<compile_context>
chip_gen: v7x
topology: tpu7x:2x2x1
jax: 0.10.0
libtpu: 0.0.40
codegen_flags: <defaults>
</compile_context>

<pallas_src>
import functools

import jax
import jax.numpy as jnp
from jax.experimental import pallas as pl
from jax.experimental.pallas import tpu as pltpu


# ---------------------------------------------------------------------------
# Fused per-scale kernel: 6 (conv -> BN -> ReLU) matmuls with the per-batch
# max-pool interleaved after each pooled layer.  One grid step == one scale,
# M = B * NMAX points at once.
# ---------------------------------------------------------------------------
def _convstack_kernel(B, NMAX,
                      x_ref,
                      w1, b1, w2, b2, w3, b3, w4, b4, w5, b5, w6, b6,
                      pp_ref, pooled_ref):
    def lin(h_bf16, w_r, b_r):
        # bf16 x bf16 -> f32 accumulate on the MXU; bias + ReLU in f32.
        y = jnp.dot(h_bf16, w_r[0], preferred_element_type=jnp.float32)
        return jnp.maximum(y + b_r[0], 0.0)

    def pool_into(h, lo):
        # Per-batch max over the NMAX point rows -> [B, C], stored directly
        # into its lane range of the 1920-wide pooled output.  `lo` and C are
        # multiples of 128, so the store is lane-aligned / unmasked; the
        # cross-sublane reduce runs on the XLU while the MXU pushes the next
        # layer's matmul.  The [M,C]->[B,NMAX,C] reshape splits sublanes at a
        # multiple of 8, so it is layout-free.
        c = h.shape[-1]
        pooled_ref[0, :, lo:lo + c] = jnp.max(h.reshape(B, NMAX, c), axis=1)

    x = x_ref[0]                                         # [M, 8] bf16 (3 real ch)
    # Layer 1: K=8 matmul — tiny; kept on the MXU (sub-µs either way).
    h = lin(x, w1, b1)                                   # [M, 64]
    h = lin(h.astype(jnp.bfloat16), w2, b2)              # [M, 64]
    h128 = lin(h.astype(jnp.bfloat16), w3, b3)           # [M, 128]

    # Per-point 128-d features (x_128_squeezed).  Written early so the
    # writeback overlaps the remaining matmuls.  Only scale 0 is consumed
    # downstream; the extra scale writes are ~128 KiB total.
    pp_ref[0] = h128

    # PyTorch concat order: [x_1024 | x_512 | x_256 | x_128] -> 1920 lanes.
    pool_into(h128, 1792)                                # lanes 1792:1920
    h256 = lin(h128.astype(jnp.bfloat16), w4, b4)        # [M, 256]
    pool_into(h256, 1536)                                # lanes 1536:1792
    h512 = lin(h256.astype(jnp.bfloat16), w5, b5)        # [M, 512]
    pool_into(h512, 1024)                                # lanes 1024:1536
    h1024 = lin(h512.astype(jnp.bfloat16), w6, b6)       # [M, 1024]
    pool_into(h1024, 0)                                  # lanes 0:1024


def convstack_call(x_all, layer_ws, layer_bs, B, NMAX):
    S, M, CIN0 = x_all.shape

    in_specs = [pl.BlockSpec((1, M, CIN0), lambda s: (s, 0, 0))]
    flat = [x_all]
    for w, b in zip(layer_ws, layer_bs):
        cin, cout = w.shape[1], w.shape[2]
        in_specs.append(pl.BlockSpec((1, cin, cout), lambda s: (s, 0, 0)))
        in_specs.append(pl.BlockSpec((1, 1, cout), lambda s: (s, 0, 0)))
        flat += [w, b]

    out_shape = (
        jax.ShapeDtypeStruct((S, M, 128), jnp.float32),   # per-point x_128
        jax.ShapeDtypeStruct((S, B, 1920), jnp.float32),  # pooled per scale
    )
    out_specs = (
        pl.BlockSpec((1, M, 128), lambda s: (s, 0, 0)),
        pl.BlockSpec((1, B, 1920), lambda s: (s, 0, 0)),
    )

    kernel = functools.partial(_convstack_kernel, B, NMAX)
    return pl.pallas_call(
        kernel,
        out_shape=out_shape,
        grid_spec=pltpu.PrefetchScalarGridSpec(
            num_scalar_prefetch=0, grid=(S,),
            in_specs=in_specs, out_specs=out_specs),
        compiler_params=pltpu.CompilerParams(
            dimension_semantics=("parallel",)),
    )(*flat)


# ---------------------------------------------------------------------------
# One-time weight preparation (hoisted out of the per-call forward):
# pad layer-1 channels 3 -> 8, stack per-scale weights per layer, cast the
# matmul weights to bf16.  Call once; reuse the result for every forward.
# ---------------------------------------------------------------------------
def prepare_conv_weights(conv_params_list):
    S = len(conv_params_list)
    n_layers = len(conv_params_list[0])
    layer_ws, layer_bs = [], []
    for l in range(n_layers):
        ws, bs = [], []
        for s in range(S):
            w, b = conv_params_list[s][l]
            if l == 0:
                w = jnp.pad(w, ((0, 8 - w.shape[0]), (0, 0)))
            ws.append(w)
            bs.append(b)
        layer_ws.append(jnp.stack(ws, axis=0).astype(jnp.bfloat16))  # [S,cin,cout]
        layer_bs.append(jnp.stack(bs, axis=0))                       # [S,1,cout] f32
    return layer_ws, layer_bs


# ---------------------------------------------------------------------------
# Deterministic parameter init (BN folded into conv weight/bias).
# ---------------------------------------------------------------------------
def init_convlayer_params(key):
    dims = [(3, 64), (64, 64), (64, 128), (128, 256), (256, 512), (512, 1024)]
    params = []
    for (cin, cout) in dims:
        key, kw, kb, kg, kbe, km, kv = jax.random.split(key, 7)
        w = jax.random.normal(kw, (cin, cout), jnp.float32) / jnp.sqrt(cin)
        b = 0.1 * jax.random.normal(kb, (cout,), jnp.float32)
        gamma = jax.random.uniform(kg, (cout,), jnp.float32, minval=0.5, maxval=1.5)
        beta = 0.1 * jax.random.normal(kbe, (cout,), jnp.float32)
        mean = 0.1 * jax.random.normal(km, (cout,), jnp.float32)
        var = jax.random.uniform(kv, (cout,), jnp.float32, minval=0.5, maxval=1.5)
        s = gamma / jnp.sqrt(var + 1e-5)
        w_f = w * s[None, :]
        b_f = ((b - mean) * s + beta).reshape(1, cout)
        params.append((w_f, b_f))
    return params, key


def init_fuse_params(key):
    key, kw, kb, kg, kbe, km, kv = jax.random.split(key, 7)
    w = jax.random.normal(kw, (3, 1), jnp.float32) / jnp.sqrt(3.0)
    b = 0.1 * jax.random.normal(kb, (1,), jnp.float32)
    gamma = jax.random.uniform(kg, (1,), jnp.float32, minval=0.5, maxval=1.5)
    beta = 0.1 * jax.random.normal(kbe, (1,), jnp.float32)
    mean = 0.1 * jax.random.normal(km, (1,), jnp.float32)
    var = jax.random.uniform(kv, (1,), jnp.float32, minval=0.5, maxval=1.5)
    s = gamma / jnp.sqrt(var + 1e-5)
    return w * s, ((b - mean) * s + beta).reshape(1, 1), key


# ---------------------------------------------------------------------------
# Latentfeature forward (thin glue around the single Pallas kernel).
# Takes the PRE-PREPARED stacked bf16 weights; jit the whole thing.
# ---------------------------------------------------------------------------
def latentfeature_forward(xs, layer_ws, layer_bs, fuse_w, fuse_b):
    B = xs[0].shape[0]
    Ns = [x.shape[1] for x in xs]
    N0 = Ns[0]
    NMAX = max(Ns)
    M = B * NMAX

    # Pad every scale to NMAX points by tiling its own points (the max-pool is
    # unchanged by duplicates) and pad channels 3 -> 8 for the MXU matmul.
    xp = []
    for x in xs:
        N = x.shape[1]
        reps = -(-NMAX // N)
        xt = jnp.tile(x, (1, reps, 1))[:, :NMAX, :]            # [B, NMAX, 3]
        xt = jnp.pad(xt, ((0, 0), (0, 0), (0, 8 - xt.shape[-1])))
        xp.append(xt.reshape(M, 8))
    x_all = jnp.stack(xp, axis=0).astype(jnp.bfloat16)          # [S, M, 8]

    pp, pooled = convstack_call(x_all, layer_ws, layer_bs, B, NMAX)

    # per-point 128-d features for scale 0 (x_128_squeezed): [B, 128, N0]
    points_features = pp[0].reshape(B, NMAX, 128)[:, :N0, :]
    points_features = jnp.transpose(points_features, (0, 2, 1))

    # Conv1d(3,1,1) + BN1d(1) + ReLU fuse: ~5.7 KFLOP, done in plain JAX
    # (a dedicated pallas_call would cost more in launch than compute).
    latent = jnp.maximum(
        jnp.einsum('s,sbf->bf', fuse_w[:, 0], pooled) + fuse_b[0, 0], 0.0)  # [B,1920]

    seg = jnp.broadcast_to(latent[:, :, None], (B, 1920, N0))
    segfeatures = jnp.concatenate([points_features, seg], axis=1)   # [B, 2048, N0]
    return latent, segfeatures


latentfeature_forward_jit = jax.jit(latentfeature_forward)


# ---------------------------------------------------------------------------
# Pure-JAX reference (same bf16-matmul / f32-accumulate numerics).
# ---------------------------------------------------------------------------
def reference_forward(xs, conv_params_list, fuse_w, fuse_b):
    pooled, pts = [], None
    for s, x in enumerate(xs):
        h = x
        acts = []
        for (w, b) in conv_params_list[s]:
            y = jnp.einsum('bnc,cd->bnd',
                           h.astype(jnp.bfloat16), w.astype(jnp.bfloat16),
                           preferred_element_type=jnp.float32)
            h = jnp.maximum(y + b[0], 0.0)
            acts.append(h)
        h128, h256, h512, h1024 = acts[2], acts[3], acts[4], acts[5]
        pooled.append(jnp.concatenate(
            [h1024.max(1), h512.max(1), h256.max(1), h128.max(1)], axis=-1))
        if s == 0:
            pts = jnp.transpose(h128, (0, 2, 1))
    lf3 = jnp.stack(pooled, axis=0)                                  # [S, B, 1920]
    latent = jnp.maximum(
        jnp.einsum('s,sbf->bf', fuse_w[:, 0], lf3) + fuse_b[0, 0], 0.0)
    B, N0 = latent.shape[0], xs[0].shape[1]
    seg = jnp.broadcast_to(latent[:, :, None], (B, 1920, N0))
    return latent, jnp.concatenate([pts, seg], axis=1)


if __name__ == "__main__":
    key = jax.random.PRNGKey(0)
    B = 2
    # num_scales=3, each_scales_size=1 (required by Conv1d(3,1,1) in the module)
    point_scales_list = [64, 32, 16]

    conv_params_list = []
    for _ in range(3):
        p, key = init_convlayer_params(key)
        conv_params_list.append(p)
    fuse_w, fuse_b, key = init_fuse_params(key)

    xs = []
    for N in point_scales_list:
        key, kx = jax.random.split(key)
        xs.append(jax.random.normal(kx, (B, N, 3), jnp.float32))

    # One-time weight preparation (hoisted out of the per-call forward).
    layer_ws, layer_bs = prepare_conv_weights(conv_params_list)
    layer_ws, layer_bs = jax.block_until_ready((layer_ws, layer_bs))

    latent, seg = latentfeature_forward_jit(xs, layer_ws, layer_bs, fuse_w, fuse_b)
    jax.block_until_ready((latent, seg))

    assert latent.shape == (B, 1920) and latent.dtype == jnp.float32
    assert seg.shape == (B, 2048, point_scales_list[0]) and seg.dtype == jnp.float32

    latent_ref, seg_ref = reference_forward(xs, conv_params_list, fuse_w, fuse_b)
    assert jnp.allclose(latent, latent_ref, rtol=5e-2, atol=5e-2)
    assert jnp.allclose(seg, seg_ref, rtol=5e-2, atol=5e-2)

    print("KERNEL_OK")
</pallas_src>

<mosaic_0001>
module attributes {stable_mosaic.version = 11 : i64} {
  func.func @_convstack_kernel(%arg0: i32, %arg1: memref<1x128x8xbf16, #tpu.memory_space<vmem>>, %arg2: memref<1x8x64xbf16, #tpu.memory_space<vmem>>, %arg3: memref<1x1x64xf32, #tpu.memory_space<vmem>>, %arg4: memref<1x64x64xbf16, #tpu.memory_space<vmem>>, %arg5: memref<1x1x64xf32, #tpu.memory_space<vmem>>, %arg6: memref<1x64x128xbf16, #tpu.memory_space<vmem>>, %arg7: memref<1x1x128xf32, #tpu.memory_space<vmem>>, %arg8: memref<1x128x256xbf16, #tpu.memory_space<vmem>>, %arg9: memref<1x1x256xf32, #tpu.memory_space<vmem>>, %arg10: memref<1x256x512xbf16, #tpu.memory_space<vmem>>, %arg11: memref<1x1x512xf32, #tpu.memory_space<vmem>>, %arg12: memref<1x512x1024xbf16, #tpu.memory_space<vmem>>, %arg13: memref<1x1x1024xf32, #tpu.memory_space<vmem>>, %arg14: memref<1x128x128xf32, #tpu.memory_space<vmem>>, %arg15: memref<1x2x1920xf32, #tpu.memory_space<vmem>>) attributes {dimension_semantics = [#tpu.dimension_semantics<parallel>], iteration_bounds = array<i64: 3>, scalar_prefetch = 0 : i64, scratch_operands = 0 : i64, tpu.core_type = #tpu.core_type<tc>, window_params = [{transform_indices = @transform_0, window_bounds = array<i64: 1, 128, 8>}, {transform_indices = @transform_1, window_bounds = array<i64: 1, 8, 64>}, {transform_indices = @transform_2, window_bounds = array<i64: 1, 1, 64>}, {transform_indices = @transform_3, window_bounds = array<i64: 1, 64, 64>}, {transform_indices = @transform_4, window_bounds = array<i64: 1, 1, 64>}, {transform_indices = @transform_5, window_bounds = array<i64: 1, 64, 128>}, {transform_indices = @transform_6, window_bounds = array<i64: 1, 1, 128>}, {transform_indices = @transform_7, window_bounds = array<i64: 1, 128, 256>}, {transform_indices = @transform_8, window_bounds = array<i64: 1, 1, 256>}, {transform_indices = @transform_9, window_bounds = array<i64: 1, 256, 512>}, {transform_indices = @transform_10, window_bounds = array<i64: 1, 1, 512>}, {transform_indices = @transform_11, window_bounds = array<i64: 1, 512, 1024>}, {transform_indices = @transform_12, window_bounds = array<i64: 1, 1, 1024>}, {transform_indices = @transform_13, window_bounds = array<i64: 1, 128, 128>}, {transform_indices = @transform_14, window_bounds = array<i64: 1, 2, 1920>}]} {
    %c0 = arith.constant 0 : index
    %c0_0 = arith.constant 0 : index
    %c0_1 = arith.constant 0 : index
    %0 = vector.load %arg1[%c0, %c0_0, %c0_1] : memref<1x128x8xbf16, #tpu.memory_space<vmem>>, vector<1x128x8xbf16>
    %1 = vector.shape_cast %0 : vector<1x128x8xbf16> to vector<128x8xbf16>
    %c0_2 = arith.constant 0 : index
    %c0_3 = arith.constant 0 : index
    %c0_4 = arith.constant 0 : index
    %2 = vector.load %arg2[%c0_2, %c0_3, %c0_4] : memref<1x8x64xbf16, #tpu.memory_space<vmem>>, vector<1x8x64xbf16>
    %3 = vector.shape_cast %2 : vector<1x8x64xbf16> to vector<8x64xbf16>
    %cst = arith.constant dense<0.000000e+00> : vector<128x64xf32>
    %4 = tpu.matmul %1, %3, %cst {dimension_numbers = #tpu.dot_dimension_numbers<[1], [0], [0], [1], [0, 0, 1, 1], [], []>} : vector<128x8xbf16>, vector<8x64xbf16>, vector<128x64xf32> -> vector<128x64xf32>
    %c0_5 = arith.constant 0 : index
    %c0_6 = arith.constant 0 : index
    %c0_7 = arith.constant 0 : index
    %5 = vector.load %arg3[%c0_5, %c0_6, %c0_7] : memref<1x1x64xf32, #tpu.memory_space<vmem>>, vector<1x1x64xf32>
    %6 = vector.shape_cast %5 : vector<1x1x64xf32> to vector<1x64xf32>
    %7 = vector.broadcast %6 : vector<1x64xf32> to vector<128x64xf32>
    %8 = arith.addf %4, %7 : vector<128x64xf32>
    %cst_8 = arith.constant 0.000000e+00 : f32
    %9 = vector.broadcast %cst_8 : f32 to vector<128x64xf32>
    %10 = arith.maximumf %8, %9 : vector<128x64xf32>
    %11 = arith.truncf %10 : vector<128x64xf32> to vector<128x64xbf16>
    %c0_9 = arith.constant 0 : index
    %c0_10 = arith.constant 0 : index
    %c0_11 = arith.constant 0 : index
    %12 = vector.load %arg4[%c0_9, %c0_10, %c0_11] : memref<1x64x64xbf16, #tpu.memory_space<vmem>>, vector<1x64x64xbf16>
    %13 = vector.shape_cast %12 : vector<1x64x64xbf16> to vector<64x64xbf16>
    %cst_12 = arith.constant dense<0.000000e+00> : vector<128x64xf32>
    %14 = tpu.matmul %11, %13, %cst_12 {dimension_numbers = #tpu.dot_dimension_numbers<[1], [0], [0], [1], [0, 0, 1, 1], [], []>} : vector<128x64xbf16>, vector<64x64xbf16>, vector<128x64xf32> -> vector<128x64xf32>
    %c0_13 = arith.constant 0 : index
    %c0_14 = arith.constant 0 : index
    %c0_15 = arith.constant 0 : index
    %15 = vector.load %arg5[%c0_13, %c0_14, %c0_15] : memref<1x1x64xf32, #tpu.memory_space<vmem>>, vector<1x1x64xf32>
    %16 = vector.shape_cast %15 : vector<1x1x64xf32> to vector<1x64xf32>
    %17 = vector.broadcast %16 : vector<1x64xf32> to vector<128x64xf32>
    %18 = arith.addf %14, %17 : vector<128x64xf32>
    %cst_16 = arith.constant 0.000000e+00 : f32
    %19 = vector.broadcast %cst_16 : f32 to vector<128x64xf32>
    %20 = arith.maximumf %18, %19 : vector<128x64xf32>
    %21 = arith.truncf %20 : vector<128x64xf32> to vector<128x64xbf16>
    %c0_17 = arith.constant 0 : index
    %c0_18 = arith.constant 0 : index
    %c0_19 = arith.constant 0 : index
    %22 = vector.load %arg6[%c0_17, %c0_18, %c0_19] : memref<1x64x128xbf16, #tpu.memory_space<vmem>>, vector<1x64x128xbf16>
    %23 = vector.shape_cast %22 : vector<1x64x128xbf16> to vector<64x128xbf16>
    %cst_20 = arith.constant dense<0.000000e+00> : vector<128x128xf32>
    %24 = tpu.matmul %21, %23, %cst_20 {dimension_numbers = #tpu.dot_dimension_numbers<[1], [0], [0], [1], [0, 0, 1, 1], [], []>} : vector<128x64xbf16>, vector<64x128xbf16>, vector<128x128xf32> -> vector<128x128xf32>
    %c0_21 = arith.constant 0 : index
    %c0_22 = arith.constant 0 : index
    %c0_23 = arith.constant 0 : index
    %25 = vector.load %arg7[%c0_21, %c0_22, %c0_23] : memref<1x1x128xf32, #tpu.memory_space<vmem>>, vector<1x1x128xf32>
    %26 = vector.shape_cast %25 : vector<1x1x128xf32> to vector<1x128xf32>
    %27 = vector.broadcast %26 : vector<1x128xf32> to vector<128x128xf32>
    %28 = arith.addf %24, %27 : vector<128x128xf32>
    %cst_24 = arith.constant 0.000000e+00 : f32
    %29 = vector.broadcast %cst_24 : f32 to vector<128x128xf32>
    %30 = arith.maximumf %28, %29 : vector<128x128xf32>
    %c0_25 = arith.constant 0 : index
    %c0_26 = arith.constant 0 : index
    %c0_27 = arith.constant 0 : index
    %31 = vector.load %arg14[%c0_25, %c0_26, %c0_27] : memref<1x128x128xf32, #tpu.memory_space<vmem>>, vector<1x128x128xf32>
    %32 = vector.shape_cast %31 : vector<1x128x128xf32> to vector<128x128xf32>
    %33 = vector.shape_cast %30 : vector<128x128xf32> to vector<1x128x128xf32>
    tpu.vector_store %arg14[%c0_25, %c0_26, %c0_27], %33 {strides = array<i32>} : memref<1x128x128xf32, #tpu.memory_space<vmem>>, vector<1x128x128xf32>,
    %34 = vector.shape_cast %30 : vector<128x128xf32> to vector<2x64x128xf32>
    %cst_28 = arith.constant dense<0xFF800000> : vector<2x128xf32>
    %35 = vector.multi_reduction <maximumf>, %34, %cst_28 [1] : vector<2x64x128xf32> to vector<2x128xf32>
    %c0_29 = arith.constant 0 : index
    %c0_30 = arith.constant 0 : index
    %c1792 = arith.constant 1792 : index
    %36 = vector.load %arg15[%c0_29, %c0_30, %c1792] : memref<1x2x1920xf32, #tpu.memory_space<vmem>>, vector<1x2x128xf32>
    %37 = vector.shape_cast %36 : vector<1x2x128xf32> to vector<2x128xf32>
    %38 = vector.shape_cast %35 : vector<2x128xf32> to vector<1x2x128xf32>
    tpu.vector_store %arg15[%c0_29, %c0_30, %c1792], %38 {strides = array<i32>} : memref<1x2x1920xf32, #tpu.memory_space<vmem>>, vector<1x2x128xf32>,
    %39 = arith.truncf %30 : vector<128x128xf32> to vector<128x128xbf16>
    %c0_31 = arith.constant 0 : index
    %c0_32 = arith.constant 0 : index
    %c0_33 = arith.constant 0 : index
    %40 = vector.load %arg8[%c0_31, %c0_32, %c0_33] : memref<1x128x256xbf16, #tpu.memory_space<vmem>>, vector<1x128x256xbf16>
    %41 = vector.shape_cast %40 : vector<1x128x256xbf16> to vector<128x256xbf16>
    %cst_34 = arith.constant dense<0.000000e+00> : vector<128x256xf32>
    %42 = tpu.matmul %39, %41, %cst_34 {dimension_numbers = #tpu.dot_dimension_numbers<[1], [0], [0], [1], [0, 0, 1, 1], [], []>} : vector<128x128xbf16>, vector<128x256xbf16>, vector<128x256xf32> -> vector<128x256xf32>
    %c0_35 = arith.constant 0 : index
    %c0_36 = arith.constant 0 : index
    %c0_37 = arith.constant 0 : index
    %43 = vector.load %arg9[%c0_35, %c0_36, %c0_37] : memref<1x1x256xf32, #tpu.memory_space<vmem>>, vector<1x1x256xf32>
    %44 = vector.shape_cast %43 : vector<1x1x256xf32> to vector<1x256xf32>
    %45 = vector.broadcast %44 : vector<1x256xf32> to vector<128x256xf32>
    %46 = arith.addf %42, %45 : vector<128x256xf32>
    %cst_38 = arith.constant 0.000000e+00 : f32
    %47 = vector.broadcast %cst_38 : f32 to vector<128x256xf32>
    %48 = arith.maximumf %46, %47 : vector<128x256xf32>
    %49 = vector.shape_cast %48 : vector<128x256xf32> to vector<2x64x256xf32>
    %cst_39 = arith.constant dense<0xFF800000> : vector<2x256xf32>
    %50 = vector.multi_reduction <maximumf>, %49, %cst_39 [1] : vector<2x64x256xf32> to vector<2x256xf32>
    %c0_40 = arith.constant 0 : index
    %c0_41 = arith.constant 0 : index
    %c1536 = arith.constant 1536 : index
    %51 = vector.load %arg15[%c0_40, %c0_41, %c1536] : memref<1x2x1920xf32, #tpu.memory_space<vmem>>, vector<1x2x256xf32>
    %52 = vector.shape_cast %51 : vector<1x2x256xf32> to vector<2x256xf32>
    %53 = vector.shape_cast %50 : vector<2x256xf32> to vector<1x2x256xf32>
    tpu.vector_store %arg15[%c0_40, %c0_41, %c1536], %53 {strides = array<i32>} : memref<1x2x1920xf32, #tpu.memory_space<vmem>>, vector<1x2x256xf32>,
    %54 = arith.truncf %48 : vector<128x256xf32> to vector<128x256xbf16>
    %c0_42 = arith.constant 0 : index
    %c0_43 = arith.constant 0 : index
    %c0_44 = arith.constant 0 : index
    %55 = vector.load %arg10[%c0_42, %c0_43, %c0_44] : memref<1x256x512xbf16, #tpu.memory_space<vmem>>, vector<1x256x512xbf16>
    %56 = vector.shape_cast %55 : vector<1x256x512xbf16> to vector<256x512xbf16>
    %cst_45 = arith.constant dense<0.000000e+00> : vector<128x512xf32>
    %57 = tpu.matmul %54, %56, %cst_45 {dimension_numbers = #tpu.dot_dimension_numbers<[1], [0], [0], [1], [0, 0, 1, 1], [], []>} : vector<128x256xbf16>, vector<256x512xbf16>, vector<128x512xf32> -> vector<128x512xf32>
    %c0_46 = arith.constant 0 : index
    %c0_47 = arith.constant 0 : index
    %c0_48 = arith.constant 0 : index
    %58 = vector.load %arg11[%c0_46, %c0_47, %c0_48] : memref<1x1x512xf32, #tpu.memory_space<vmem>>, vector<1x1x512xf32>
    %59 = vector.shape_cast %58 : vector<1x1x512xf32> to vector<1x512xf32>
    %60 = vector.broadcast %59 : vector<1x512xf32> to vector<128x512xf32>
    %61 = arith.addf %57, %60 : vector<128x512xf32>
    %cst_49 = arith.constant 0.000000e+00 : f32
    %62 = vector.broadcast %cst_49 : f32 to vector<128x512xf32>
    %63 = arith.maximumf %61, %62 : vector<128x512xf32>
    %64 = vector.shape_cast %63 : vector<128x512xf32> to vector<2x64x512xf32>
    %cst_50 = arith.constant dense<0xFF800000> : vector<2x512xf32>
    %65 = vector.multi_reduction <maximumf>, %64, %cst_50 [1] : vector<2x64x512xf32> to vector<2x512xf32>
    %c0_51 = arith.constant 0 : index
    %c0_52 = arith.constant 0 : index
    %c1024 = arith.constant 1024 : index
    %66 = vector.load %arg15[%c0_51, %c0_52, %c1024] : memref<1x2x1920xf32, #tpu.memory_space<vmem>>, vector<1x2x512xf32>
    %67 = vector.shape_cast %66 : vector<1x2x512xf32> to vector<2x512xf32>
    %68 = vector.shape_cast %65 : vector<2x512xf32> to vector<1x2x512xf32>
    tpu.vector_store %arg15[%c0_51, %c0_52, %c1024], %68 {strides = array<i32>} : memref<1x2x1920xf32, #tpu.memory_space<vmem>>, vector<1x2x512xf32>,
    %69 = arith.truncf %63 : vector<128x512xf32> to vector<128x512xbf16>
    %c0_53 = arith.constant 0 : index
    %c0_54 = arith.constant 0 : index
    %c0_55 = arith.constant 0 : index
    %70 = vector.load %arg12[%c0_53, %c0_54, %c0_55] : memref<1x512x1024xbf16, #tpu.memory_space<vmem>>, vector<1x512x1024xbf16>
    %71 = vector.shape_cast %70 : vector<1x512x1024xbf16> to vector<512x1024xbf16>
    %cst_56 = arith.constant dense<0.000000e+00> : vector<128x1024xf32>
    %72 = tpu.matmul %69, %71, %cst_56 {dimension_numbers = #tpu.dot_dimension_numbers<[1], [0], [0], [1], [0, 0, 1, 1], [], []>} : vector<128x512xbf16>, vector<512x1024xbf16>, vector<128x1024xf32> -> vector<128x1024xf32>
    %c0_57 = arith.constant 0 : index
    %c0_58 = arith.constant 0 : index
    %c0_59 = arith.constant 0 : index
    %73 = vector.load %arg13[%c0_57, %c0_58, %c0_59] : memref<1x1x1024xf32, #tpu.memory_space<vmem>>, vector<1x1x1024xf32>
    %74 = vector.shape_cast %73 : vector<1x1x1024xf32> to vector<1x1024xf32>
    %75 = vector.broadcast %74 : vector<1x1024xf32> to vector<128x1024xf32>
    %76 = arith.addf %72, %75 : vector<128x1024xf32>
    %cst_60 = arith.constant 0.000000e+00 : f32
    %77 = vector.broadcast %cst_60 : f32 to vector<128x1024xf32>
    %78 = arith.maximumf %76, %77 : vector<128x1024xf32>
    %79 = vector.shape_cast %78 : vector<128x1024xf32> to vector<2x64x1024xf32>
    %cst_61 = arith.constant dense<0xFF800000> : vector<2x1024xf32>
    %80 = vector.multi_reduction <maximumf>, %79, %cst_61 [1] : vector<2x64x1024xf32> to vector<2x1024xf32>
    %c0_62 = arith.constant 0 : index
    %c0_63 = arith.constant 0 : index
    %c0_64 = arith.constant 0 : index
    %81 = vector.load %arg15[%c0_62, %c0_63, %c0_64] : memref<1x2x1920xf32, #tpu.memory_space<vmem>>, vector<1x2x1024xf32>
    %82 = vector.shape_cast %81 : vector<1x2x1024xf32> to vector<2x1024xf32>
    %83 = vector.shape_cast %80 : vector<2x1024xf32> to vector<1x2x1024xf32>
    tpu.vector_store %arg15[%c0_62, %c0_63, %c0_64], %83 {strides = array<i32>} : memref<1x2x1920xf32, #tpu.memory_space<vmem>>, vector<1x2x1024xf32>,
    return
  }
  func.func @transform_0(%arg0: i32) -> (i32, i32, i32) {
    %c0_i32 = arith.constant 0 : i32
    %c0_i32_0 = arith.constant 0 : i32
    %c0_i32_1 = arith.constant 0 : i32
    return %arg0, %c0_i32, %c0_i32_0 : i32, i32, i32
  }
  func.func @transform_1(%arg0: i32) -> (i32, i32, i32) {
    %c0_i32 = arith.constant 0 : i32
    %c0_i32_0 = arith.constant 0 : i32
    %c0_i32_1 = arith.constant 0 : i32
    return %arg0, %c0_i32, %c0_i32_0 : i32, i32, i32
  }
  func.func @transform_2(%arg0: i32) -> (i32, i32, i32) {
    %c0_i32 = arith.constant 0 : i32
    %c0_i32_0 = arith.constant 0 : i32
    %c0_i32_1 = arith.constant 0 : i32
    return %arg0, %c0_i32, %c0_i32_0 : i32, i32, i32
  }
  func.func @transform_3(%arg0: i32) -> (i32, i32, i32) {
    %c0_i32 = arith.constant 0 : i32
    %c0_i32_0 = arith.constant 0 : i32
    %c0_i32_1 = arith.constant 0 : i32
    return %arg0, %c0_i32, %c0_i32_0 : i32, i32, i32
  }
  func.func @transform_4(%arg0: i32) -> (i32, i32, i32) {
    %c0_i32 = arith.constant 0 : i32
    %c0_i32_0 = arith.constant 0 : i32
    %c0_i32_1 = arith.constant 0 : i32
    return %arg0, %c0_i32, %c0_i32_0 : i32, i32, i32
  }
  func.func @transform_5(%arg0: i32) -> (i32, i32, i32) {
    %c0_i32 = arith.constant 0 : i32
    %c0_i32_0 = arith.constant 0 : i32
    %c0_i32_1 = arith.constant 0 : i32
    return %arg0, %c0_i32, %c0_i32_0 : i32, i32, i32
  }
  func.func @transform_6(%arg0: i32) -> (i32, i32, i32) {
    %c0_i32 = arith.constant 0 : i32
    %c0_i32_0 = arith.constant 0 : i32
    %c0_i32_1 = arith.constant 0 : i32
    return %arg0, %c0_i32, %c0_i32_0 : i32, i32, i32
  }
  func.func @transform_7(%arg0: i32) -> (i32, i32, i32) {
    %c0_i32 = arith.constant 0 : i32
    %c0_i32_0 = arith.constant 0 : i32
    %c0_i32_1 = arith.constant 0 : i32
    return %arg0, %c0_i32, %c0_i32_0 : i32, i32, i32
  }
  func.func @transform_8(%arg0: i32) -> (i32, i32, i32) {
    %c0_i32 = arith.constant 0 : i32
    %c0_i32_0 = arith.constant 0 : i32
    %c0_i32_1 = arith.constant 0 : i32
    return %arg0, %c0_i32, %c0_i32_0 : i32, i32, i32
  }
  func.func @transform_9(%arg0: i32) -> (i32, i32, i32) {
    %c0_i32 = arith.constant 0 : i32
    %c0_i32_0 = arith.constant 0 : i32
    %c0_i32_1 = arith.constant 0 : i32
    return %arg0, %c0_i32, %c0_i32_0 : i32, i32, i32
  }
  func.func @transform_10(%arg0: i32) -> (i32, i32, i32) {
    %c0_i32 = arith.constant 0 : i32
    %c0_i32_0 = arith.constant 0 : i32
    %c0_i32_1 = arith.constant 0 : i32
    return %arg0, %c0_i32, %c0_i32_0 : i32, i32, i32
  }
  func.func @transform_11(%arg0: i32) -> (i32, i32, i32) {
    %c0_i32 = arith.constant 0 : i32
    %c0_i32_0 = arith.constant 0 : i32
    %c0_i32_1 = arith.constant 0 : i32
    return %arg0, %c0_i32, %c0_i32_0 : i32, i32, i32
  }
  func.func @transform_12(%arg0: i32) -> (i32, i32, i32) {
    %c0_i32 = arith.constant 0 : i32
    %c0_i32_0 = arith.constant 0 : i32
    %c0_i32_1 = arith.constant 0 : i32
    return %arg0, %c0_i32, %c0_i32_0 : i32, i32, i32
  }
  func.func @transform_13(%arg0: i32) -> (i32, i32, i32) {
    %c0_i32 = arith.constant 0 : i32
    %c0_i32_0 = arith.constant 0 : i32
    %c0_i32_1 = arith.constant 0 : i32
    return %arg0, %c0_i32, %c0_i32_0 : i32, i32, i32
  }
  func.func @transform_14(%arg0: i32) -> (i32, i32, i32) {
    %c0_i32 = arith.constant 0 : i32
    %c0_i32_0 = arith.constant 0 : i32
    %c0_i32_1 = arith.constant 0 : i32
    return %arg0, %c0_i32, %c0_i32_0 : i32, i32, i32
  }
}

</mosaic_0001>

<bundles_post_ra>
// kernel: tile.1
= control target key start
LH: loop header
LB: loop body
LE: loop exit
PB: predicated region body
PF: predicated region fallthrough
CT: control target
= control target key end

     0   :  { %s111_s18 = smov 48  ;;  %vm100_vm0 = vcmask 1045508   ;;  %vm102_vm1 = vcmask 261120   ;;  %s158_s19 = smov 32   ;;  %vm117_vm2 = vcmask 523520   ;;  %v159_v22 = vmov 0.0   ;;  %s197_s0 = inlined_call_operand.vmem [shape: bf16[2,2,32,3], index: 0, kind: input, shape index: {}]   ;;  %s198_s1 = inlined_call_operand.vmem [shape: bf16[2,64,3], index: 1, kind: output, shape index: {}]  }
   0x1   :  { %v149_v0 = vld [vmem:[%s197_s0 + $0x5] sm:$0x1]  ;;  %v150_v1 = vld [vmem:[%s197_s0 + $0x4] sm:$0x1]  ;;  %v151_v2 = vld [vmem:[%s197_s0 + $0x3] sm:$0x1] }
   0x2   :  { %v17_v3 = vunpack.c.l.bf16 %v149_v0  ;;  %v33_v4 = vunpack.c.l.bf16 %v150_v1  ;;  %v49_v5 = vunpack.c.l.bf16 %v151_v2  ;;  %v152_v6 = vld [vmem:[%s197_s0 + $0x2] sm:$0x1]  ;;  %v153_v7 = vld [vmem:[%s197_s0 + $0x1] sm:$0x1]  ;;  %v93_v8 = vld [vmem:[%s197_s0] sm:$0x1] }
   0x3   :  { %v65_v9 = vunpack.c.l.bf16 %v152_v6  ;;  %v80_v10 = vunpack.c.l.bf16 %v153_v7  ;;  %v94_v11 = vunpack.c.l.bf16 %v93_v8  ;;  %s98_s0 = smov 48 }
   0x4   :  { %20 = vst [vmem:[#allocation1 + $0x28] sm:$0x3] %v17_v3  ;;  %36 = vst [vmem:[#allocation1 + $0x20] sm:$0x3] %v33_v4 }
   0x5   :  { %52 = vst [vmem:[#allocation1 + $0x18] sm:$0x3] %v49_v5  ;;  %68 = vst [vmem:[#allocation1 + $0x10] sm:$0x3] %v65_v9 }
   0x6   :  { %83 = vst [vmem:[#allocation1 + $0x8] sm:$0x3] %v80_v10  ;;  %96 = vst [vmem:[#allocation1] sm:$0x3] %v94_v11 }
   0xd   :  { %v97_v12 = vld [vmem:[#allocation1] ss:$8 sm:$0xf]   ;;  %v109_v15 = vld [vmem:[#allocation1 + $0x1] ss:$8 sm:$0xf]  }
   0xe   :  { %v99_v13 = vld [vmem:[#allocation1] ss:$8 sm:%s98_s0]   ;;  %v112_v16 = vld [vmem:[#allocation1 + $0x1] ss:$8 sm:%s111_s18]  }
   0xf   :  { %v101_v14 = vsel %vm100_vm0, %v99_v13, %v97_v12  ;;  %v114_v17 = vsel %vm100_vm0, %v112_v16, %v109_v15 }
  0x10   :  { %103 = vst.msk [vmem:[#allocation0] sm:$0x3] %vm102_vm1, %v101_v14   ;;  %105 = vst.msk [vmem:[#allocation0 + $0x6] sm:$0xc] %vm102_vm1, %v101_v14   ;;  %115 = vrot.lane.b32.xlu0 %v114_v17, %s158_s19 }
  0x11   :  { %107 = vst.msk [vmem:[#allocation0 + $0xc] sm:$0x30] %vm102_vm1, %v101_v14  }
  0x82   :  { %v116_v18 = vpop.permute.xlu0 %115  }
  0x83   :  { %118 = vst.msk [vmem:[#allocation0] sm:$0x3] %vm117_vm2, %v116_v18   ;;  %120 = vst.msk [vmem:[#allocation0 + $0x6] sm:$0xc] %vm117_vm2, %v116_v18  }
  0x84   :  { %122 = vst.msk [vmem:[#allocation0 + $0xc] sm:$0x30] %vm117_vm2, %v116_v18  }
  0x8a   :  { %v127_v19 = vld [vmem:[#allocation0] sm:$0x3]  ;;  %v132_v20 = vld [vmem:[#allocation0 + $0x8] sm:$0x3] }
  0x8b   :  { %v138_v21 = vld [vmem:[#allocation0 + $0x10] sm:$0x3]  ;;  %v128_v23 = vpack.c.bf16 %v159_v22, %v127_v19  ;;  %v133_v24 = vpack.c.bf16 %v159_v22, %v132_v20 }
  0x8c   :  { %v139_v25 = vpack.c.bf16 %v159_v22, %v138_v21 }
  0x8d   :  { %130 = vst [vmem:[%s198_s1] sm:$0x1] %v128_v23  ;;  %154 = vst [vmem:[%s198_s1 + $0x1] sm:$0x1] %v133_v24 }
  0x8e   :  { %155 = vst [vmem:[%s198_s1 + $0x2] sm:$0x1] %v139_v25 }

// kernel: tile.0
= control target key start
LH: loop header
LB: loop body
LE: loop exit
PB: predicated region body
PF: predicated region fallthrough
CT: control target
= control target key end

     0   :  { %vm100_vm0 = vcmask 1045508   ;;  %s126_s10 = smov 48  ;;  %s141_s11 = smov 48  ;;  %vm102_vm1 = vcmask 130048   ;;  %vm117_vm2 = vcmask 523648   ;;  %vm132_vm3 = vcmask 392448   ;;  %s223_s0 = inlined_call_operand.vmem [shape: bf16[2,4,16,3], index: 0, kind: input, shape index: {}]   ;;  %s224_s1 = inlined_call_operand.vmem [shape: bf16[2,64,3], index: 1, kind: output, shape index: {}]  }
   0x1   :  { %v179_v0 = vld [vmem:[%s223_s0 + $0x4] sm:$0xff]   ;;  %v183_v1 = vld [vmem:[%s223_s0] sm:$0xf]   ;;  %s111_s0 = smov 48  ;;  %s98_s12 = smov 48  ;;  %vm147_vm4 = vcmask 261248  }
   0x2   :  { %v17_v2 = vunpack.c.h.bf16 %v179_v0  ;;  %v49_v3 = vunpack.c.l.bf16 %v179_v0  ;;  %v80_v4 = vunpack.c.l.bf16 %v183_v1  ;;  %s190_s13 = smov 48   ;;  %s191_s14 = smov 16   ;;  %v193_v23 = vmov 0.0  }
   0x3   :  { %s192_s15 = smov 32  }
   0x4   :  { %20 = vst [vmem:[#allocation1 + $0x20] ss:$8 sps:$4 sm:$0xff] %v17_v2   ;;  %52 = vst [vmem:[#allocation1 + $0x10] ss:$8 sps:$4 sm:$0xff] %v49_v3  }
   0x5   :  { %83 = vst [vmem:[#allocation1] ss:$8 sps:$4 sm:$0xff] %v80_v4  }
   0xc   :  { %v109_v5 = vld [vmem:[#allocation1 + $0x3] ss:$8 sm:$0xf]   ;;  %v124_v8 = vld [vmem:[#allocation1 + $0x2] ss:$8 sm:$0xf]  }
   0xd   :  { %v112_v6 = vld [vmem:[#allocation1 + $0x3] ss:$8 sm:%s111_s0]   ;;  %v127_v9 = vld [vmem:[#allocation1 + $0x2] ss:$8 sm:%s126_s10]   ;;  %v142_v11 = vld [vmem:[#allocation1 + $0x1] ss:$8 sm:%s141_s11]  }
   0xe   :  { %v114_v7 = vsel %vm100_vm0, %v112_v6, %v109_v5  ;;  %v139_v10 = vld [vmem:[#allocation1 + $0x1] ss:$8 sm:$0xf]   ;;  %v129_v12 = vsel %vm100_vm0, %v127_v9, %v124_v8  ;;  %v97_v14 = vld [vmem:[#allocation1] ss:$8 sm:$0xf]  }
   0xf   :  { %115 = vrot.lane.b32.xlu0 %v114_v7, %s190_s13  ;;  %v144_v13 = vsel %vm100_vm0, %v142_v11, %v139_v10  ;;  %v99_v15 = vld [vmem:[#allocation1] ss:$8 sm:%s98_s12]  }
  0x10   :  { %145 = vrot.lane.b32.xlu1 %v144_v13, %s191_s14  ;;  %v101_v16 = vsel %vm100_vm0, %v99_v15, %v97_v14 }
  0x11   :  { %103 = vst.msk [vmem:[#allocation0] sm:$0x3] %vm102_vm1, %v101_v16   ;;  %105 = vst.msk [vmem:[#allocation0 + $0x6] sm:$0xc] %vm102_vm1, %v101_v16  }
  0x12   :  { %107 = vst.msk [vmem:[#allocation0 + $0xc] sm:$0x30] %vm102_vm1, %v101_v16  }
  0x13   :  { %130 = vrot.lane.b32.xlu0 %v129_v12, %s192_s15 }
  0x81   :  { %v116_v17 = vpop.permute.xlu0 %115  }
  0x82   :  { %118 = vst.msk [vmem:[#allocation0] sm:$0x3] %vm117_vm2, %v116_v17   ;;  %120 = vst.msk [vmem:[#allocation0 + $0x6] sm:$0xc] %vm117_vm2, %v116_v17   ;;  %v146_v18 = vpop.permute.xlu1 %145  }
  0x83   :  { %122 = vst.msk [vmem:[#allocation0 + $0xc] sm:$0x30] %vm117_vm2, %v116_v17  }
  0x85   :  { %v131_v19 = vpop.permute.xlu0 %130  }
  0x86   :  { %133 = vst.msk [vmem:[#allocation0] sm:$0x3] %vm132_vm3, %v131_v19   ;;  %135 = vst.msk [vmem:[#allocation0 + $0x6] sm:$0xc] %vm132_vm3, %v131_v19  }
  0x87   :  { %137 = vst.msk [vmem:[#allocation0 + $0xc] sm:$0x30] %vm132_vm3, %v131_v19  }
  0x88   :  { %148 = vst.msk [vmem:[#allocation0] sm:$0x3] %vm147_vm4, %v146_v18   ;;  %150 = vst.msk [vmem:[#allocation0 + $0x6] sm:$0xc] %vm147_vm4, %v146_v18  }
  0x89   :  { %152 = vst.msk [vmem:[#allocation0 + $0xc] sm:$0x30] %vm147_vm4, %v146_v18  }
  0x8f   :  { %v157_v20 = vld [vmem:[#allocation0] sm:$0x3]  ;;  %v162_v21 = vld [vmem:[#allocation0 + $0x8] sm:$0x3] }
  0x90   :  { %v168_v22 = vld [vmem:[#allocation0 + $0x10] sm:$0x3]  ;;  %v158_v24 = vpack.c.bf16 %v193_v23, %v157_v20  ;;  %v163_v25 = vpack.c.bf16 %v193_v23, %v162_v21 }
  0x91   :  { %v169_v26 = vpack.c.bf16 %v193_v23, %v168_v22 }
  0x92   :  { %160 = vst [vmem:[%s224_s1] sm:$0x1] %v158_v24  ;;  %184 = vst [vmem:[%s224_s1 + $0x1] sm:$0x1] %v163_v25 }
  0x93   :  { %185 = vst [vmem:[%s224_s1 + $0x2] sm:$0x1] %v169_v26 }

// kernel: latentfeature_forward.1
= control target key start
LH: loop header
LB: loop body
LE: loop exit
PB: predicated region body
PF: predicated region fallthrough
CT: control target
= control target key end

     0   :  { %s9661_s0 = inlined_call_operand.vmem [shape: bf16[3,128,8], index: 0, kind: input, shape index: {}]   ;;  %s9662_s1 = inlined_call_operand.hbm [shape: bf16[3,8,64], index: 1, kind: input, shape index: {}]   ;;  %s9663_s2 = inlined_call_operand.hbm [shape: f32[3,1,64], index: 2, kind: input, shape index: {}]   ;;  %s9664_s3 = inlined_call_operand.hbm [shape: bf16[3,64,64], index: 3, kind: input, shape index: {}]   ;;  %s9665_s4 = inlined_call_operand.hbm [shape: f32[3,1,64], index: 4, kind: input, shape index: {}]   ;;  %s9666_s5 = inlined_call_operand.hbm [shape: bf16[3,64,128], index: 5, kind: input, shape index: {}]   ;;  %s9667_s6 = inlined_call_operand.hbm [shape: f32[3,1,128], index: 6, kind: input, shape index: {}]   ;;  %s9668_s7 = inlined_call_operand.hbm [shape: bf16[3,128,256], index: 7, kind: input, shape index: {}]   ;;  %s9669_s8 = inlined_call_operand.hbm [shape: f32[3,1,256], index: 8, kind: input, shape index: {}]   ;;  %s9670_s9 = inlined_call_operand.hbm [shape: bf16[3,256,512], index: 9, kind: input, shape index: {}]   ;;  %s9671_s10 = inlined_call_operand.hbm [shape: f32[3,1,512], index: 10, kind: input, shape index: {}]   ;;  %s9672_s11 = inlined_call_operand.hbm [shape: bf16[3,512,1024], index: 11, kind: input, shape index: {}]   ;;  %s9673_s12 = inlined_call_operand.hbm [shape: f32[3,1,1024], index: 12, kind: input, shape index: {}]   ;;  %s9674_s13 = inlined_call_operand.vmem [shape: f32[3,128,128], index: 13, kind: output, shape index: {0}]   ;;  %s9675_s14 = inlined_call_operand.vmem [shape: f32[3,2,1920], index: 14, kind: output, shape index: {1}]  }
   0x1   :  { %9740 = sst [smem:[#allocation58_spill]] %s9661_s0 }
   0x2   :  { %9741 = sst [smem:[#allocation59_spill]] %s9662_s1 }
   0x3   :  { %9742 = sst [smem:[#allocation60_spill]] %s9663_s2 }
   0x4   :  { %9743 = sst [smem:[#allocation61_spill]] %s9665_s4 }
   0x5   :  { %9744 = sst [smem:[#allocation62_spill]] %s9674_s13 }
   0x6   :  { %9745 = sst [smem:[#allocation63_spill]] %s9675_s14 }
   0x7   :  { %20 = vsyncpa [#allocation3], 0 }
   0x8   :  { %22 = vsyncpa [#allocation3 + $0x1], 0 }
   0x9   :  { %23 = vsyncpa [#allocation5], 0 }
   0xa   :  { %25 = vsyncpa [#allocation5 + $0x1], 0 }
   0xb   :  { %26 = vsyncpa [#allocation8], 0 }
   0xc   :  { %28 = vsyncpa [#allocation8 + $0x1], 0 }
   0xd   :  { %29 = vsyncpa [#allocation11], 0 }
   0xe   :  { %31 = vsyncpa [#allocation11 + $0x1], 0 }
   0xf   :  { %32 = vsyncpa [#allocation14], 0 }
  0x10   :  { %34 = vsyncpa [#allocation14 + $0x1], 0 }
  0x11   :  { %35 = vsyncpa [#allocation17], 0 }
  0x12   :  { %37 = vsyncpa [#allocation17 + $0x1], 0 }
  0x13   :  { %38 = vsyncpa [#allocation20], 0 }
  0x14   :  { %40 = vsyncpa [#allocation20 + $0x1], 0  ;;  %s7622_s29 = smov 0   ;;  %s7624_s30 = smov 0  }
  0x15   :  { %s7626_s15 = smov 0   ;;  %s7628_s16 = smov 0  }
  0x16 LB: > { %9746 = sst [smem:[#allocation28_spill]] %s7519_s15  ;;  %s7641_s17 = sadd.s32 4294967295, %s7523_s16   ;;  %s7523_s16 = sphi %s7628_s16, %s9885_s16   ;;  %s7519_s15 = sphi %s7626_s15, %s9887_s15   ;;  %s7515_s30 = sphi %s7624_s30, %s9889_s30   ;;  %s7511_s29 = sphi %s7622_s29, %s9888_s29  }
  0x17   : > { %9747 = sst [smem:[#allocation29_spill]] %s7641_s17  ;;  %s7644_s18 = sadd.s32 1, %s7523_s16  }
  0x18   : > { %9748 = sst [smem:[#allocation30_spill]] %s7644_s18  ;;  %s76_s19 = ssub.s32 %s7523_s16, %s7644_s18 }
  0x19   : > { %s79_s20 = sadd.s32 1, %s7519_s15  ;;  %p77_p0 = scmp.eq.s32.totalorder %s76_s19, 0 }
  0x1a   : > { %p86_p1 = scmp.ne.s32.totalorder %s7519_s15, %s7515_s30  ;;  %p87_p2 = scmp.eq.s32.totalorder %s7523_s16, 0 }
  0x1b   : > { %p92_p3 = scmp.ne.s32.totalorder %s7515_s30, %s7511_s29  ;;  %p93_p5 = scmp.eq.s32.totalorder %s7641_s17, 0 }
  0x1c   : > { %s7654_s21 = scalar_select %p77_p0, %s7519_s15, %s79_s20  }
  0x1d   : > { %p88_p4 = por %p87_p2, %p86_p1  ;;  %p6926_p6 = scmp.lt.s32.totalorder %s7523_s16, 3 }
  0x1e   : > { %9749 = sst [smem:[#allocation31_spill]] %s7654_s21  ;;  %p7658_p7 = por %p93_p5, %p92_p3 }
  0x1f   : > { %s7663_s23 = sand.u32 1, %s7519_s15   ;;  %p7665_p8 = pnand %p6926_p6, %p88_p4 }
  0x20   : > { %s9750_s22 = scalar_select %p7658_p7, 1, 0 }
  0x21   : > { %s9751_s24 = scalar_select %p7665_p8, 1, 0 }
  0x22   : > { %s7670_s25 = sand.u32 1, %s7523_s16   ;;  %s7673_s26 = sshll.u32 %s7523_s16, 4 }
  0x23   : > { %s9752_s2 = sld [smem:[#allocation60_spill]]  ;;  %s483_s19 = scalar_lea.vmem [#allocation4], %s7663_s23 }
  0x24   : > { %s490_s20 = sshll.u32 %s483_s19, 4  ;;  %p7690_p11 = pneg %p7665_p8  ;;  %s7682_s20 = int_to_ptr.vmem [resolvable:$true] %s490_s20 }
  0x29   : > { %s7679_s29 = scalar_lea.hbm %s9752_s2, %s7673_s26  ;;  %s7110_s14 = scalar_lea.hbm %s9752_s2, 48 }
  0x2a   : > { %s7105_s15 = scalar_lea.hbm %s7679_s29, 16  ;;  %p7111_p0 = scmp.lt.u32.totalorder %s7679_s29, %s9752_s2 }
  0x2b   : > { %p7106_p10 = scmp.ne.s32.totalorder %s7679_s29, %s7105_s15  ;;  %p7112_p1 = scmp.lt.u32.totalorder %s7110_s14, %s7105_s15 }
  0x2c   : > { %p7114_p3 = scmp.lt.u32.totalorder %s7105_s15, %s7679_s29 }
  0x2d   : > { %p7108_p12 = pnand %p7690_p11, %p7106_p10  ;;  %p7113_p2 = por %p7112_p1, %p7111_p0 }
  0x2f   : > { %p7109_p13 = pneg %p7108_p12  ;;  %p7115_p4 = por %p7114_p3, %p7113_p2 }
  0x31   : > { %p7116_p5 = pnand %p7115_p4, %p7109_p13 }
  0x33   : > { %7119 = shalt.err (!%p7116_p5)
}
  0x34   : > { %s7120_s21 = scalar_lea.vmem %s7682_s20, 16  ;;  %s7525_s27 = smov [#allocation4]  }
  0x35   : > { %p7121_p6 = scmp.ne.s32.totalorder %s7682_s20, %s7120_s21  ;;  %s7125_s28 = sshll.u32 %s7525_s27, 4  ;;  %s7126_s28 = int_to_ptr.vmem [resolvable:$false] %s7125_s28 }
  0x36   : > { %s7127_s13 = scalar_lea.vmem %s7126_s28, 32  ;;  %p7128_p9 = scmp.lt.s32.totalorder %s7682_s20, %s7126_s28 }
  0x37   : > { %p7123_p10 = pnand %p7121_p6, %p7690_p11  ;;  %p7129_p7 = scmp.lt.s32.totalorder %s7127_s13, %s7120_s21 }
  0x39   : > { %p7124_p12 = pneg %p7123_p10  ;;  %p7130_p0 = por %p7129_p7, %p7128_p9 }
  0x3b   : > { %p7131_p1 = pnand %p7130_p0, %p7124_p12 }
  0x3d   : > { %7134 = shalt.err (!%p7131_p1)
}
  0x3e   : > { %s9754_s14 = scalar_lea.sflag [#allocation5], %s7670_s25  ;;  %p691_p13 = scmp.lt.s32.totalorder %s7523_s16, 4 }
  0x3f   : > { %6895 = dma.hbm_to_vmem [thread:$0]  (!%p7665_p8), %s7679_s29, 16, %s7682_s20, %s9754_s14  }
  0x40   : > { %s9755_s4 = sld [smem:[#allocation61_spill]]  ;;  %p9756_p7 = scmp.ge.s32.totalorder %s7523_s16, 1 }
  0x41   : > { %s521_s28 = scalar_lea.vmem [#allocation7], %s7663_s23 }
  0x42   : > { %p7724_p9 = pnand %p9756_p7, %p691_p13  ;;  %s528_s13 = sshll.u32 %s521_s28, 4  ;;  %s529_s13 = int_to_ptr.vmem [resolvable:$true] %s528_s13 }
  0x44   : > { %s9757_s27 = scalar_select %p7724_p9, 1, 0 }
  0x46   : > { %s7720_s21 = scalar_lea.hbm %s9755_s4, %s7673_s26  ;;  %s7140_s15 = scalar_lea.hbm %s9755_s4, 48 }
  0x47   : > { %s7135_s29 = scalar_lea.hbm %s7720_s21, 16  ;;  %p7141_p5 = scmp.lt.u32.totalorder %s7720_s21, %s9755_s4 }
  0x48   : > { %p7136_p2 = scmp.ne.s32.totalorder %s7720_s21, %s7135_s29  ;;  %p7142_p6 = scmp.lt.u32.totalorder %s7140_s15, %s7135_s29 }
  0x49   : > { %p7144_p12 = scmp.lt.u32.totalorder %s7135_s29, %s7720_s21 }
  0x4a   : > { %p7138_p3 = pnand %p7136_p2, %p7690_p11  ;;  %p7143_p10 = por %p7142_p6, %p7141_p5 }
  0x4c   : > { %p7139_p4 = pneg %p7138_p3  ;;  %p7145_p0 = por %p7144_p12, %p7143_p10 }
  0x4e   : > { %p7146_p1 = pnand %p7145_p0, %p7139_p4 }
  0x50   : > { %7149 = shalt.err (!%p7146_p1)
}
  0x51   : > { %s7150_s28 = scalar_lea.vmem %s529_s13, 16  ;;  %s7526_s2 = smov [#allocation7]  }
  0x52   : > { %p7151_p13 = scmp.ne.s32.totalorder %s529_s13, %s7150_s28  ;;  %s7155_s17 = sshll.u32 %s7526_s2, 4  ;;  %s7156_s17 = int_to_ptr.vmem [resolvable:$false] %s7155_s17 }
  0x53   : > { %s7157_s20 = scalar_lea.vmem %s7156_s17, 32  ;;  %p7158_p3 = scmp.lt.s32.totalorder %s529_s13, %s7156_s17 }
  0x54   : > { %p7153_p7 = pnand %p7151_p13, %p7690_p11  ;;  %p7159_p9 = scmp.lt.s32.totalorder %s7157_s20, %s7150_s28 }
  0x56   : > { %p7154_p2 = pneg %p7153_p7  ;;  %p7160_p8 = por %p7159_p9, %p7158_p3 }
  0x58   : > { %p7161_p5 = pnand %p7160_p8, %p7154_p2 }
  0x5a   : > { %7164 = shalt.err (!%p7161_p5)
}
  0x5b   : > { %p9758_p6 = scmp.ne.s32.totalorder %s9751_s24, 0  ;;  %s9759_s0 = scalar_lea.sflag [#allocation8], %s7670_s25 }
  0x5c   : > { %s7753_s14 = scalar_lea.hbm %s9667_s6, %s7673_s26  ;;  %s559_s17 = scalar_lea.vmem [#allocation10], %s7663_s23 }
  0x5d   : > { %6901 = dma.hbm_to_vmem [thread:$0]  (!%p9758_p6), %s7720_s21, 16, %s529_s13, %s9759_s0  }
  0x5e   : > { %s566_s15 = sshll.u32 %s559_s17, 4  ;;  %s6087_s19 = sshll.u32 %s7663_s23, 1  ;;  %s7756_s15 = int_to_ptr.vmem [resolvable:$true] %s566_s15 }
  0x5f   : > { %s9685_s28 = scalar_lea.sflag [#allocation11], %s7670_s25  ;;  %s7165_s20 = scalar_lea.hbm %s7753_s14, 16 }
  0x60   : > { %p7166_p8 = scmp.ne.s32.totalorder %s7753_s14, %s7165_s20  ;;  %s7170_s26 = scalar_lea.hbm %s9667_s6, 48 }
  0x61   : > { %p7171_p10 = scmp.lt.u32.totalorder %s7753_s14, %s9667_s6  ;;  %p7172_p12 = scmp.lt.u32.totalorder %s7170_s26, %s7165_s20 }
  0x62   : > { %p7168_p9 = pnand %p7166_p8, %p7690_p11  ;;  %p7174_p1 = scmp.lt.u32.totalorder %s7165_s20, %s7753_s14 }
  0x63   : > { %p7173_p0 = por %p7172_p12, %p7171_p10 }
  0x64   : > { %p7169_p4 = pneg %p7168_p9 }
  0x65   : > { %p7175_p13 = por %p7174_p1, %p7173_p0 }
  0x67   : > { %p7176_p7 = pnand %p7175_p13, %p7169_p4 }
  0x69   : > { %7179 = shalt.err (!%p7176_p7)
}
  0x6a   : > { %s7180_s2 = scalar_lea.vmem %s7756_s15, 16  ;;  %s7527_s17 = smov [#allocation10]  }
  0x6b   : > { %p7181_p2 = scmp.ne.s32.totalorder %s7756_s15, %s7180_s2  ;;  %s7185_s21 = sshll.u32 %s7527_s17, 4  ;;  %s7186_s21 = int_to_ptr.vmem [resolvable:$false] %s7185_s21 }
  0x6c   : > { %s7187_s13 = scalar_lea.vmem %s7186_s21, 32  ;;  %p7188_p8 = scmp.lt.s32.totalorder %s7756_s15, %s7186_s21 }
  0x6d   : > { %p7183_p3 = pnand %p7181_p2, %p7690_p11  ;;  %p7189_p9 = scmp.lt.s32.totalorder %s7187_s13, %s7180_s2 }
  0x6f   : > { %p7184_p5 = pneg %p7183_p3  ;;  %p7190_p10 = por %p7189_p9, %p7188_p8 }
  0x71   : > { %p7191_p12 = pnand %p7190_p10, %p7184_p5 }
  0x73   : > { %7194 = shalt.err (!%p7191_p12)
}
  0x74   : > { %6907 = dma.hbm_to_vmem [thread:$0]  (!%p9758_p6), %s7753_s14, 16, %s7756_s15, %s9685_s28  }
  0x75   : > { %s6501_s20 = sshll.u32 %s7523_s16, 5  ;;  %s598_s2 = scalar_lea.vmem [#allocation13], %s6087_s19 }
  0x76   : > { %s7787_s29 = scalar_lea.hbm %s9669_s8, %s6501_s20  ;;  %s606_s17 = sshll.u32 %s598_s2, 4  ;;  %s7791_s17 = int_to_ptr.vmem [resolvable:$true] %s606_s17 }
  0x77   : > { %s9686_s21 = sshll.u32 %s7663_s23, 2  ;;  %s9684_s13 = scalar_lea.sflag [#allocation14], %s7670_s25 }
  0x78   : > { %s7195_s4 = scalar_lea.hbm %s7787_s29, 32  ;;  %s7200_s20 = scalar_lea.hbm %s9669_s8, 96 }
  0x79   : > { %p7196_p4 = scmp.ne.s32.totalorder %s7787_s29, %s7195_s4  ;;  %p7201_p13 = scmp.lt.u32.totalorder %s7787_s29, %s9669_s8 }
  0x7a   : > { %p7202_p7 = scmp.lt.u32.totalorder %s7200_s20, %s7195_s4  ;;  %p7204_p3 = scmp.lt.u32.totalorder %s7195_s4, %s7787_s29 }
  0x7b   : > { %p7198_p0 = pnand %p7196_p4, %p7690_p11 }
  0x7c   : > { %p7203_p2 = por %p7202_p7, %p7201_p13 }
  0x7d   : > { %p7199_p1 = pneg %p7198_p0 }
  0x7e   : > { %p7205_p5 = por %p7204_p3, %p7203_p2 }
  0x80   : > { %p7206_p8 = pnand %p7205_p5, %p7199_p1 }
  0x82   : > { %7209 = shalt.err (!%p7206_p8)
}
  0x83   : > { %s7210_s19 = scalar_lea.vmem %s7791_s17, 32  ;;  %s7528_s2 = smov [#allocation13]  }
  0x84   : > { %p7211_p9 = scmp.ne.s32.totalorder %s7791_s17, %s7210_s19  ;;  %s7215_s14 = sshll.u32 %s7528_s2, 4  ;;  %s7216_s14 = int_to_ptr.vmem [resolvable:$false] %s7215_s14 }
  0x85   : > { %s7217_s15 = scalar_lea.vmem %s7216_s14, 64  ;;  %p7218_p4 = scmp.lt.s32.totalorder %s7791_s17, %s7216_s14 }
  0x86   : > { %p7213_p10 = pnand %p7211_p9, %p7690_p11  ;;  %p7219_p0 = scmp.lt.s32.totalorder %s7217_s15, %s7210_s19 }
  0x88   : > { %p7214_p12 = pneg %p7213_p10  ;;  %p7220_p13 = por %p7219_p0, %p7218_p4 }
  0x8a   : > { %p7221_p7 = pnand %p7220_p13, %p7214_p12 }
  0x8c   : > { %7224 = shalt.err (!%p7221_p7)
}
  0x8d   : > { %6913 = dma.hbm_to_vmem [thread:$0]  (!%p9758_p6), %s7787_s29, 32, %s7791_s17, %s9684_s13  }
  0x8e   : > { %s6074_s4 = sshll.u32 %s7523_s16, 6  ;;  %s638_s19 = scalar_lea.vmem [#allocation16], %s9686_s21 }
  0x8f   : > { %s7824_s0 = scalar_lea.hbm %s9671_s10, %s6074_s4  ;;  %s646_s2 = sshll.u32 %s638_s19, 4  ;;  %s647_s2 = int_to_ptr.vmem [resolvable:$true] %s646_s2 }
  0x90   : > { %s9688_s14 = scalar_lea.sflag [#allocation17], %s7670_s25  ;;  %s7225_s15 = scalar_lea.hbm %s7824_s0, 64 }
  0x91   : > { %p7226_p1 = scmp.ne.s32.totalorder %s7824_s0, %s7225_s15  ;;  %s7230_s20 = scalar_lea.hbm %s9671_s10, 192 }
  0x92   : > { %p7231_p5 = scmp.lt.u32.totalorder %s7824_s0, %s9671_s10  ;;  %p7232_p8 = scmp.lt.u32.totalorder %s7230_s20, %s7225_s15 }
  0x93   : > { %p7228_p2 = pnand %p7226_p1, %p7690_p11  ;;  %p7234_p10 = scmp.lt.u32.totalorder %s7225_s15, %s7824_s0 }
  0x94   : > { %p7233_p9 = por %p7232_p8, %p7231_p5 }
  0x95   : > { %p7229_p3 = pneg %p7228_p2 }
  0x96   : > { %p7235_p12 = por %p7234_p10, %p7233_p9 }
  0x98   : > { %p7236_p4 = pnand %p7235_p12, %p7229_p3 }
  0x9a   : > { %7239 = shalt.err (!%p7236_p4)
}
  0x9b   : > { %s7240_s19 = scalar_lea.vmem %s647_s2, 64  ;;  %s7529_s28 = smov [#allocation16]  }
  0x9c   : > { %p7241_p0 = scmp.ne.s32.totalorder %s647_s2, %s7240_s19  ;;  %s7245_s21 = sshll.u32 %s7529_s28, 4  ;;  %s7246_s21 = int_to_ptr.vmem [resolvable:$false] %s7245_s21 }
  0x9d   : > { %s7247_s29 = scalar_lea.vmem %s7246_s21, 128  ;;  %p7248_p1 = scmp.lt.s32.totalorder %s647_s2, %s7246_s21 }
  0x9e   : > { %p7243_p13 = pnand %p7241_p0, %p7690_p11  ;;  %p7249_p2 = scmp.lt.s32.totalorder %s7247_s29, %s7240_s19 }
  0xa0   : > { %p7244_p7 = pneg %p7243_p13  ;;  %p7250_p6 = por %p7249_p2, %p7248_p1 }
  0xa2   : > { %p7251_p5 = pnand %p7250_p6, %p7244_p7 }
  0xa4   : > { %7254 = shalt.err (!%p7251_p5)
}
  0xa5   : > { %p9760_p8 = scmp.ne.s32.totalorder %s9751_s24, 0  ;;  %s9761_s1 = sld [smem:[#allocation59_spill]] }
  0xa6   : > { %s9762_s15 = sshll.u32 %s7663_s23, 2  ;;  %s6076_s26 = sshll.u32 %s7663_s23, 5 }
  0xa7   : > { %6919 = dma.hbm_to_vmem [thread:$0]  (!%p9760_p8), %s7824_s0, 64, %s647_s2, %s9688_s14  }
  0xa8   : > { %s466_s17 = scalar_lea.vmem [#allocation2], %s9762_s15  ;;  %s463_s19 = scalar_lea.sflag [#allocation3], %s7663_s23 }
  0xa9   : > { %s473_s20 = sshll.u32 %s466_s17, 4  ;;  %s7857_s20 = int_to_ptr.vmem [resolvable:$true] %s473_s20 }
  0xab   : > { %s7853_s21 = scalar_lea.hbm %s9761_s1, %s6074_s4  ;;  %s7260_s4 = scalar_lea.hbm %s9761_s1, 192 }
  0xac   : > { %s7255_s29 = scalar_lea.hbm %s7853_s21, 64  ;;  %p7261_p10 = scmp.lt.u32.totalorder %s7853_s21, %s9761_s1 }
  0xad   : > { %p7256_p6 = scmp.ne.s32.totalorder %s7853_s21, %s7255_s29  ;;  %p7262_p12 = scmp.lt.u32.totalorder %s7260_s4, %s7255_s29 }
  0xae   : > { %p7264_p0 = scmp.lt.u32.totalorder %s7255_s29, %s7853_s21 }
  0xaf   : > { %p7258_p3 = pnand %p7256_p6, %p7690_p11  ;;  %p7263_p4 = por %p7262_p12, %p7261_p10 }
  0xb1   : > { %p7259_p9 = pneg %p7258_p3  ;;  %p7265_p13 = por %p7264_p0, %p7263_p4 }
  0xb3   : > { %p7266_p7 = pnand %p7265_p13, %p7259_p9 }
  0xb5   : > { %7269 = shalt.err (!%p7266_p7)
}
  0xb6   : > { %s7270_s15 = scalar_lea.vmem %s7857_s20, 64  ;;  %s7530_s17 = smov [#allocation2]  }
  0xb7   : > { %p7271_p1 = scmp.ne.s32.totalorder %s7857_s20, %s7270_s15  ;;  %s7275_s0 = sshll.u32 %s7530_s17, 4  ;;  %s7276_s0 = int_to_ptr.vmem [resolvable:$false] %s7275_s0 }
  0xb8   : > { %s7277_s2 = scalar_lea.vmem %s7276_s0, 128  ;;  %p7278_p6 = scmp.lt.s32.totalorder %s7857_s20, %s7276_s0 }
  0xb9   : > { %p7273_p2 = pnand %p7271_p1, %p7690_p11  ;;  %p7279_p3 = scmp.lt.s32.totalorder %s7277_s2, %s7270_s15 }
  0xbb   : > { %p7274_p5 = pneg %p7273_p2  ;;  %p7280_p10 = por %p7279_p3, %p7278_p6 }
  0xbd   : > { %p7281_p12 = pnand %p7280_p10, %p7274_p5 }
  0xbf   : > { %7284 = shalt.err (!%p7281_p12)
}
  0xc0   : > { %6892 = dma.hbm_to_vmem [thread:$0]  (!%p9760_p8), %s7853_s21, 64, %s7857_s20, %s463_s19  }
  0xc1   : > { %s6498_s29 = sshll.u32 %s7523_s16, 9  ;;  %s501_s15 = scalar_lea.vmem [#allocation6], %s6076_s26 }
  0xc2   : > { %s7888_s13 = scalar_lea.hbm %s9664_s3, %s6498_s29  ;;  %s508_s17 = sshll.u32 %s501_s15, 4  ;;  %s7892_s17 = int_to_ptr.vmem [resolvable:$true] %s508_s17 }
  0xc3   : > { %s7285_s0 = scalar_lea.hbm %s7888_s13, 512  ;;  %s7290_s19 = scalar_lea.hbm %s9664_s3, 1536 }
  0xc4   : > { %p7286_p9 = scmp.ne.s32.totalorder %s7888_s13, %s7285_s0  ;;  %p7291_p13 = scmp.lt.u32.totalorder %s7888_s13, %s9664_s3 }
  0xc5   : > { %p7292_p7 = scmp.lt.u32.totalorder %s7290_s19, %s7285_s0  ;;  %p7294_p2 = scmp.lt.u32.totalorder %s7285_s0, %s7888_s13 }
  0xc6   : > { %p7288_p4 = pnand %p7286_p9, %p7690_p11 }
  0xc7   : > { %p7293_p1 = por %p7292_p7, %p7291_p13 }
  0xc8   : > { %p7289_p0 = pneg %p7288_p4 }
  0xc9   : > { %p7295_p5 = por %p7294_p2, %p7293_p1 }
  0xcb   : > { %p7296_p6 = pnand %p7295_p5, %p7289_p0 }
  0xcd   : > { %7299 = shalt.err (!%p7296_p6)
}
  0xce   : > { %s7300_s28 = scalar_lea.vmem %s7892_s17, 512  ;;  %s7531_s15 = smov [#allocation6]  }
  0xcf   : > { %p7301_p3 = scmp.ne.s32.totalorder %s7892_s17, %s7300_s28  ;;  %s7305_s21 = sshll.u32 %s7531_s15, 4  ;;  %s7306_s21 = int_to_ptr.vmem [resolvable:$false] %s7305_s21 }
  0xd0   : > { %s7307_s20 = scalar_lea.vmem %s7306_s21, 1024  ;;  %p7308_p9 = scmp.lt.s32.totalorder %s7892_s17, %s7306_s21 }
  0xd1   : > { %p7303_p10 = pnand %p7301_p3, %p7690_p11  ;;  %p7309_p4 = scmp.lt.s32.totalorder %s7307_s20, %s7300_s28 }
  0xd3   : > { %p7304_p12 = pneg %p7303_p10  ;;  %p7310_p13 = por %p7309_p4, %p7308_p9 }
  0xd5   : > { %p7311_p7 = pnand %p7310_p13, %p7304_p12 }
  0xd7   : > { %7314 = shalt.err (!%p7311_p7)
}
  0xd8   : > { %s7532_s0 = smov 64   ;;  %s7533_s19 = smov 4  }
  0xd9   : > { %s9763_s2 = scalar_lea.sflag [#allocation5], %s7670_s25  ;;  %s7925_s15 = scalar_lea.hbm %s9666_s5, %s6498_s29 }
  0xda   : > { %6898 = dma.hbm_to_vmem [thread:$0]  (!%p9760_p8), %s7888_s13, 512, %s7892_s17, %s9763_s2, %s7532_s0, %s7532_s0, %s7533_s19  }
  0xdb   : > { %s539_s21 = scalar_lea.vmem [#allocation9], %s6076_s26  ;;  %s6084_s14 = sshll.u32 %s7663_s23, 7 }
  0xdc   : > { %s546_s20 = sshll.u32 %s539_s21, 4  ;;  %s7315_s1 = scalar_lea.hbm %s7925_s15, 512  ;;  %s7929_s20 = int_to_ptr.vmem [resolvable:$true] %s546_s20 }
  0xdd   : > { %p7316_p0 = scmp.ne.s32.totalorder %s7925_s15, %s7315_s1  ;;  %s7320_s29 = scalar_lea.hbm %s9666_s5, 1536 }
  0xde   : > { %p7321_p5 = scmp.lt.u32.totalorder %s7925_s15, %s9666_s5  ;;  %p7322_p6 = scmp.lt.u32.totalorder %s7320_s29, %s7315_s1 }
  0xdf   : > { %p7318_p1 = pnand %p7316_p0, %p7690_p11  ;;  %p7324_p10 = scmp.lt.u32.totalorder %s7315_s1, %s7925_s15 }
  0xe0   : > { %p7323_p3 = por %p7322_p6, %p7321_p5 }
  0xe1   : > { %p7319_p2 = pneg %p7318_p1 }
  0xe2   : > { %p7325_p12 = por %p7324_p10, %p7323_p3 }
  0xe4   : > { %p7326_p9 = pnand %p7325_p12, %p7319_p2 }
  0xe6   : > { %7329 = shalt.err (!%p7326_p9)
}
  0xe7   : > { %s7330_s26 = scalar_lea.vmem %s7929_s20, 512  ;;  %s7534_s28 = smov [#allocation9]  }
  0xe8   : > { %p7331_p4 = scmp.ne.s32.totalorder %s7929_s20, %s7330_s26  ;;  %s7335_s21 = sshll.u32 %s7534_s28, 4  ;;  %s7336_s21 = int_to_ptr.vmem [resolvable:$false] %s7335_s21 }
  0xe9   : > { %s7337_s13 = scalar_lea.vmem %s7336_s21, 1024  ;;  %p7338_p0 = scmp.lt.s32.totalorder %s7929_s20, %s7336_s21 }
  0xea   : > { %p7333_p13 = pnand %p7331_p4, %p7690_p11  ;;  %p7339_p1 = scmp.lt.s32.totalorder %s7337_s13, %s7330_s26 }
  0xec   : > { %p7334_p7 = pneg %p7333_p13  ;;  %p7340_p5 = por %p7339_p1, %p7338_p0 }
  0xee   : > { %p7341_p6 = pnand %p7340_p5, %p7334_p7 }
  0xf0   : > { %7344 = shalt.err (!%p7341_p6)
}
  0xf1   : > { %s9764_s1 = scalar_lea.sflag [#allocation8], %s7670_s25  ;;  %s6500_s17 = sshll.u32 %s7523_s16, 11 }
  0xf2   : > { %6904 = dma.hbm_to_vmem [thread:$0]  (!%p9760_p8), %s7925_s15, 512, %s7929_s20, %s9764_s1, %s7532_s0, %s7532_s0, %s7533_s19  }
  0xf3   : > { %s7962_s4 = scalar_lea.hbm %s9668_s7, %s6500_s17  ;;  %s577_s26 = scalar_lea.vmem [#allocation12], %s6084_s14 }
  0xf4   : > { %s584_s28 = sshll.u32 %s577_s26, 4  ;;  %s6090_s21 = sshll.u32 %s7663_s23, 9  ;;  %s7966_s28 = int_to_ptr.vmem [resolvable:$true] %s584_s28 }
  0xf5   : > { %s7345_s13 = scalar_lea.hbm %s7962_s4, 2048  ;;  %s7350_s15 = scalar_lea.hbm %s9668_s7, 6144 }
  0xf6   : > { %p7346_p2 = scmp.ne.s32.totalorder %s7962_s4, %s7345_s13  ;;  %p7351_p12 = scmp.lt.u32.totalorder %s7962_s4, %s9668_s7 }
  0xf7   : > { %p7352_p9 = scmp.lt.u32.totalorder %s7350_s15, %s7345_s13  ;;  %p7354_p13 = scmp.lt.u32.totalorder %s7345_s13, %s7962_s4 }
  0xf8   : > { %p7348_p3 = pnand %p7346_p2, %p7690_p11 }
  0xf9   : > { %p7353_p4 = por %p7352_p9, %p7351_p12 }
  0xfa   : > { %p7349_p10 = pneg %p7348_p3 }
  0xfb   : > { %p7355_p7 = por %p7354_p13, %p7353_p4 }
  0xfd   : > { %p7356_p0 = pnand %p7355_p7, %p7349_p10 }
  0xff   : > { %7359 = shalt.err (!%p7356_p0)
}
 0x100   : > { %s7360_s14 = scalar_lea.vmem %s7966_s28, 2048  ;;  %s7535_s17 = smov [#allocation12]  }
 0x101   : > { %p7361_p1 = scmp.ne.s32.totalorder %s7966_s28, %s7360_s14  ;;  %s7365_s29 = sshll.u32 %s7535_s17, 4  ;;  %s7366_s29 = int_to_ptr.vmem [resolvable:$false] %s7365_s29 }
 0x102   : > { %s7367_s2 = scalar_lea.vmem %s7366_s29, 4096  ;;  %p7368_p2 = scmp.lt.s32.totalorder %s7966_s28, %s7366_s29 }
 0x103   : > { %p7363_p5 = pnand %p7361_p1, %p7690_p11  ;;  %p7369_p3 = scmp.lt.s32.totalorder %s7367_s2, %s7360_s14 }
 0x105   : > { %p7364_p6 = pneg %p7363_p5  ;;  %p7370_p12 = por %p7369_p3, %p7368_p2 }
 0x107   : > { %p7371_p9 = pnand %p7370_p12, %p7364_p6 }
 0x109   : > { %7374 = shalt.err (!%p7371_p9)
}
 0x10a   : > { %s7536_s26 = smov 128   ;;  %s7537_s13 = smov 8  }
 0x10b   : > { %s9765_s0 = scalar_lea.sflag [#allocation11], %s7670_s25  ;;  %s6502_s19 = sshll.u32 %s7523_s16, 13 }
 0x10c   : > { %6910 = dma.hbm_to_vmem [thread:$0]  (!%p9760_p8), %s7962_s4, 2048, %s7966_s28, %s9765_s0, %s7536_s26, %s7536_s26, %s7537_s13  }
 0x10d   : > { %s7996_s1 = scalar_lea.hbm %s9670_s9, %s6502_s19  ;;  %s617_s14 = scalar_lea.vmem [#allocation15], %s6090_s21 }
 0x10e   : > { %s624_s17 = sshll.u32 %s617_s14, 4  ;;  %s6096_s29 = sshll.u32 %s7663_s23, 11  ;;  %s8000_s17 = int_to_ptr.vmem [resolvable:$true] %s624_s17 }
 0x10f   : > { %s7375_s2 = scalar_lea.hbm %s7996_s1, 8192  ;;  %s7380_s26 = scalar_lea.hbm %s9670_s9, 24576 }
 0x110   : > { %p7376_p10 = scmp.ne.s32.totalorder %s7996_s1, %s7375_s2  ;;  %p7381_p7 = scmp.lt.u32.totalorder %s7996_s1, %s9670_s9 }
 0x111   : > { %p7382_p0 = scmp.lt.u32.totalorder %s7380_s26, %s7375_s2  ;;  %p7384_p5 = scmp.lt.u32.totalorder %s7375_s2, %s7996_s1 }
 0x112   : > { %p7378_p4 = pnand %p7376_p10, %p7690_p11 }
 0x113   : > { %p7383_p1 = por %p7382_p0, %p7381_p7 }
 0x114   : > { %p7379_p13 = pneg %p7378_p4 }
 0x115   : > { %p7385_p6 = por %p7384_p5, %p7383_p1 }
 0x117   : > { %p7386_p2 = pnand %p7385_p6, %p7379_p13 }
 0x119   : > { %7389 = shalt.err (!%p7386_p2)
}
 0x11a   : > { %s7390_s21 = scalar_lea.vmem %s8000_s17, 8192  ;;  %s7538_s19 = smov [#allocation15]  }
 0x11b   : > { %p7391_p3 = scmp.ne.s32.totalorder %s8000_s17, %s7390_s21  ;;  %s7395_s15 = sshll.u32 %s7538_s19, 4  ;;  %s7396_s15 = int_to_ptr.vmem [resolvable:$false] %s7395_s15 }
 0x11c   : > { %s7397_s20 = scalar_lea.vmem %s7396_s15, 16384  ;;  %p7398_p10 = scmp.lt.s32.totalorder %s8000_s17, %s7396_s15 }
 0x11d   : > { %p7393_p12 = pnand %p7391_p3, %p7690_p11  ;;  %p7399_p4 = scmp.lt.s32.totalorder %s7397_s20, %s7390_s21 }
 0x11f   : > { %p7394_p9 = pneg %p7393_p12  ;;  %p7400_p7 = por %p7399_p4, %p7398_p10 }
 0x121   : > { %p7401_p0 = pnand %p7400_p7, %p7394_p9 }
 0x123   : > { %7404 = shalt.err (!%p7401_p0)
}
 0x124   : > { %s7539_s14 = smov 256   ;;  %s7540_s2 = smov 16  }
 0x125   : > { %s9766_s4 = scalar_lea.sflag [#allocation14], %s7670_s25  ;;  %s6504_s28 = sshll.u32 %s7523_s16, 15 }
 0x126   : > { %6916 = dma.hbm_to_vmem [thread:$0]  (!%p9760_p8), %s7996_s1, 8192, %s8000_s17, %s9766_s4, %s7539_s14, %s7539_s14, %s7540_s2  }
 0x127   : > { %s8030_s0 = scalar_lea.hbm %s9672_s11, %s6504_s28  ;;  %s657_s21 = scalar_lea.vmem [#allocation18], %s6096_s29 }
 0x128   : > { %s664_s19 = sshll.u32 %s657_s21, 4  ;;  %s7405_s15 = scalar_lea.hbm %s8030_s0, 32768  ;;  %s8034_s19 = int_to_ptr.vmem [resolvable:$true] %s664_s19 }
 0x129   : > { %p7406_p13 = scmp.ne.s32.totalorder %s8030_s0, %s7405_s15  ;;  %s7410_s20 = scalar_lea.hbm %s9672_s11, 98304 }
 0x12a   : > { %p7411_p6 = scmp.lt.u32.totalorder %s8030_s0, %s9672_s11  ;;  %p7412_p2 = scmp.lt.u32.totalorder %s7410_s20, %s7405_s15 }
 0x12b   : > { %p7408_p1 = pnand %p7406_p13, %p7690_p11  ;;  %p7414_p12 = scmp.lt.u32.totalorder %s7405_s15, %s8030_s0 }
 0x12c   : > { %p7413_p3 = por %p7412_p2, %p7411_p6 }
 0x12d   : > { %p7409_p5 = pneg %p7408_p1 }
 0x12e   : > { %p7415_p9 = por %p7414_p12, %p7413_p3 }
 0x130   : > { %p7416_p10 = pnand %p7415_p9, %p7409_p5 }
 0x132   : > { %7419 = shalt.err (!%p7416_p10)
}
 0x133   : > { %s7420_s29 = scalar_lea.vmem %s8034_s19, 32768  ;;  %s7541_s4 = smov [#allocation18]  }
 0x134   : > { %p7421_p4 = scmp.ne.s32.totalorder %s8034_s19, %s7420_s29  ;;  %s7425_s28 = sshll.u32 %s7541_s4, 4  ;;  %s7426_s28 = int_to_ptr.vmem [resolvable:$false] %s7425_s28 }
 0x135   : > { %s7427_s26 = scalar_lea.vmem %s7426_s28, 65536  ;;  %p7428_p13 = scmp.lt.s32.totalorder %s8034_s19, %s7426_s28 }
 0x136   : > { %p7423_p7 = pnand %p7421_p4, %p7690_p11  ;;  %p7429_p1 = scmp.lt.s32.totalorder %s7427_s26, %s7420_s29 }
 0x138   : > { %p7424_p0 = pneg %p7423_p7  ;;  %p7430_p6 = por %p7429_p1, %p7428_p13 }
 0x13a   : > { %p7431_p2 = pnand %p7430_p6, %p7424_p0 }
 0x13c   : > { %7434 = shalt.err (!%p7431_p2)
}
 0x13d   : > { %s7542_s13 = smov 512   ;;  %s7543_s21 = smov 32  }
 0x13e   : > { %s9767_s15 = scalar_lea.sflag [#allocation17], %s7670_s25  ;;  %s6099_s1 = sshll.u32 %s7663_s23, 3 }
 0x13f   : > { %6922 = dma.hbm_to_vmem [thread:$0]  (!%p9760_p8), %s8030_s0, 32768, %s8034_s19, %s9767_s15, %s7542_s13, %s7542_s13, %s7543_s21  }
 0x140   : > { %s6505_s17 = sshll.u32 %s7523_s16, 7  ;;  %s678_s29 = scalar_lea.vmem [#allocation19], %s6099_s1 }
 0x141   : > { %s8064_s2 = scalar_lea.hbm %s9673_s12, %s6505_s17  ;;  %s686_s4 = sshll.u32 %s678_s29, 4  ;;  %s687_s4 = int_to_ptr.vmem [resolvable:$true] %s686_s4 }
 0x142   : > { %s675_s28 = scalar_lea.sflag [#allocation20], %s7663_s23  ;;  %s7435_s26 = scalar_lea.hbm %s8064_s2, 128 }
 0x143   : > { %p7436_p5 = scmp.ne.s32.totalorder %s8064_s2, %s7435_s26  ;;  %s7440_s0 = scalar_lea.hbm %s9673_s12, 384 }
 0x144   : > { %p7441_p9 = scmp.lt.u32.totalorder %s8064_s2, %s9673_s12  ;;  %p7442_p10 = scmp.lt.u32.totalorder %s7440_s0, %s7435_s26 }
 0x145   : > { %p7438_p3 = pnand %p7436_p5, %p7690_p11  ;;  %p7444_p7 = scmp.lt.u32.totalorder %s7435_s26, %s8064_s2 }
 0x146   : > { %p7443_p4 = por %p7442_p10, %p7441_p9 }
 0x147   : > { %p7439_p12 = pneg %p7438_p3 }
 0x148   : > { %p7445_p0 = por %p7444_p7, %p7443_p4 }
 0x14a   : > { %p7446_p13 = pnand %p7445_p0, %p7439_p12 }
 0x14c   : > { %7449 = shalt.err (!%p7446_p13)
}
 0x14d   : > { %s7450_s23 = scalar_lea.vmem %s687_s4, 128  ;;  %s7544_s21 = smov [#allocation19]  }
 0x14e   : > { %p7451_p1 = scmp.ne.s32.totalorder %s687_s4, %s7450_s23  ;;  %s7455_s15 = sshll.u32 %s7544_s21, 4  ;;  %s7456_s15 = int_to_ptr.vmem [resolvable:$false] %s7455_s15 }
 0x14f   : > { %s7457_s1 = scalar_lea.vmem %s7456_s15, 256  ;;  %p7458_p5 = scmp.lt.s32.totalorder %s687_s4, %s7456_s15 }
 0x150   : > { %p7453_p6 = pnand %p7451_p1, %p7690_p11  ;;  %p7459_p3 = scmp.lt.s32.totalorder %s7457_s1, %s7450_s23 }
 0x152   : > { %p7454_p2 = pneg %p7453_p6  ;;  %p7460_p8 = por %p7459_p3, %p7458_p5 }
 0x154   : > { %p7461_p9 = pnand %p7460_p8, %p7454_p2 }
 0x156   : > { %7464 = shalt.err (!%p7461_p9)
}
 0x157   : > { %p9768_p10 = scmp.ne.s32.totalorder %s9751_s24, 0  ;;  %p9769_p12 = scmp.ne.s32.totalorder %s9757_s27, 0 }
 0x159   : > { %6925 = dma.hbm_to_vmem [thread:$0]  (!%p9768_p10), %s8064_s2, 128, %s687_s4, %s675_s28  }
 0x15a   : > { %695 = sbr.rel (%p9769_p12) target bundleno = 2016 (0x7e0), region = 72 }
 0x161   : > { %s8087_s18 = sand.u32 1, %s7515_s30   ;;  %p9770_p11 = scmp.ne.s32.totalorder %s9750_s22, 0 }
 0x162   : > { %s6103_s17 = sshll.u32 %s8087_s18, 2  ;;  %s698_s20 = scalar_lea.sflag [#allocation3], %s8087_s18 }
 0x163   : > { %s8093_s14 = scalar_lea.vmem [#allocation2], %s6103_s17 }
 0x164   : > { %7482 = dma.done.wait (%p9770_p11), %s698_s20, 64  }
 0x165   : > { %7484 = vsyncadd (%p9770_p11), %s698_s20, 4294967232  ;;  %s9771_s24 = sld [smem:[#allocation29_spill]]  ;;  %s709_s29 = scalar_lea.vmem [#allocation4], %s8087_s18 }
 0x16b   : > { %s706_s27 = sand.u32 1, %s9771_s24  }
 0x16c   : > { %s707_s2 = scalar_lea.sflag [#allocation5], %s706_s27 }
 0x16d   : > { %7486 = dma.done.wait (%p9770_p11), %s707_s2, 528  }
 0x16e   : > { %7488 = vsyncadd (%p9770_p11), %s707_s2, 4294966768  ;;  %s6104_s4 = sshll.u32 %s8087_s18, 5  ;;  %s724_s26 = scalar_lea.sflag [#allocation8], %s706_s27 }
 0x16f   : > { %s8106_s28 = scalar_lea.vmem [#allocation6], %s6104_s4  ;;  %s726_s25 = scalar_lea.vmem [#allocation7], %s8087_s18 }
 0x170   : > { %7490 = dma.done.wait (%p9770_p11), %s724_s26, 528  }
 0x171   : > { %7492 = vsyncadd (%p9770_p11), %s724_s26, 4294966768  ;;  %s8113_s16 = scalar_lea.vmem [#allocation9], %s6104_s4  ;;  %s741_s0 = scalar_lea.sflag [#allocation11], %s706_s27 }
 0x172   : > { %s743_s19 = scalar_lea.vmem [#allocation10], %s8087_s18 }
 0x173   : > { %7494 = dma.done.wait (%p9770_p11), %s741_s0, 2064  }
 0x174   : > { %7496 = vsyncadd (%p9770_p11), %s741_s0, 4294965232  ;;  %s6106_s13 = sshll.u32 %s8087_s18, 7  ;;  %s6107_s23 = sshll.u32 %s8087_s18, 1 }
 0x175   : > { %s8122_s21 = scalar_lea.vmem [#allocation12], %s6106_s13  ;;  %s758_s15 = scalar_lea.sflag [#allocation14], %s706_s27 }
 0x176   : > { %s8124_s1 = scalar_lea.vmem [#allocation13], %s6107_s23 }
 0x177   : > { %7498 = dma.done.wait (%p9770_p11), %s758_s15, 8224  }
 0x178   : > { %7500 = vsyncadd (%p9770_p11), %s758_s15, 4294959072  ;;  %s6108_s20 = sshll.u32 %s8087_s18, 9  ;;  %s776_s4 = scalar_lea.sflag [#allocation17], %s706_s27 }
 0x179   : > { %s8131_s2 = scalar_lea.vmem [#allocation15], %s6108_s20  ;;  %s8135_s26 = scalar_lea.vmem [#allocation16], %s6103_s17 }
 0x17a   : > { %7502 = dma.done.wait (%p9770_p11), %s776_s4, 32832  }
 0x17b   : > { %7504 = vsyncadd (%p9770_p11), %s776_s4, 4294934464  ;;  %s6110_s0 = sshll.u32 %s8087_s18, 11  ;;  %s6111_s13 = sshll.u32 %s8087_s18, 3 }
 0x17c   : > { %s8143_s23 = scalar_lea.vmem [#allocation18], %s6110_s0  ;;  %s794_s15 = scalar_lea.sflag [#allocation20], %s8087_s18 }
 0x17d   : > { %s8146_s20 = scalar_lea.vmem [#allocation19], %s6111_s13 }
 0x17e   : > { %7506 = dma.done.wait (%p9770_p11), %s794_s15, 128  }
 0x17f   : > { %7508 = vsyncadd (%p9770_p11), %s794_s15, 4294967168  ;;  %p904_p8 = scmp.lt.s32.totalorder %s9771_s24, 2  ;;  %vm1009_vm0 = vcmask 1043456   ;;  %s9772_s0 = sld [smem:[#allocation58_spill]]  ;;  %vm984_vm1 = vcmask 64512   ;;  %v6977_v7 = vld [vmem:[%s8106_s28] sm:$0xff]  }
 0x180   : > { %v936_v0 = vld [vmem:[%s8093_s14] sm:$0xf]  ;;  %v6978_v8 = vld [vmem:[%s8106_s28 + $0x8] sm:$0xff]   ;;  %6559 = vmatprep.subr.bf16.mxu1 %v6977_v7  ;;  %vm1173_vm2 = vcmask 523264   ;;  %vm1558_vm3 = vcmask 1041409   ;;  %vm1560_vm4 = vcmask 1043459  }
 0x181   : > { %s9891_s24 = smov (!%p904_p8, %s9771_s24), 2  ;;  %6863 = vmatprep.subr.msk.bf16.mxu0 %vm1009_vm0, %v936_v0  ;;  %v1011_v1 = vsel %vm1009_vm0, %v936_v0, 0  ;;  %6560 = vmatpush3.bf16.msra.mxu1 %v6977_v7  ;;  %v6979_v12 = vld [vmem:[%s8106_s28 + $0x10] sm:$0xff]   ;;  %v6980_v13 = vld [vmem:[%s8106_s28 + $0x18] sm:$0xff]   ;;  %v6981_v14 = vld [vmem:[%s8113_s16] sm:$0xff]   ;;  %s9773_s28 = sld [smem:[#allocation62_spill]] }
 0x182   : > { %s6506_s17 = sshll.u32 %s9891_s24, 6  ;;  %6542 = vmatpush3.bf16.msra.mxu0 %v1011_v1  ;;  %6561 = vmatprep.subr.bf16.mxu1 %v6978_v8  ;;  %v6982_v15 = vld [vmem:[%s8113_s16 + $0x8] sm:$0xff]   ;;  %v6983_v16 = vld [vmem:[%s8113_s16 + $0x10] sm:$0xff]   ;;  %s6507_s22 = sshll.u32 %s9891_s24, 7  ;;  %vm1562_vm5 = vcmask 1045509   ;;  %vm1564_vm6 = vcmask 1047559  }
 0x183   : > { %6583 = vmatprep.subr.bf16.mxu0 %v6981_v14  ;;  %v6117_v17 = vld [vmem:[%s709_s29] ss:$0 sm:$0xff]  ;;  %s6864_s18 = smul.u32 30, %s9891_s24 }
 0x185   : > { %s908_s13 = scalar_lea.vmem %s9772_s0, %s6506_s17  ;;  %6562 = vmatpush3.bf16.msra.mxu1 %v6978_v8 }
 0x186   : > { %v6969_v2 = vld [vmem:[%s908_s13] sm:$0xff]   ;;  %v6970_v3 = vld [vmem:[%s908_s13 + $0x8] sm:$0xff]   ;;  %v6971_v4 = vld [vmem:[%s908_s13 + $0x10] sm:$0xff]   ;;  %6563 = vmatprep.subr.bf16.mxu1 %v6979_v12 }
 0x187   : > { %6543 = vmatprep.mubr.msk.bf16.mxu0 %vm984_vm1, %v6969_v2  ;;  %v6972_v5 = vld [vmem:[%s908_s13 + $0x18] sm:$0xff]   ;;  %v6973_v6 = vld [vmem:[%s908_s13 + $0x20] sm:$0xff]   ;;  %v6974_v9 = vld [vmem:[%s908_s13 + $0x28] sm:$0xff]  }
 0x188   : > { %6544 = vmatmul.mubr.msk.bf16.vlgmr.msra.gmra.mrb[0].mxu0 %vm984_vm1, %v6970_v3  ;;  %v6975_v10 = vld [vmem:[%s908_s13 + $0x30] sm:$0xff]   ;;  %v6976_v11 = vld [vmem:[%s908_s13 + $0x38] sm:$0xff]  }
 0x189   : > { %6547 = vmatprep.mubr.msk.bf16.mxu0 %vm984_vm1, %v6971_v4  ;;  %6564 = vmatpush3.bf16.msra.mxu1 %v6979_v12  ;;  %v6987_v12 = vld [vmem:[%s8122_s21 + $0x4] ss:$8 sps:$4 sm:$0xff]  }
 0x18a   : > { %6565 = vmatprep.subr.bf16.mxu1 %v6980_v13  ;;  %6584 = vmatpush3.bf16.msra.mxu0 %v6981_v14  ;;  %v6988_v14 = vld [vmem:[%s8122_s21 + $0x10] ss:$8 sps:$4 sm:$0xff]  }
 0x18b   : > { %6585 = vmatprep.subr.bf16.mxu0 %v6982_v15 }
 0x18d   : > { %6566 = vmatpush3.bf16.msra.mxu1 %v6980_v13  ;;  %v6990_v13 = vld [vmem:[%s8122_s21 + $0x14] ss:$8 sps:$4 sm:$0xff]  }
 0x18e   : > { %6586 = vmatpush3.bf16.msra.mxu0 %v6982_v15  ;;  %1684 = vmatprep.subr.bf16.mxu1 %v6987_v12  ;;  %v6993_v15 = vld [vmem:[%s8122_s21 + $0x24] ss:$8 sps:$4 sm:$0xff]  }
 0x18f   : > { %6587 = vmatprep.subr.bf16.mxu0 %v6983_v16 }
 0x190   : > { %6548 = vmatmul.mubr.msk.bf16.gmra.mrb[4].mxu0 %vm984_vm1, %v6972_v5 }
 0x191   : > { %6551 = vmatprep.mubr.msk.bf16.mxu0 %vm984_vm1, %v6973_v6 }
 0x192   : > { %6588 = vmatpush3.bf16.msra.mxu0 %v6983_v16  ;;  %v6991_v16 = vld [vmem:[%s8122_s21 + $0x20] ss:$8 sps:$4 sm:$0xff]  }
 0x198   : > { %6552 = vmatmul.mubr.msk.bf16.gmra.mrb[8].mxu0 %vm984_vm1, %v6974_v9 }
 0x199   : > { %6555 = vmatprep.mubr.msk.bf16.mxu0 %vm984_vm1, %v6975_v10  ;;  %v6984_v10 = vld [vmem:[%s8113_s16 + $0x18] sm:$0xff]  }
 0x19a   : > { %6589 = vmatprep.subr.bf16.mxu0 %v6984_v10 }
 0x19b   : > { %6590 = vmatpush3.bf16.msra.mxu0 %v6984_v10 }
 0x1a0   : > { %6556 = vmatmul.mubr.msk.bf16.gmra.mrb[12].mxu0 %vm984_vm1, %v6976_v11  ;;  %v6985_v11 = vld [vmem:[%s8122_s21] ss:$8 sps:$4 sm:$0xff]  }
 0x25b   : > { %v6545_v18 = vpop.f32.mrb[0].mxu0 }
 0x25c   : > { %v1056_v19 = vadd.f32 %v6545_v18, %v6117_v17  ;;  %v1047_v20 = vpop.f32.mrb[1].mxu0  ;;  %v6994_v18 = vld [vmem:[%s8122_s21 + $0x30] ss:$8 sps:$4 sm:$0xff]  }
 0x25d   : > { %v1048_v21 = vadd.f32 %v6117_v17, %v1047_v20  ;;  %v6546_v22 = vpop.f32.mrb[2].mxu0  ;;  %v6997_v20 = vld [vmem:[%s8122_s21 + $0x40] ss:$8 sps:$4 sm:$0xff]  }
 0x25e   : > { %v1059_v23 = vadd.f32 %v6546_v22, %v6117_v17  ;;  %v1050_v24 = vpop.f32.mrb[3].mxu0  ;;  %v1112_v26 = vmax.f32 %v1056_v19, 0.0  ;;  %v6999_v19 = vld [vmem:[%s8122_s21 + $0x44] ss:$8 sps:$4 sm:$0xff]   ;;  %v7000_v22 = vld [vmem:[%s8122_s21 + $0x50] ss:$8 sps:$4 sm:$0xff]  }
 0x25f   : > { %v1051_v25 = vadd.f32 %v6117_v17, %v1050_v24  ;;  %v1110_v28 = vmax.f32 %v1048_v21, 0.0  ;;  %v7002_v21 = vld [vmem:[%s8122_s21 + $0x54] ss:$8 sps:$4 sm:$0xff]  }
 0x260   : > { %v1113_v27 = vmax.f32 %v1059_v23, 0.0  ;;  %v6134_v23 = vld [vmem:[%s726_s25] ss:$0 sm:$0xff]  ;;  %s8252_s25 = scalar_lea.vmem %s9773_s28, %s6507_s22 }
 0x261   : > { %v1111_v29 = vmax.f32 %v1051_v25, 0.0 }
 0x262   : > { %v1127_v30 = vpack.c.bf16 %v1113_v27, %v1112_v26 }
 0x263   : > { %v6549_v31 = vpop.f32.mrb[4].mxu0  ;;  %v1126_v32 = vpack.c.bf16 %v1111_v29, %v1110_v28 }
 0x264   : > { %v1072_v33 = vadd.f32 %v6549_v31, %v6117_v17  ;;  %v1063_v34 = vpop.f32.mrb[5].mxu0 }
 0x265   : > { %v1064_v35 = vadd.f32 %v6117_v17, %v1063_v34  ;;  %v6550_v36 = vpop.f32.mrb[6].mxu0  ;;  %6567 = vmatprep.mubr.msk.bf16.mxu1 %vm1173_vm2, %v1126_v32 }
 0x266   : > { %v1116_v37 = vmax.f32 %v1072_v33, 0.0  ;;  %v1075_v38 = vadd.f32 %v6550_v36, %v6117_v17  ;;  %v1066_v39 = vpop.f32.mrb[7].mxu0  ;;  %6568 = vmatmul.mubr.msk.bf16.vlgmr.msra.gmra.mrb[0].mxu1 %vm1173_vm2, %v1127_v30 }
 0x267   : > { %v1114_v40 = vmax.f32 %v1064_v35, 0.0  ;;  %v1067_v41 = vadd.f32 %v6117_v17, %v1066_v39  ;;  %1685 = vmatpush1.bf16.msra.mxu1 %v6985_v11 }
 0x268   : > { %v1117_v42 = vmax.f32 %v1075_v38, 0.0  ;;  %1686 = vmatprep.subr.bf16.mxu1 %v6990_v13 }
 0x269   : > { %v1115_v43 = vmax.f32 %v1067_v41, 0.0 }
 0x26a   : > { %v1129_v44 = vpack.c.bf16 %v1117_v42, %v1116_v37 }
 0x26b   : > { %v1128_v45 = vpack.c.bf16 %v1115_v43, %v1114_v40  ;;  %v6553_v46 = vpop.f32.mrb[8].mxu0  ;;  %1687 = vmatpush1.bf16.msra.mxu1 %v6988_v14 }
 0x26c   : > { %v1088_v47 = vadd.f32 %v6553_v46, %v6117_v17  ;;  %v1079_v48 = vpop.f32.mrb[9].mxu0  ;;  %1688 = vmatprep.subr.bf16.mxu1 %v6993_v15 }
 0x26d   : > { %v1080_v49 = vadd.f32 %v6117_v17, %v1079_v48  ;;  %v6554_v50 = vpop.f32.mrb[10].mxu0  ;;  %6571 = vmatprep.mubr.msk.bf16.mxu1 %vm1173_vm2, %v1128_v45 }
 0x26e   : > { %v1120_v51 = vmax.f32 %v1088_v47, 0.0  ;;  %v1091_v52 = vadd.f32 %v6554_v50, %v6117_v17  ;;  %v1082_v53 = vpop.f32.mrb[11].mxu0  ;;  %6572 = vmatmul.mubr.msk.bf16.gmra.mrb[4].mxu1 %vm1173_vm2, %v1129_v44 }
 0x26f   : > { %v1118_v54 = vmax.f32 %v1080_v49, 0.0  ;;  %v1083_v55 = vadd.f32 %v6117_v17, %v1082_v53  ;;  %1689 = vmatpush1.bf16.msra.mxu1 %v6991_v16  ;;  %v7005_v16 = vld [vmem:[%s8122_s21 + $0x64] ss:$8 sps:$4 sm:$0xff]  }
 0x270   : > { %v1121_v56 = vmax.f32 %v1091_v52, 0.0 }
 0x271   : > { %v1119_v57 = vmax.f32 %v1083_v55, 0.0 }
 0x272   : > { %v1131_v58 = vpack.c.bf16 %v1121_v56, %v1120_v51 }
 0x273   : > { %v1130_v59 = vpack.c.bf16 %v1119_v57, %v1118_v54  ;;  %v6557_v60 = vpop.f32.mrb[12].mxu0 }
 0x274   : > { %v1104_v61 = vadd.f32 %v6557_v60, %v6117_v17  ;;  %v1095_v62 = vpop.f32.mrb[13].mxu0 }
 0x275   : > { %v1096_v63 = vadd.f32 %v6117_v17, %v1095_v62  ;;  %v6558_v0 = vpop.f32.mrb[14].mxu0  ;;  %6575 = vmatprep.mubr.msk.bf16.mxu1 %vm1173_vm2, %v1130_v59 }
 0x276   : > { %v1124_v1 = vmax.f32 %v1104_v61, 0.0  ;;  %v1107_v2 = vadd.f32 %v6558_v0, %v6117_v17  ;;  %v1098_v3 = vpop.f32.mrb[15].mxu0  ;;  %6576 = vmatmul.mubr.msk.bf16.gmra.mrb[8].mxu1 %vm1173_vm2, %v1131_v58 }
 0x277   : > { %v1122_v4 = vmax.f32 %v1096_v63, 0.0  ;;  %v1099_v5 = vadd.f32 %v6117_v17, %v1098_v3  ;;  %v6996_v17 = vld [vmem:[%s8122_s21 + $0x34] ss:$8 sps:$4 sm:$0xff]  }
 0x278   : > { %v1125_v6 = vmax.f32 %v1107_v2, 0.0  ;;  %1690 = vmatprep.subr.bf16.mxu1 %v6996_v17  ;;  %v7003_v17 = vld [vmem:[%s8122_s21 + $0x60] ss:$8 sps:$4 sm:$0xff]  }
 0x279   : > { %v1123_v7 = vmax.f32 %v1099_v5, 0.0  ;;  %1691 = vmatpush1.bf16.msra.mxu1 %v6994_v18  ;;  %v7008_v18 = vld [vmem:[%s8122_s21 + $0x74] ss:$8 sps:$4 sm:$0xff]  }
 0x27a   : > { %v1133_v8 = vpack.c.bf16 %v1125_v6, %v1124_v1  ;;  %1692 = vmatprep.subr.bf16.mxu1 %v6999_v19  ;;  %v7006_v19 = vld [vmem:[%s8122_s21 + $0x70] ss:$8 sps:$4 sm:$0xff]  }
 0x27b   : > { %v1132_v9 = vpack.c.bf16 %v1123_v7, %v1122_v4 }
 0x27d   : > { %6579 = vmatprep.mubr.msk.bf16.mxu1 %vm1173_vm2, %v1132_v9  ;;  %1693 = vmatpush1.bf16.msra.mxu1 %v6997_v20  ;;  %v7545_v20 = vmov 0  }
 0x27e   : > { %6580 = vmatmul.mubr.msk.bf16.gmra.mrb[12].mxu1 %vm1173_vm2, %v1133_v8  ;;  %1694 = vmatprep.subr.bf16.mxu1 %v7002_v21  ;;  %v7009_v21 = vld [vmem:[%s8131_s2] ss:$16 sps:$4 sm:$0xff]  }
 0x27f   : > { %1716 = vmatprep.mubr.bf16.mxu1 %v7545_v20 }
 0x281   : > { %1695 = vmatpush1.bf16.msra.mxu1 %v7000_v22  ;;  %v7011_v22 = vld [vmem:[%s8131_s2 + $0x4] ss:$16 sps:$4 sm:$0xff]  }
 0x282   : > { %1696 = vmatprep.subr.bf16.mxu1 %v7005_v16  ;;  %2332 = vmatprep.subr.bf16.mxu0 %v7011_v22  ;;  %v7026_v16 = vld [vmem:[%s8131_s2 + $0x4c] ss:$16 sps:$4 sm:$0xff]   ;;  %v7024_v22 = vld [vmem:[%s8131_s2 + $0x48] ss:$16 sps:$4 sm:$0xff]  }
 0x285   : > { %1697 = vmatpush1.bf16.msra.mxu1 %v7003_v17 }
 0x286   : > { %1698 = vmatprep.subr.bf16.mxu1 %v7008_v18 }
 0x289   : > { %1699 = vmatpush1.bf16.msra.mxu1 %v7006_v19 }
 0x339   : > { %v6569_v24 = vpop.f32.mrb[0].mxu1 }
 0x33a   : > { %v1241_v25 = vadd.f32 %v6569_v24, %v6134_v23  ;;  %v1232_v26 = vpop.f32.mrb[1].mxu1  ;;  %v7017_v24 = vld [vmem:[%s8131_s2 + $0x24] ss:$16 sps:$4 sm:$0xff]  }
 0x33b   : > { %v1233_v27 = vadd.f32 %v6134_v23, %v1232_v26  ;;  %v6570_v28 = vpop.f32.mrb[2].mxu1  ;;  %v7023_v26 = vld [vmem:[%s8131_s2 + $0x44] ss:$16 sps:$4 sm:$0xff]  }
 0x33c   : > { %v1244_v29 = vadd.f32 %v6570_v28, %v6134_v23  ;;  %v1235_v30 = vpop.f32.mrb[3].mxu1  ;;  %v1297_v32 = vmax.f32 %v1241_v25, 0.0  ;;  %v7015_v25 = vld [vmem:[%s8131_s2 + $0x20] ss:$16 sps:$4 sm:$0xff]   ;;  %v7029_v28 = vld [vmem:[%s8131_s2 + $0x64] ss:$16 sps:$4 sm:$0xff]  }
 0x33d   : > { %v1236_v31 = vadd.f32 %v6134_v23, %v1235_v30  ;;  %v1295_v34 = vmax.f32 %v1233_v27, 0.0  ;;  %v7021_v27 = vld [vmem:[%s8131_s2 + $0x40] ss:$16 sps:$4 sm:$0xff]   ;;  %v7035_v30 = vld [vmem:[%s8131_s2 + $0x84] ss:$16 sps:$4 sm:$0xff]  }
 0x33e   : > { %v1298_v33 = vmax.f32 %v1244_v29, 0.0  ;;  %v7027_v29 = vld [vmem:[%s8131_s2 + $0x60] ss:$16 sps:$4 sm:$0xff]  }
 0x33f   : > { %v1296_v35 = vmax.f32 %v1236_v31, 0.0  ;;  %v7033_v31 = vld [vmem:[%s8131_s2 + $0x80] ss:$16 sps:$4 sm:$0xff]  }
 0x340   : > { %v1312_v36 = vpack.c.bf16 %v1298_v33, %v1297_v32  ;;  %v7041_v32 = vld [vmem:[%s8131_s2 + $0xa4] ss:$16 sps:$4 sm:$0xff]   ;;  %v7039_v33 = vld [vmem:[%s8131_s2 + $0xa0] ss:$16 sps:$4 sm:$0xff]  }
 0x341   : > { %v1311_v37 = vpack.c.bf16 %v1296_v35, %v1295_v34  ;;  %v6573_v38 = vpop.f32.mrb[4].mxu1  ;;  %v7047_v34 = vld [vmem:[%s8131_s2 + $0xc4] ss:$16 sps:$4 sm:$0xff]   ;;  %v7045_v35 = vld [vmem:[%s8131_s2 + $0xc0] ss:$16 sps:$4 sm:$0xff]  }
 0x342   : > { %v1257_v39 = vadd.f32 %v6573_v38, %v6134_v23  ;;  %v1248_v40 = vpop.f32.mrb[5].mxu1  ;;  %v7059_v38 = vld [vmem:[%s8131_s2 + $0x104] ss:$16 sps:$4 sm:$0xff]  }
 0x343   : > { %v1249_v41 = vadd.f32 %v6134_v23, %v1248_v40  ;;  %v6574_v42 = vpop.f32.mrb[6].mxu1  ;;  %6591 = vmatprep.mubr.msk.bf16.mxu0 %vm1173_vm2, %v1311_v37  ;;  %v7051_v37 = vld [vmem:[%s8131_s2 + $0xe0] ss:$16 sps:$4 sm:$0xff]   ;;  %v7065_v40 = vld [vmem:[%s8131_s2 + $0x124] ss:$16 sps:$4 sm:$0xff]  }
 0x344   : > { %v1301_v43 = vmax.f32 %v1257_v39, 0.0  ;;  %v1260_v44 = vadd.f32 %v6574_v42, %v6134_v23  ;;  %v1251_v45 = vpop.f32.mrb[7].mxu1  ;;  %6592 = vmatmul.mubr.msk.bf16.vlgmr.msra.gmra.mrb[16].mxu0 %vm1173_vm2, %v1312_v36  ;;  %v7053_v36 = vld [vmem:[%s8131_s2 + $0xe4] ss:$16 sps:$4 sm:$0xff]   ;;  %v7057_v39 = vld [vmem:[%s8131_s2 + $0x100] ss:$16 sps:$4 sm:$0xff]  }
 0x345   : > { %v1299_v46 = vmax.f32 %v1249_v41, 0.0  ;;  %v1252_v47 = vadd.f32 %v6134_v23, %v1251_v45  ;;  %2333 = vmatpush1.bf16.msra.mxu0 %v7009_v21  ;;  %v7063_v41 = vld [vmem:[%s8131_s2 + $0x120] ss:$16 sps:$4 sm:$0xff]   ;;  %v7071_v42 = vld [vmem:[%s8131_s2 + $0x144] ss:$16 sps:$4 sm:$0xff]  }
 0x346   : > { %v1302_v48 = vmax.f32 %v1260_v44, 0.0  ;;  %2334 = vmatprep.subr.bf16.mxu0 %v7017_v24  ;;  %v7077_v44 = vld [vmem:[%s8131_s2 + $0x164] ss:$16 sps:$4 sm:$0xff]   ;;  %v7075_v45 = vld [vmem:[%s8131_s2 + $0x160] ss:$16 sps:$4 sm:$0xff]  }
 0x347   : > { %v1300_v49 = vmax.f32 %v1252_v47, 0.0  ;;  %v7081_v47 = vld [vmem:[%s8131_s2 + $0x180] ss:$16 sps:$4 sm:$0xff]  }
 0x348   : > { %v1314_v50 = vpack.c.bf16 %v1302_v48, %v1301_v43  ;;  %v7069_v43 = vld [vmem:[%s8131_s2 + $0x140] ss:$16 sps:$4 sm:$0xff]   ;;  %v7089_v48 = vld [vmem:[%s8131_s2 + $0x1a4] ss:$16 sps:$4 sm:$0xff]  }
 0x349   : > { %v1313_v51 = vpack.c.bf16 %v1300_v49, %v1299_v46  ;;  %v6577_v52 = vpop.f32.mrb[8].mxu1  ;;  %2335 = vmatpush1.bf16.msra.mxu0 %v7015_v25  ;;  %v7083_v46 = vld [vmem:[%s8131_s2 + $0x184] ss:$16 sps:$4 sm:$0xff]   ;;  %v7087_v49 = vld [vmem:[%s8131_s2 + $0x1a0] ss:$16 sps:$4 sm:$0xff]  }
 0x34a   : > { %v1273_v53 = vadd.f32 %v6577_v52, %v6134_v23  ;;  %v1264_v54 = vpop.f32.mrb[9].mxu1  ;;  %2336 = vmatprep.subr.bf16.mxu0 %v7023_v26 }
 0x34b   : > { %v1265_v55 = vadd.f32 %v6134_v23, %v1264_v54  ;;  %v6578_v56 = vpop.f32.mrb[10].mxu1  ;;  %6595 = vmatprep.mubr.msk.bf16.mxu0 %vm1173_vm2, %v1313_v51 }
 0x34c   : > { %v1305_v57 = vmax.f32 %v1273_v53, 0.0  ;;  %v1276_v58 = vadd.f32 %v6578_v56, %v6134_v23  ;;  %v1267_v59 = vpop.f32.mrb[11].mxu1  ;;  %6596 = vmatmul.mubr.msk.bf16.gmra.mrb[20].mxu0 %vm1173_vm2, %v1314_v50  ;;  %v8245_v50 = vld [vmem:[%s743_s19] ss:$0 sm:$0xff]  ;;  %s9776_s19 = sld [smem:[#allocation63_spill]] }
 0x34d   : > { %v1303_v60 = vmax.f32 %v1265_v55, 0.0  ;;  %v1268_v61 = vadd.f32 %v6134_v23, %v1267_v59  ;;  %2337 = vmatpush1.bf16.msra.mxu0 %v7021_v27  ;;  %v7032_v27 = vld [vmem:[%s8131_s2 + $0x6c] ss:$16 sps:$4 sm:$0xff]  }
 0x34e   : > { %v1306_v62 = vmax.f32 %v1276_v58, 0.0  ;;  %2338 = vmatprep.subr.bf16.mxu0 %v7029_v28 }
 0x34f   : > { %v1304_v63 = vmax.f32 %v1268_v61, 0.0 }
 0x350   : > { %v1316_v0 = vpack.c.bf16 %v1306_v62, %v1305_v57 }
 0x351   : > { %v1315_v1 = vpack.c.bf16 %v1304_v63, %v1303_v60  ;;  %v6581_v2 = vpop.f32.mrb[12].mxu1  ;;  %2339 = vmatpush1.bf16.msra.mxu0 %v7027_v29 }
 0x352   : > { %v1289_v3 = vadd.f32 %v6581_v2, %v6134_v23  ;;  %v1280_v4 = vpop.f32.mrb[13].mxu1  ;;  %2340 = vmatprep.subr.bf16.mxu0 %v7035_v30  ;;  %s8383_s21 = scalar_lea.vmem %s9776_s19, %s6864_s18 }
 0x353   : > { %v1281_v5 = vadd.f32 %v6134_v23, %v1280_v4  ;;  %v6582_v6 = vpop.f32.mrb[14].mxu1  ;;  %6599 = vmatprep.mubr.msk.bf16.mxu0 %vm1173_vm2, %v1315_v1  ;;  %v7012_v1 = vld [vmem:[%s8131_s2 + $0x8] ss:$16 sps:$4 sm:$0xff]  }
 0x354   : > { %v1309_v7 = vmax.f32 %v1289_v3, 0.0  ;;  %v1292_v8 = vadd.f32 %v6582_v6, %v6134_v23  ;;  %v1283_v9 = vpop.f32.mrb[15].mxu1  ;;  %6600 = vmatmul.mubr.msk.bf16.gmra.mrb[24].mxu0 %vm1173_vm2, %v1316_v0 }
 0x355   : > { %v1307_v10 = vmax.f32 %v1281_v5, 0.0  ;;  %v1284_v11 = vadd.f32 %v6134_v23, %v1283_v9  ;;  %v7014_v23 = vld [vmem:[%s8131_s2 + $0xc] ss:$16 sps:$4 sm:$0xff]   ;;  %2341 = vmatpush1.bf16.msra.mxu0 %v7033_v31 }
 0x356   : > { %v1310_v12 = vmax.f32 %v1292_v8, 0.0  ;;  %2445 = vmatprep.subr.bf16.mxu1 %v7014_v23  ;;  %2342 = vmatprep.subr.bf16.mxu0 %v7041_v32  ;;  %v7020_v5 = vld [vmem:[%s8131_s2 + $0x2c] ss:$16 sps:$4 sm:$0xff]  }
 0x357   : > { %v1308_v13 = vmax.f32 %v1284_v11, 0.0 }
 0x358   : > { %v1318_v14 = vpack.c.bf16 %v1310_v12, %v1309_v7 }
 0x359   : > { %v1317_v15 = vpack.c.bf16 %v1308_v13, %v1307_v10  ;;  %2343 = vmatpush1.bf16.msra.mxu0 %v7039_v33  ;;  %v7018_v13 = vld [vmem:[%s8131_s2 + $0x28] ss:$16 sps:$4 sm:$0xff]  }
 0x35a   : > { %2344 = vmatprep.subr.bf16.mxu0 %v7047_v34 }
 0x35b   : > { %6603 = vmatprep.mubr.msk.bf16.mxu0 %vm1173_vm2, %v1317_v15 }
 0x35c   : > { %6604 = vmatmul.mubr.msk.bf16.gmra.mrb[28].mxu0 %vm1173_vm2, %v1318_v14 }
 0x35d   : > { %2345 = vmatpush1.bf16.msra.mxu0 %v7045_v35 }
 0x35e   : > { %2346 = vmatprep.subr.bf16.mxu0 %v7053_v36  ;;  %v7030_v36 = vld [vmem:[%s8131_s2 + $0x68] ss:$16 sps:$4 sm:$0xff]  }
 0x361   : > { %2347 = vmatpush1.bf16.msra.mxu0 %v7051_v37 }
 0x362   : > { %2348 = vmatprep.subr.bf16.mxu0 %v7059_v38 }
 0x365   : > { %2349 = vmatpush1.bf16.msra.mxu0 %v7057_v39 }
 0x366   : > { %2350 = vmatprep.subr.bf16.mxu0 %v7065_v40  ;;  %v7038_v40 = vld [vmem:[%s8131_s2 + $0x8c] ss:$16 sps:$4 sm:$0xff]  }
 0x369   : > { %2351 = vmatpush1.bf16.msra.mxu0 %v7063_v41 }
 0x36a   : > { %2352 = vmatprep.subr.bf16.mxu0 %v7071_v42 }
 0x36d   : > { %2353 = vmatpush1.bf16.msra.mxu0 %v7069_v43 }
 0x36e   : > { %2354 = vmatprep.subr.bf16.mxu0 %v7077_v44 }
 0x371   : > { %2355 = vmatpush1.bf16.msra.mxu0 %v7075_v45  ;;  %v7036_v45 = vld [vmem:[%s8131_s2 + $0x88] ss:$16 sps:$4 sm:$0xff]  }
 0x372   : > { %2356 = vmatprep.subr.bf16.mxu0 %v7083_v46 }
 0x375   : > { %2357 = vmatpush1.bf16.msra.mxu0 %v7081_v47 }
 0x376   : > { %2358 = vmatprep.subr.bf16.mxu0 %v7089_v48 }
 0x379   : > { %2359 = vmatpush1.bf16.msra.mxu0 %v7087_v49  ;;  %v7044_v49 = vld [vmem:[%s8131_s2 + $0xac] ss:$16 sps:$4 sm:$0xff]  }
 0x417   : > { %v6593_v51 = vpop.f32.mrb[16].mxu0 }
 0x418   : > { %v1425_v52 = vadd.f32 %v6593_v51, %v8245_v50  ;;  %v1416_v53 = vpop.f32.mrb[17].mxu0 }
 0x419   : > { %v1417_v54 = vadd.f32 %v8245_v50, %v1416_v53  ;;  %v6594_v55 = vpop.f32.mrb[18].mxu0 }
 0x41a   : > { %v1481_v56 = vmax.f32 %v1425_v52, 0.0  ;;  %v1428_v57 = vadd.f32 %v6594_v55, %v8245_v50  ;;  %v1419_v58 = vpop.f32.mrb[19].mxu0 }
 0x41b   : > { %v1479_v59 = vmax.f32 %v1417_v54, 0.0  ;;  %v1420_v60 = vadd.f32 %v8245_v50, %v1419_v58  ;;  %v7042_v58 = vld [vmem:[%s8131_s2 + $0xa8] ss:$16 sps:$4 sm:$0xff]  }
 0x41c   : > { %1497 = vst [vmem:[%s8252_s25 + $0x10] sm:$0xff] %v1481_v56  ;;  %v1482_v61 = vmax.f32 %v1428_v57, 0.0 }
 0x41d   : > { %1495 = vst [vmem:[%s8252_s25] sm:$0xff] %v1479_v59  ;;  %v1511_v62 = vmax.f32 %v1479_v59, %v1481_v56  ;;  %v1480_v63 = vmax.f32 %v1420_v60, 0.0 }
 0x41e   : > { %1498 = vst [vmem:[%s8252_s25 + $0x18] sm:$0xff] %v1482_v61  ;;  %v1569_v0 = vpack.c.bf16 %v1482_v61, %v1481_v56 }
 0x41f   : > { %1496 = vst [vmem:[%s8252_s25 + $0x8] sm:$0xff] %v1480_v63  ;;  %v1512_v2 = vmax.f32 %v1480_v63, %v1482_v61  ;;  %v1568_v3 = vpack.c.bf16 %v1480_v63, %v1479_v59  ;;  %v6597_v4 = vpop.f32.mrb[20].mxu0 }
 0x420   : > { %v1441_v6 = vadd.f32 %v6597_v4, %v8245_v50  ;;  %v1432_v7 = vpop.f32.mrb[21].mxu0 }
 0x421   : > { %v1433_v8 = vadd.f32 %v8245_v50, %v1432_v7  ;;  %v6598_v9 = vpop.f32.mrb[22].mxu0  ;;  %1717 = vmatmul.mubr.bf16.vlgmr.msra.gmra.mrb[16].mxu1 %v1568_v3  ;;  %v7056_v7 = vld [vmem:[%s8131_s2 + $0xec] ss:$16 sps:$4 sm:$0xff]  }
 0x422   : > { %v8265_v10 = vmax.f32 %v1441_v6, 0.0  ;;  %v1444_v11 = vadd.f32 %v6598_v9, %v8245_v50  ;;  %v1435_v12 = vpop.f32.mrb[23].mxu0  ;;  %1726 = vmatprep.mubr.bf16.mxu1 %v7545_v20  ;;  %2446 = vmatpush1.bf16.msra.mxu1 %v7012_v1  ;;  %v7054_v9 = vld [vmem:[%s8131_s2 + $0xe8] ss:$16 sps:$4 sm:$0xff]  }
 0x423   : > { %v1483_v14 = vmax.f32 %v1433_v8, 0.0  ;;  %v1436_v15 = vadd.f32 %v8245_v50, %v1435_v12  ;;  %2447 = vmatprep.subr.bf16.mxu1 %v7020_v5 }
 0x424   : > { %1501 = vst [vmem:[%s8252_s25 + $0x30] sm:$0xff] %v8265_v10  ;;  %v8274_v17 = vmax.f32 %v1444_v11, 0.0 }
 0x425   : > { %1499 = vst [vmem:[%s8252_s25 + $0x20] sm:$0xff] %v1483_v14  ;;  %v1513_v18 = vmax.f32 %v1511_v62, %v1483_v14  ;;  %v1484_v19 = vmax.f32 %v1436_v15, 0.0  ;;  %v7050_v62 = vld [vmem:[%s8131_s2 + $0xcc] ss:$16 sps:$4 sm:$0xff]   ;;  %v7060_v15 = vld [vmem:[%s8131_s2 + $0x108] ss:$16 sps:$4 sm:$0xff]  }
 0x426   : > { %1502 = vst [vmem:[%s8252_s25 + $0x38] sm:$0xff] %v8274_v17  ;;  %v1571_v21 = vpack.c.bf16 %v8274_v17, %v8265_v10  ;;  %2448 = vmatpush1.bf16.msra.mxu1 %v7018_v13  ;;  %v7062_v13 = vld [vmem:[%s8131_s2 + $0x10c] ss:$16 sps:$4 sm:$0xff]  }
 0x427   : > { %v1515_v23 = vmax.f32 %v1513_v18, %v8265_v10  ;;  %1500 = vst [vmem:[%s8252_s25 + $0x28] sm:$0xff] %v1484_v19  ;;  %v1514_v24 = vmax.f32 %v1512_v2, %v1484_v19  ;;  %v6601_v25 = vpop.f32.mrb[24].mxu0  ;;  %v1570_v26 = vpack.c.bf16 %v1484_v19, %v1483_v14  ;;  %2449 = vmatprep.subr.bf16.mxu1 %v7026_v16  ;;  %v7546_v18 = vmov 1983009808  }
 0x428   : > { %v1457_v28 = vadd.f32 %v6601_v25, %v8245_v50  ;;  %v1448_v29 = vpop.f32.mrb[25].mxu0  ;;  %v1540_v19 = vunpack.c.l.s4 %v7546_v18  ;;  %v2822_v18 = vld [vmem:[%s8143_s23 + $0x68] sm:$0xff] }
 0x429   : > { %v1516_v30 = vmax.f32 %v1514_v24, %v8274_v17  ;;  %1727 = vmatmul.mubr.bf16.gmra.mrb[20].mxu1 %v1569_v0  ;;  %v1449_v31 = vadd.f32 %v8245_v50, %v1448_v29  ;;  %v6602_v32 = vpop.f32.mrb[26].mxu0  ;;  %v7068_v17 = vld [vmem:[%s8131_s2 + $0x12c] ss:$16 sps:$4 sm:$0xff]  }
 0x42a   : > { %v8288_v33 = vmax.f32 %v1457_v28, 0.0  ;;  %v1460_v34 = vadd.f32 %v6602_v32, %v8245_v50  ;;  %v1451_v35 = vpop.f32.mrb[27].mxu0  ;;  %1736 = vmatprep.mubr.bf16.mxu1 %v7545_v20  ;;  %2450 = vmatpush1.bf16.msra.mxu1 %v7024_v22  ;;  %v1542_v22 = vlaneseq  ;;  %v1541_v25 = vunpack.c.0.s8 %v1540_v19  ;;  %v7074_v28 = vld [vmem:[%s8131_s2 + $0x14c] ss:$16 sps:$4 sm:$0xff]  }
 0x42b   : > { %v1517_v37 = vmax.f32 %v1515_v23, %v1516_v30  ;;  %v8293_v38 = vmax.f32 %v1449_v31, 0.0  ;;  %v1452_v39 = vadd.f32 %v8245_v50, %v1451_v35  ;;  %2451 = vmatprep.subr.bf16.mxu1 %v7032_v27  ;;  %v7066_v23 = vld [vmem:[%s8131_s2 + $0x128] ss:$16 sps:$4 sm:$0xff]   ;;  %v7080_v35 = vld [vmem:[%s8131_s2 + $0x16c] ss:$16 sps:$4 sm:$0xff]  }
 0x42c   : > { %1505 = vst [vmem:[%s8252_s25 + $0x50] sm:$0xff] %v8288_v33  ;;  %v8299_v41 = vmax.f32 %v1460_v34, 0.0  ;;  %v7072_v30 = vld [vmem:[%s8131_s2 + $0x148] ss:$16 sps:$4 sm:$0xff]  }
 0x42d   : > { %1503 = vst [vmem:[%s8252_s25 + $0x40] sm:$0xff] %v8293_v38  ;;  %v1524_v42 = vmax.f32 %v8293_v38, %v8288_v33  ;;  %v8305_v43 = vmax.f32 %v1452_v39, 0.0  ;;  %v1518_v59 = vrot.slane %v1517_v37, 4 }
 0x42e   : > { %1506 = vst [vmem:[%s8252_s25 + $0x58] sm:$0xff] %v8299_v41  ;;  %v1573_v44 = vpack.c.bf16 %v8299_v41, %v8288_v33  ;;  %2452 = vmatpush1.bf16.msra.mxu1 %v7030_v36 }
 0x42f   : > { %1504 = vst [vmem:[%s8252_s25 + $0x48] sm:$0xff] %v8305_v43  ;;  %v1525_v46 = vmax.f32 %v8305_v43, %v8299_v41  ;;  %v6605_v47 = vpop.f32.mrb[28].mxu0  ;;  %v1572_v48 = vpack.c.bf16 %v8305_v43, %v8293_v38  ;;  %2453 = vmatprep.subr.bf16.mxu1 %v7038_v40  ;;  %v1519_v3 = vmax.f32 %v1517_v37, %v1518_v59  ;;  %v7078_v37 = vld [vmem:[%s8131_s2 + $0x168] ss:$16 sps:$4 sm:$0xff]   ;;  %v7086_v40 = vld [vmem:[%s8131_s2 + $0x18c] ss:$16 sps:$4 sm:$0xff]  }
 0x430   : > { %v1473_v51 = vadd.f32 %v6605_v47, %v8245_v50  ;;  %v1464_v52 = vpop.f32.mrb[29].mxu0  ;;  %v7084_v41 = vld [vmem:[%s8131_s2 + $0x188] ss:$16 sps:$4 sm:$0xff]   ;;  %v7095_v47 = vld [vmem:[%s8131_s2 + $0x1c4] ss:$16 sps:$4 sm:$0xff]  }
 0x431   : > { %v1465_v53 = vadd.f32 %v8245_v50, %v1464_v52  ;;  %v6606_v54 = vpop.f32.mrb[30].mxu0  ;;  %1737 = vmatmul.mubr.bf16.gmra.mrb[24].mxu1 %v1570_v26  ;;  %v1520_v11 = vrot.slane %v1519_v3, 2  ;;  %v8362_v26 = vshrl.u32 %v1542_v22, 7  ;;  %2360 = vmatprep.subr.bf16.mxu0 %v7095_v47  ;;  %v7104_v52 = vld [vmem:[%s8131_s2 + $0x1ec] ss:$16 sps:$4 sm:$0xff]   ;;  %v2814_v59 = vld [vmem:[%s8143_s23 + $0x28] sm:$0xff] }
 0x432   : > { %v8321_v55 = vmax.f32 %v1473_v51, 0.0  ;;  %v1476_v56 = vadd.f32 %v6606_v54, %v8245_v50  ;;  %v1467_v57 = vpop.f32.mrb[31].mxu0  ;;  %1746 = vmatprep.mubr.bf16.mxu1 %v7545_v20  ;;  %2454 = vmatpush1.bf16.msra.mxu1 %v7036_v45  ;;  %v7096_v51 = vld [vmem:[%s8131_s2 + $0x1c8] ss:$16 sps:$4 sm:$0xff]  }
 0x433   : > { %v8326_v60 = vmax.f32 %v1465_v53, 0.0  ;;  %v1468_v61 = vadd.f32 %v8245_v50, %v1467_v57  ;;  %2455 = vmatprep.subr.bf16.mxu1 %v7044_v49  ;;  %v7048_v50 = vld [vmem:[%s8131_s2 + $0xc8] ss:$16 sps:$4 sm:$0xff]   ;;  %v1521_v16 = vmax.f32 %v1519_v3, %v1520_v11  ;;  %9774 = vst [vmem:[#allocation32_spill] sm:$0xff] %v8362_v26  ;;  %v8367_v32 = vsub.s32 %v1541_v25, %v8362_v26  ;;  %v7093_v49 = vld [vmem:[%s8131_s2 + $0x1c0] ss:$16 sps:$4 sm:$0xff]  }
 0x434   : > { %1509 = vst [vmem:[%s8252_s25 + $0x70] sm:$0xff] %v8321_v55  ;;  %v8332_v63 = vmax.f32 %v1476_v56, 0.0  ;;  %2361 = vmatpush1.bf16.msra.mxu0 %v7093_v49  ;;  %v7099_v53 = vld [vmem:[%s8131_s2 + $0x1e0] ss:$16 sps:$4 sm:$0xff]   ;;  %v7102_v54 = vld [vmem:[%s8131_s2 + $0x1e8] ss:$16 sps:$4 sm:$0xff]  }
 0x435   : > { %1507 = vst [vmem:[%s8252_s25 + $0x60] sm:$0xff] %v8326_v60  ;;  %v1526_v0 = vmax.f32 %v1524_v42, %v8326_v60  ;;  %v8337_v1 = vmax.f32 %v1468_v61, 0.0  ;;  %v1522_v24 = vrot.slane %v1521_v16, 1  ;;  %9775 = vst [vmem:[#allocation33_spill] sm:$0xff] %v8367_v32  ;;  %v2813_v56 = vld [vmem:[%s8143_s23 + $0x20] sm:$0xff]  ;;  %v2810_v57 = vld [vmem:[%s8143_s23 + $0x8] sm:$0xff] }
 0x436   : > { %1510 = vst [vmem:[%s8252_s25 + $0x78] sm:$0xff] %v8332_v63  ;;  %v1575_v2 = vpack.c.bf16 %v8332_v63, %v8321_v55  ;;  %2456 = vmatpush1.bf16.msra.mxu1 %v7042_v58  ;;  %v8412_v61 = vsub.s32 0, %v8362_v26 }
 0x437   : > { %v1528_v4 = vmax.f32 %v1526_v0, %v8321_v55  ;;  %1508 = vst [vmem:[%s8252_s25 + $0x68] sm:$0xff] %v8337_v1  ;;  %v1527_v5 = vmax.f32 %v1525_v46, %v8337_v1  ;;  %v1574_v6 = vpack.c.bf16 %v8337_v1, %v8326_v60  ;;  %2457 = vmatprep.subr.bf16.mxu1 %v7050_v62  ;;  %v7090_v46 = vld [vmem:[%s8131_s2 + $0x1a8] ss:$16 sps:$4 sm:$0xff]   ;;  %v1592_v62 = vld [vmem:[%s8124_s1] sm:$0x3] }
 0x438   : > { %v1523_v31 = vmax.f32 %v1521_v16, %v1522_v24  ;;  %v2809_v55 = vld [vmem:[%s8143_s23] sm:$0xff]  ;;  %v6243_v60 = vcombine.high %v2810_v57, %v2814_v59  ;;  %9777 = vst [vmem:[#allocation34_spill] sm:$0xff] %v8412_v61  ;;  %v8419_v0 = vrot.slane %v1592_v62, %v8412_v61  ;;  %v2818_v16 = vld [vmem:[%s8143_s23 + $0x48] sm:$0xff]  ;;  %v6242_v24 = vcombine.low %v2810_v57, %v2814_v59 }
 0x439   : > { %v1529_v8 = vmax.f32 %v1527_v5, %v8332_v63  ;;  %1747 = vmatmul.mubr.bf16.gmra.mrb[28].mxu1 %v1571_v21  ;;  %v6241_v58 = vcombine.high %v2809_v55, %v2813_v56  ;;  %v8416_v63 = vsub.s32 1, %v8362_v26 }
 0x43a   : > { %1756 = vmatprep.mubr.bf16.mxu1 %v7545_v20  ;;  %2458 = vmatpush1.bf16.msra.mxu1 %v7048_v50  ;;  %v1545_v38 = vrot.slane %v1523_v31, %v8367_v32 }
 0x43b   : > { %v1530_v12 = vmax.f32 %v1528_v4, %v1529_v8  ;;  %2459 = vmatprep.subr.bf16.mxu1 %v7056_v7  ;;  %9778 = vst [vmem:[#allocation35_spill] sm:$0xff] %v8416_v63  ;;  %v8422_v1 = vrot.slane %v1592_v62, %v8416_v63 }
 0x43d   : > { %v1531_v14 = vrot.slane %v1530_v12, 4 }
 0x43e   : > { %2460 = vmatpush1.bf16.msra.mxu1 %v7054_v9 }
 0x43f   : > { %v1532_v10 = vmax.f32 %v1530_v12, %v1531_v14  ;;  %2461 = vmatprep.subr.bf16.mxu1 %v7062_v13  ;;  %v2817_v12 = vld [vmem:[%s8143_s23 + $0x40] sm:$0xff] }
 0x441   : > { %v1533_v21 = vrot.slane %v1532_v10, 2  ;;  %1757 = vmatmul.mubr.bf16.gmra.mrb[32].mxu1 %v1572_v48  ;;  %v7098_v48 = vld [vmem:[%s8131_s2 + $0x1cc] ss:$16 sps:$4 sm:$0xff]  }
 0x442   : > { %1766 = vmatprep.mubr.bf16.mxu1 %v7545_v20  ;;  %2462 = vmatpush1.bf16.msra.mxu1 %v7060_v15  ;;  %v2821_v15 = vld [vmem:[%s8143_s23 + $0x60] sm:$0xff] }
 0x443   : > { %v1534_v27 = vmax.f32 %v1532_v10, %v1533_v21  ;;  %2463 = vmatprep.subr.bf16.mxu1 %v7068_v17 }
 0x445   : > { %v1535_v29 = vrot.slane %v1534_v27, 1 }
 0x446   : > { %2464 = vmatpush1.bf16.msra.mxu1 %v7066_v23  ;;  %v6240_v23 = vcombine.low %v2809_v55, %v2813_v56 }
 0x447   : > { %v1536_v34 = vmax.f32 %v1534_v27, %v1535_v29  ;;  %2465 = vmatprep.subr.bf16.mxu1 %v7074_v28  ;;  %v6249_v28 = vcombine.high %v2817_v12, %v2821_v15  ;;  %v6251_v29 = vcombine.high %v2818_v16, %v2822_v18 }
 0x449   : > { %v1552_v36 = vrot.slane %v1536_v34, %v8367_v32  ;;  %1767 = vmatmul.mubr.bf16.gmra.mrb[36].mxu1 %v1573_v44  ;;  %v7092_v44 = vld [vmem:[%s8131_s2 + $0x1ac] ss:$16 sps:$4 sm:$0xff]  }
 0x44a   : > { %1776 = vmatprep.mubr.bf16.mxu1 %v7545_v20  ;;  %2466 = vmatpush1.bf16.msra.mxu1 %v7072_v30  ;;  %v2825_v30 = vld [vmem:[%s8143_s23 + $0x80] sm:$0xff] }
 0x44b   : > { %v1557_v39 = vrot.slane %v1552_v36, 7  ;;  %2467 = vmatprep.subr.bf16.mxu1 %v7080_v35  ;;  %v2829_v35 = vld [vmem:[%s8143_s23 + $0xa0] sm:$0xff]  ;;  %v2826_v36 = vld [vmem:[%s8143_s23 + $0x88] sm:$0xff] }
 0x44c   : > { %v6256_v56 = vcombine.low %v2825_v30, %v2829_v35 }
 0x44d   : > { %v1559_v42 = vsel %vm1558_vm3, %v1557_v39, %v1545_v38 }
 0x44e   : > { %v1561_v33 = vsel %vm1560_vm4, %v1557_v39, %v1559_v42  ;;  %2468 = vmatpush1.bf16.msra.mxu1 %v7078_v37  ;;  %v2830_v37 = vld [vmem:[%s8143_s23 + $0xa8] sm:$0xff] }
 0x44f   : > { %v1563_v43 = vsel %vm1562_vm5, %v1557_v39, %v1561_v33  ;;  %2469 = vmatprep.subr.bf16.mxu1 %v7086_v40  ;;  %v6259_v47 = vcombine.high %v2826_v36, %v2830_v37 }
 0x450   : > { %v1565_v45 = vsel %vm1564_vm6, %v1557_v39, %v1563_v43  ;;  %v6250_v43 = vcombine.low %v2818_v16, %v2822_v18 }
 0x451   : > { %1567 = vst [vmem:[%s8383_s21 + $0x1c] sm:$0x3] %v1565_v45  ;;  %1777 = vmatmul.mubr.bf16.gmra.mrb[40].mxu1 %v1574_v6 }
 0x452   : > { %1786 = vmatprep.mubr.bf16.mxu1 %v7545_v20  ;;  %2470 = vmatpush1.bf16.msra.mxu1 %v7084_v41  ;;  %v7101_v20 = vld [vmem:[%s8131_s2 + $0x1e4] ss:$16 sps:$4 sm:$0xff]   ;;  %v6248_v41 = vcombine.low %v2817_v12, %v2821_v15 }
 0x453   : > { %2471 = vmatprep.subr.bf16.mxu1 %v7092_v44  ;;  %2362 = vmatprep.subr.bf16.mxu0 %v7101_v20  ;;  %v2837_v20 = vld [vmem:[%s8143_s23 + $0xe0] sm:$0xff] }
 0x454   : > { %2363 = vmatpush1.bf16.msra.mxu0 %v7099_v53  ;;  %v2838_v53 = vld [vmem:[%s8143_s23 + $0xe8] sm:$0xff] }
 0x455   : > { %4387 = vmatprep.subr.bf16.mxu0 %v6241_v58 }
 0x456   : > { %2472 = vmatpush1.bf16.msra.mxu1 %v7090_v46  ;;  %v6257_v46 = vcombine.high %v2825_v30, %v2829_v35 }
 0x457   : > { %2473 = vmatprep.subr.bf16.mxu1 %v7098_v48  ;;  %v2833_v48 = vld [vmem:[%s8143_s23 + $0xc0] sm:$0xff] }
 0x458   : > { %v6264_v16 = vcombine.low %v2833_v48, %v2837_v20 }
 0x459   : > { %1787 = vmatmul.mubr.bf16.gmra.mrb[44].mxu1 %v1575_v2 }
 0x45a   : > { %2474 = vmatpush1.bf16.msra.mxu1 %v7096_v51 }
 0x45b   : > { %2475 = vmatprep.subr.bf16.mxu1 %v7104_v52  ;;  %v2834_v52 = vld [vmem:[%s8143_s23 + $0xc8] sm:$0xff] }
 0x45c   : > { %v6266_v18 = vcombine.low %v2834_v52, %v2838_v53 }
 0x45e   : > { %2476 = vmatpush1.bf16.msra.mxu1 %v7102_v54 }
 0x45f   : > { %4613 = vmatprep.subr.bf16.mxu1 %v6243_v60  ;;  %v6258_v60 = vcombine.low %v2826_v36, %v2830_v37 }
 0x4f4   : > { %v1718_v2 = vpop.f32.mrb[16].mxu1 }
 0x4f5   : > { %v1719_v50 = vadd.f32 %v1718_v2, %v8419_v0  ;;  %v1720_v3 = vpop.f32.mrb[17].mxu1 }
 0x4f6   : > { %v1721_v4 = vadd.f32 %v1720_v3, %v8422_v1  ;;  %v1722_v5 = vpop.f32.mrb[18].mxu1  ;;  %v6267_v3 = vcombine.high %v2834_v52, %v2838_v53 }
 0x4f7   : > { %v1723_v6 = vadd.f32 %v1722_v5, %v8419_v0  ;;  %v1724_v7 = vpop.f32.mrb[19].mxu1  ;;  %v1797_v9 = vmax.f32 %v1719_v50, 0.0  ;;  %v6265_v50 = vcombine.high %v2833_v48, %v2837_v20 }
 0x4f8   : > { %v1725_v8 = vadd.f32 %v1724_v7, %v8422_v1  ;;  %v1798_v13 = vmax.f32 %v1721_v4, 0.0  ;;  %v2841_v4 = vld [vmem:[%s8143_s23 + $0x100] sm:$0xff] }
 0x4f9   : > { %v1799_v11 = vmax.f32 %v1723_v6, 0.0  ;;  %v2845_v7 = vld [vmem:[%s8143_s23 + $0x120] sm:$0xff] }
 0x4fa   : > { %v1800_v14 = vmax.f32 %v1725_v8, 0.0  ;;  %v2842_v8 = vld [vmem:[%s8143_s23 + $0x108] sm:$0xff] }
 0x4fb   : > { %v1829_v19 = vmax.f32 %v1797_v9, %v1799_v11  ;;  %v1910_v22 = vpack.c.bf16 %v1799_v11, %v1797_v9  ;;  %v2846_v9 = vld [vmem:[%s8143_s23 + $0x128] sm:$0xff] }
 0x4fc   : > { %v1842_v10 = vmax.f32 %v1798_v13, %v1800_v14  ;;  %v1911_v17 = vpack.c.bf16 %v1800_v14, %v1798_v13  ;;  %v1728_v21 = vpop.f32.mrb[20].mxu1  ;;  %v6274_v37 = vcombine.low %v2842_v8, %v2846_v9 }
 0x4fd   : > { %v1729_v25 = vadd.f32 %v1728_v21, %v8419_v0  ;;  %v1730_v27 = vpop.f32.mrb[21].mxu1  ;;  %v2849_v21 = vld [vmem:[%s8143_s23 + $0x140] sm:$0xff] }
 0x4fe   : > { %v1731_v31 = vadd.f32 %v1730_v27, %v8422_v1  ;;  %v1732_v34 = vpop.f32.mrb[22].mxu1  ;;  %2364 = vmatprep.mubr.bf16.mxu0 %v1911_v17  ;;  %2477 = vmatprep.mubr.bf16.mxu1 %v1911_v17  ;;  %v6275_v17 = vcombine.high %v2842_v8, %v2846_v9  ;;  %v2850_v27 = vld [vmem:[%s8143_s23 + $0x148] sm:$0xff] }
 0x4ff   : > { %v1801_v38 = vmax.f32 %v1729_v25, 0.0  ;;  %v1733_v39 = vadd.f32 %v1732_v34, %v8419_v0  ;;  %v1734_v40 = vpop.f32.mrb[23].mxu1  ;;  %2365 = vmatmul.mubr.bf16.vlgmr.msra.gmra.mrb[32].mxu0 %v1910_v22  ;;  %2478 = vmatmul.mubr.bf16.vlgmr.msra.gmra.mrb[48].mxu1 %v1910_v22  ;;  %v2853_v25 = vld [vmem:[%s8143_s23 + $0x160] sm:$0xff] }
 0x500   : > { %v1802_v42 = vmax.f32 %v1731_v31, 0.0  ;;  %v1735_v33 = vadd.f32 %v1734_v40, %v8422_v1  ;;  %4388 = vmatpush1.bf16.msra.mxu0 %v6240_v23  ;;  %4614 = vmatpush1.bf16.msra.mxu1 %v6242_v24  ;;  %v6272_v31 = vcombine.low %v2841_v4, %v2845_v7  ;;  %v6281_v40 = vcombine.high %v2849_v21, %v2853_v25 }
 0x501   : > { %v1830_v44 = vmax.f32 %v1829_v19, %v1801_v38  ;;  %v1803_v45 = vmax.f32 %v1733_v39, 0.0  ;;  %4389 = vmatprep.subr.bf16.mxu0 %v6249_v28  ;;  %4615 = vmatprep.subr.bf16.mxu1 %v6251_v29  ;;  %v2854_v28 = vld [vmem:[%s8143_s23 + $0x168] sm:$0xff]  ;;  %v6280_v52 = vcombine.low %v2849_v21, %v2853_v25 }
 0x502   : > { %v1843_v49 = vmax.f32 %v1842_v10, %v1802_v42  ;;  %v1804_v51 = vmax.f32 %v1735_v33, 0.0  ;;  %v6273_v10 = vcombine.high %v2841_v4, %v2845_v7  ;;  %v8458_v33 = vld [vmem:[%s8143_s23 + $0x180] sm:$0xff]  ;;  %v6282_v53 = vcombine.low %v2850_v27, %v2854_v28  ;;  %v8485_v21 = vld [vmem:[%s8143_s23 + $0x208] sm:$0xff] }
 0x503   : > { %v1831_v54 = vmax.f32 %v1830_v44, %v1803_v45  ;;  %v1912_v55 = vpack.c.bf16 %v1803_v45, %v1801_v38  ;;  %v2861_v44 = vld [vmem:[%s8143_s23 + $0x1a0] sm:$0xff]  ;;  %v2858_v45 = vld [vmem:[%s8143_s23 + $0x188] sm:$0xff] }
 0x504   : > { %v1844_v57 = vmax.f32 %v1843_v49, %v1804_v51  ;;  %v1913_v58 = vpack.c.bf16 %v1804_v51, %v1802_v42  ;;  %v1738_v59 = vpop.f32.mrb[24].mxu1  ;;  %4390 = vmatpush1.bf16.msra.mxu0 %v6248_v41  ;;  %4616 = vmatpush1.bf16.msra.mxu1 %v6250_v43  ;;  %v6283_v42 = vcombine.high %v2850_v27, %v2854_v28 }
 0x505   : > { %v1739_v62 = vadd.f32 %v1738_v59, %v8419_v0  ;;  %v1740_v2 = vpop.f32.mrb[25].mxu1  ;;  %4391 = vmatprep.subr.bf16.mxu0 %v6257_v46  ;;  %4617 = vmatprep.subr.bf16.mxu1 %v6259_v47  ;;  %v2862_v46 = vld [vmem:[%s8143_s23 + $0x1a8] sm:$0xff] }
 0x506   : > { %v1741_v5 = vadd.f32 %v1740_v2, %v8422_v1  ;;  %v1742_v6 = vpop.f32.mrb[26].mxu1  ;;  %2374 = vmatprep.mubr.bf16.mxu0 %v1913_v58  ;;  %2487 = vmatprep.mubr.bf16.mxu1 %v1913_v58  ;;  %v8468_v58 = vld [vmem:[%s8143_s23 + $0x1c0] sm:$0xff]  ;;  %v2866_v2 = vld [vmem:[%s8143_s23 + $0x1c8] sm:$0xff]  ;;  %v6290_v9 = vcombine.low %v2858_v45, %v2862_v46 }
 0x507   : > { %v1805_v11 = vmax.f32 %v1739_v62, 0.0  ;;  %v1743_v12 = vadd.f32 %v1742_v6, %v8419_v0  ;;  %v1744_v13 = vpop.f32.mrb[27].mxu1  ;;  %2375 = vmatmul.mubr.bf16.gmra.mrb[36].mxu0 %v1912_v55  ;;  %2488 = vmatmul.mubr.bf16.gmra.mrb[52].mxu1 %v1912_v55  ;;  %v2869_v62 = vld [vmem:[%s8143_s23 + $0x1e0] sm:$0xff] }
 0x508   : > { %v1806_v14 = vmax.f32 %v1741_v5, 0.0  ;;  %v1745_v15 = vadd.f32 %v1744_v13, %v8422_v1  ;;  %4392 = vmatpush1.bf16.msra.mxu0 %v6256_v56  ;;  %4618 = vmatpush1.bf16.msra.mxu1 %v6258_v60  ;;  %v6289_v56 = vcombine.high %v8458_v33, %v2861_v44  ;;  %v6288_v5 = vcombine.low %v8458_v33, %v2861_v44  ;;  %v2886_v44 = vld [vmem:[%s8143_s23 + $0x268] sm:$0xff] }
 0x509   : > { %v1832_v19 = vmax.f32 %v1831_v54, %v1805_v11  ;;  %v1807_v22 = vmax.f32 %v1743_v12, 0.0  ;;  %4393 = vmatprep.subr.bf16.mxu0 %v6265_v50  ;;  %4619 = vmatprep.subr.bf16.mxu1 %v6267_v3  ;;  %v2870_v50 = vld [vmem:[%s8143_s23 + $0x1e8] sm:$0xff] }
 0x50a   : > { %v1845_v23 = vmax.f32 %v1844_v57, %v1806_v14  ;;  %v1808_v24 = vmax.f32 %v1745_v15, 0.0  ;;  %v6291_v57 = vcombine.high %v2858_v45, %v2862_v46  ;;  %v6299_v15 = vcombine.high %v2866_v2, %v2870_v50 }
 0x50b   : > { %v1833_v29 = vmax.f32 %v1832_v19, %v1807_v22  ;;  %v1914_v30 = vpack.c.bf16 %v1807_v22, %v1805_v11  ;;  %v6298_v28 = vcombine.low %v2866_v2, %v2870_v50  ;;  %v2893_v2 = vld [vmem:[%s8143_s23 + $0x2a0] sm:$0xff]  ;;  %v2890_v50 = vld [vmem:[%s8143_s23 + $0x288] sm:$0xff] }
 0x50c   : > { %v1846_v34 = vmax.f32 %v1845_v23, %v1808_v24  ;;  %v1915_v35 = vpack.c.bf16 %v1808_v24, %v1806_v14  ;;  %v1748_v36 = vpop.f32.mrb[28].mxu1  ;;  %4394 = vmatpush1.bf16.msra.mxu0 %v6264_v16  ;;  %4620 = vmatpush1.bf16.msra.mxu1 %v6266_v18  ;;  %v6297_v14 = vcombine.high %v8468_v58, %v2869_v62  ;;  %v8477_v16 = vld [vmem:[%s8143_s23 + $0x200] sm:$0xff]  ;;  %v8488_v23 = vld [vmem:[%s8143_s23 + $0x228] sm:$0xff] }
 0x50d   : > { %v1749_v38 = vadd.f32 %v1748_v36, %v8419_v0  ;;  %v1750_v39 = vpop.f32.mrb[29].mxu1  ;;  %4395 = vmatprep.subr.bf16.mxu0 %v6273_v10  ;;  %4621 = vmatprep.subr.bf16.mxu1 %v6275_v17  ;;  %v8480_v18 = vld [vmem:[%s8143_s23 + $0x220] sm:$0xff]  ;;  %v6296_v17 = vcombine.low %v8468_v58, %v2869_v62 }
 0x50e   : > { %v1751_v41 = vadd.f32 %v1750_v39, %v8422_v1  ;;  %v1752_v43 = vpop.f32.mrb[30].mxu1  ;;  %2384 = vmatprep.mubr.bf16.mxu0 %v1915_v35  ;;  %2497 = vmatprep.mubr.bf16.mxu1 %v1915_v35  ;;  %v6304_v33 = vcombine.low %v8477_v16, %v8480_v18  ;;  %v8509_v58 = vld [vmem:[%s8143_s23 + $0x280] sm:$0xff] }
 0x50f   : > { %v1809_v47 = vmax.f32 %v1749_v38, 0.0  ;;  %v1753_v48 = vadd.f32 %v1752_v43, %v8419_v0  ;;  %v1754_v49 = vpop.f32.mrb[31].mxu1  ;;  %2385 = vmatmul.mubr.bf16.gmra.mrb[40].mxu0 %v1914_v30  ;;  %2498 = vmatmul.mubr.bf16.gmra.mrb[56].mxu1 %v1914_v30  ;;  %v8497_v38 = vld [vmem:[%s8143_s23 + $0x240] sm:$0xff]  ;;  %v2882_v43 = vld [vmem:[%s8143_s23 + $0x248] sm:$0xff] }
 0x510   : > { %v1810_v51 = vmax.f32 %v1751_v41, 0.0  ;;  %v1755_v20 = vadd.f32 %v1754_v49, %v8422_v1  ;;  %4396 = vmatpush1.bf16.msra.mxu0 %v6272_v31  ;;  %4622 = vmatpush1.bf16.msra.mxu1 %v6274_v37  ;;  %v6305_v31 = vcombine.high %v8477_v16, %v8480_v18  ;;  %v6307_v37 = vcombine.high %v8485_v21, %v8488_v23  ;;  %v2885_v41 = vld [vmem:[%s8143_s23 + $0x260] sm:$0xff] }
 0x511   : > { %v1834_v54 = vmax.f32 %v1833_v29, %v1809_v47  ;;  %v1811_v55 = vmax.f32 %v1753_v48, 0.0  ;;  %4397 = vmatprep.subr.bf16.mxu0 %v6281_v40  ;;  %4623 = vmatprep.subr.bf16.mxu1 %v6283_v42  ;;  %v6306_v48 = vcombine.low %v8485_v21, %v8488_v23  ;;  %v6321_v16 = vcombine.high %v8509_v58, %v2893_v2  ;;  %v2901_v21 = vld [vmem:[%s8143_s23 + $0x2e0] sm:$0xff]  ;;  %v2898_v23 = vld [vmem:[%s8143_s23 + $0x2c8] sm:$0xff] }
 0x512   : > { %v1847_v59 = vmax.f32 %v1846_v34, %v1810_v51  ;;  %v1812_v60 = vmax.f32 %v1755_v20, 0.0 }
 0x513   : > { %v1835_v3 = vmax.f32 %v1834_v54, %v1811_v55  ;;  %v1916_v4 = vpack.c.bf16 %v1811_v55, %v1809_v47 }
 0x514   : > { %v1848_v6 = vmax.f32 %v1847_v59, %v1812_v60  ;;  %v1917_v7 = vpack.c.bf16 %v1812_v60, %v1810_v51  ;;  %v1758_v8 = vpop.f32.mrb[32].mxu1  ;;  %4398 = vmatpush1.bf16.msra.mxu0 %v6280_v52  ;;  %4624 = vmatpush1.bf16.msra.mxu1 %v6282_v53 }
 0x515   : > { %v1836_v11 = vrot.slane %v1835_v3, 4  ;;  %v1759_v12 = vadd.f32 %v1758_v8, %v8419_v0  ;;  %v1760_v13 = vpop.f32.mrb[33].mxu1  ;;  %4399 = vmatprep.subr.bf16.mxu0 %v6289_v56  ;;  %4625 = vmatprep.subr.bf16.mxu1 %v6291_v57  ;;  %v6313_v56 = vcombine.high %v8497_v38, %v2885_v41  ;;  %v6315_v57 = vcombine.high %v2882_v43, %v2886_v44 }
 0x516   : > { %v1849_v19 = vrot.slane %v1848_v6, 4  ;;  %v1761_v22 = vadd.f32 %v1760_v13, %v8422_v1  ;;  %v1762_v10 = vpop.f32.mrb[34].mxu1  ;;  %2394 = vmatprep.mubr.bf16.mxu0 %v1917_v7  ;;  %2507 = vmatprep.mubr.bf16.mxu1 %v1917_v7  ;;  %v6312_v8 = vcombine.low %v8497_v38, %v2885_v41  ;;  %v6314_v13 = vcombine.low %v2882_v43, %v2886_v44  ;;  %v2906_v41 = vld [vmem:[%s8143_s23 + $0x308] sm:$0xff] }
 0x517   : > { %v1837_v24 = vmax.f32 %v1835_v3, %v1836_v11  ;;  %v1763_v25 = vadd.f32 %v1762_v10, %v8419_v0  ;;  %v1764_v27 = vpop.f32.mrb[35].mxu1  ;;  %2395 = vmatmul.mubr.bf16.gmra.mrb[44].mxu0 %v1916_v4  ;;  %2508 = vmatmul.mubr.bf16.gmra.mrb[60].mxu1 %v1916_v4  ;;  %v1813_v35 = vmax.f32 %v1759_v12, 0.0  ;;  %v2894_v3 = vld [vmem:[%s8143_s23 + $0x2a8] sm:$0xff] }
 0x518   : > { %v1850_v29 = vmax.f32 %v1848_v6, %v1849_v19  ;;  %v1765_v30 = vadd.f32 %v1764_v27, %v8422_v1  ;;  %4400 = vmatpush1.bf16.msra.mxu0 %v6288_v5  ;;  %4626 = vmatpush1.bf16.msra.mxu1 %v6290_v9  ;;  %v1814_v40 = vmax.f32 %v1761_v22, 0.0  ;;  %v6323_v18 = vcombine.high %v2890_v50, %v2894_v3  ;;  %v2897_v19 = vld [vmem:[%s8143_s23 + $0x2c0] sm:$0xff]  ;;  %v2910_v43 = vld [vmem:[%s8143_s23 + $0x328] sm:$0xff] }
 0x519   : > { %v1838_v34 = vrot.slane %v1837_v24, 2  ;;  %v1815_v36 = vmax.f32 %v1763_v25, 0.0  ;;  %4401 = vmatprep.subr.bf16.mxu0 %v6297_v14  ;;  %4627 = vmatprep.subr.bf16.mxu1 %v6299_v15 }
 0x51a   : > { %v1851_v39 = vrot.slane %v1850_v29, 2  ;;  %v1816_v42 = vmax.f32 %v1765_v30, 0.0 }
 0x51b   : > { %v1839_v45 = vmax.f32 %v1837_v24, %v1838_v34  ;;  %v1855_v46 = vmax.f32 %v1813_v35, %v1815_v36  ;;  %v1918_v47 = vpack.c.bf16 %v1815_v36, %v1813_v35  ;;  %v2902_v24 = vld [vmem:[%s8143_s23 + $0x2e8] sm:$0xff]  ;;  %v6322_v34 = vcombine.low %v2890_v50, %v2894_v3 }
 0x51c   : > { %v1852_v49 = vmax.f32 %v1850_v29, %v1851_v39  ;;  %v1868_v51 = vmax.f32 %v1814_v40, %v1816_v42  ;;  %v1919_v20 = vpack.c.bf16 %v1816_v42, %v1814_v40  ;;  %v1768_v52 = vpop.f32.mrb[36].mxu1  ;;  %4402 = vmatpush1.bf16.msra.mxu0 %v6296_v17  ;;  %4628 = vmatpush1.bf16.msra.mxu1 %v6298_v28  ;;  %v2905_v39 = vld [vmem:[%s8143_s23 + $0x300] sm:$0xff] }
 0x51d   : > { %v1840_v53 = vrot.slane %v1839_v45, 1  ;;  %v1769_v54 = vadd.f32 %v1768_v52, %v8419_v0  ;;  %v1770_v55 = vpop.f32.mrb[37].mxu1  ;;  %4403 = vmatprep.subr.bf16.mxu0 %v6305_v31  ;;  %4629 = vmatprep.subr.bf16.mxu1 %v6307_v37  ;;  %v6320_v28 = vcombine.low %v8509_v58, %v2893_v2  ;;  %v6329_v37 = vcombine.high %v2897_v19, %v2901_v21  ;;  %v2917_v58 = vld [vmem:[%s8143_s23 + $0x360] sm:$0xff] }
 0x51e   : > { %v1853_v59 = vrot.slane %v1852_v49, 1  ;;  %v1771_v60 = vadd.f32 %v1770_v55, %v8422_v1  ;;  %v1772_v62 = vpop.f32.mrb[38].mxu1  ;;  %2404 = vmatprep.mubr.bf16.mxu0 %v1919_v20  ;;  %2517 = vmatprep.mubr.bf16.mxu1 %v1919_v20  ;;  %v6331_v38 = vcombine.high %v2898_v23, %v2902_v24  ;;  %v2913_v55 = vld [vmem:[%s8143_s23 + $0x340] sm:$0xff] }
 0x51f   : > { %v8515_v4 = vmax.f32 %v1839_v45, %v1840_v53  ;;  %v1817_v5 = vmax.f32 %v1769_v54, 0.0  ;;  %v1773_v6 = vadd.f32 %v1772_v62, %v8419_v0  ;;  %v1774_v7 = vpop.f32.mrb[39].mxu1  ;;  %2405 = vmatmul.mubr.bf16.gmra.mrb[48].mxu0 %v1918_v47  ;;  %2518 = vmatmul.mubr.bf16.gmra.mrb[64].mxu1 %v1918_v47  ;;  %v6339_v54 = vcombine.high %v2906_v41, %v2910_v43 }
 0x520   : > { %v8519_v9 = vmax.f32 %v1852_v49, %v1853_v59  ;;  %v1818_v11 = vmax.f32 %v1771_v60, 0.0  ;;  %v1775_v12 = vadd.f32 %v1774_v7, %v8422_v1  ;;  %4404 = vmatpush1.bf16.msra.mxu0 %v6304_v33  ;;  %4630 = vmatpush1.bf16.msra.mxu1 %v6306_v48  ;;  %v2909_v33 = vld [vmem:[%s8143_s23 + $0x320] sm:$0xff]  ;;  %v6328_v49 = vcombine.low %v2897_v19, %v2901_v21  ;;  %v2914_v59 = vld [vmem:[%s8143_s23 + $0x348] sm:$0xff] }
 0x521   : > { %v1856_v14 = vmax.f32 %v1855_v46, %v1817_v5  ;;  %v1819_v15 = vmax.f32 %v1773_v6, 0.0  ;;  %4405 = vmatprep.subr.bf16.mxu0 %v6313_v56  ;;  %4631 = vmatprep.subr.bf16.mxu1 %v6315_v57  ;;  %v6337_v53 = vcombine.high %v2905_v39, %v2909_v33  ;;  %v2918_v60 = vld [vmem:[%s8143_s23 + $0x368] sm:$0xff]  ;;  %v6336_v50 = vcombine.low %v2905_v39, %v2909_v33 }
 0x522   : > { %v1885_v22 = vcombine.low %v8515_v4, %v8519_v9  ;;  %v1869_v10 = vmax.f32 %v1868_v51, %v1818_v11  ;;  %v1820_v17 = vmax.f32 %v1775_v12, 0.0  ;;  %v6330_v51 = vcombine.low %v2898_v23, %v2902_v24  ;;  %v2926_v4 = vld [vmem:[%s8143_s23 + $0x3a8] sm:$0xff] }
 0x523   : > { %v1857_v25 = vmax.f32 %v1856_v14, %v1819_v15  ;;  %v1920_v27 = vpack.c.bf16 %v1819_v15, %v1817_v5  ;;  %v6338_v7 = vcombine.low %v2906_v41, %v2910_v43  ;;  %v6345_v12 = vcombine.high %v2913_v55, %v2917_v58 }
 0x524   : > { %v1870_v29 = vmax.f32 %v1869_v10, %v1820_v17  ;;  %v1921_v30 = vpack.c.bf16 %v1820_v17, %v1818_v11  ;;  %v1778_v31 = vpop.f32.mrb[40].mxu1  ;;  %4406 = vmatpush1.bf16.msra.mxu0 %v6312_v8  ;;  %4632 = vmatpush1.bf16.msra.mxu1 %v6314_v13  ;;  %v6347_v13 = vcombine.high %v2914_v59, %v2918_v60 }
 0x525   : > { %v1779_v35 = vadd.f32 %v1778_v31, %v8419_v0  ;;  %v1780_v36 = vpop.f32.mrb[41].mxu1  ;;  %4407 = vmatprep.subr.bf16.mxu0 %v6321_v16  ;;  %4633 = vmatprep.subr.bf16.mxu1 %v6323_v18  ;;  %v6344_v21 = vcombine.low %v2913_v55, %v2917_v58  ;;  %v6346_v23 = vcombine.low %v2914_v59, %v2918_v60  ;;  %v2933_v58 = vld [vmem:[%s8143_s23 + $0x3e0] sm:$0xff]  ;;  %v2930_v59 = vld [vmem:[%s8143_s23 + $0x3c8] sm:$0xff] }
 0x526   : > { %v1781_v40 = vadd.f32 %v1780_v36, %v8422_v1  ;;  %v1782_v42 = vpop.f32.mrb[42].mxu1  ;;  %2414 = vmatprep.mubr.bf16.mxu0 %v1921_v30  ;;  %2527 = vmatprep.mubr.bf16.mxu1 %v1921_v30 }
 0x527   : > { %v1821_v44 = vmax.f32 %v1779_v35, 0.0  ;;  %v1783_v45 = vadd.f32 %v1782_v42, %v8419_v0  ;;  %v1784_v46 = vpop.f32.mrb[43].mxu1  ;;  %2415 = vmatmul.mubr.bf16.gmra.mrb[52].mxu0 %v1920_v27  ;;  %2528 = vmatmul.mubr.bf16.gmra.mrb[68].mxu1 %v1920_v27 }
 0x528   : > { %v1822_v47 = vmax.f32 %v1781_v40, 0.0  ;;  %v1785_v48 = vadd.f32 %v1784_v46, %v8422_v1  ;;  %4408 = vmatpush1.bf16.msra.mxu0 %v6320_v28  ;;  %4634 = vmatpush1.bf16.msra.mxu1 %v6322_v34  ;;  %v1892_v46 = vrot.slane %v1885_v22, %v8367_v32 }
 0x529   : > { %v1858_v20 = vmax.f32 %v1857_v25, %v1821_v44  ;;  %v1823_v52 = vmax.f32 %v1783_v45, 0.0  ;;  %4409 = vmatprep.subr.bf16.mxu0 %v6329_v37  ;;  %4635 = vmatprep.subr.bf16.mxu1 %v6331_v38 }
 0x52a   : > { %v1871_v56 = vmax.f32 %v1870_v29, %v1822_v47  ;;  %v1824_v57 = vmax.f32 %v1785_v48, 0.0 }
 0x52b   : > { %v1859_v62 = vmax.f32 %v1858_v20, %v1823_v52  ;;  %v1922_v2 = vpack.c.bf16 %v1823_v52, %v1821_v44  ;;  %v2921_v52 = vld [vmem:[%s8143_s23 + $0x380] sm:$0xff] }
 0x52c   : > { %v1872_v3 = vmax.f32 %v1871_v56, %v1824_v57  ;;  %v1923_v5 = vpack.c.bf16 %v1824_v57, %v1822_v47  ;;  %v1788_v6 = vpop.f32.mrb[44].mxu1  ;;  %4410 = vmatpush1.bf16.msra.mxu0 %v6328_v49  ;;  %4636 = vmatpush1.bf16.msra.mxu1 %v6330_v51  ;;  %v2929_v57 = vld [vmem:[%s8143_s23 + $0x3c0] sm:$0xff] }
 0x52d   : > { %v1789_v8 = vadd.f32 %v1788_v6, %v8419_v0  ;;  %v1790_v11 = vpop.f32.mrb[45].mxu1  ;;  %4411 = vmatprep.subr.bf16.mxu0 %v6337_v53  ;;  %4637 = vmatprep.subr.bf16.mxu1 %v6339_v54  ;;  %v2925_v53 = vld [vmem:[%s8143_s23 + $0x3a0] sm:$0xff]  ;;  %v2922_v54 = vld [vmem:[%s8143_s23 + $0x388] sm:$0xff]  ;;  %v6361_v60 = vcombine.high %v2929_v57, %v2933_v58 }
 0x52e   : > { %v1791_v14 = vadd.f32 %v1790_v11, %v8422_v1  ;;  %v1792_v15 = vpop.f32.mrb[46].mxu1  ;;  %2424 = vmatprep.mubr.bf16.mxu0 %v1923_v5  ;;  %2537 = vmatprep.mubr.bf16.mxu1 %v1923_v5  ;;  %v6353_v55 = vcombine.high %v2921_v52, %v2925_v53  ;;  %v6352_v9 = vcombine.low %v2921_v52, %v2925_v53  ;;  %v8565_v5 = vld [vmem:[%s8143_s23 + $0x400] sm:$0xff]  ;;  %v8576_v11 = vld [vmem:[%s8143_s23 + $0x428] sm:$0xff] }
 0x52f   : > { %v1825_v16 = vmax.f32 %v1789_v8, 0.0  ;;  %v1793_v18 = vadd.f32 %v1792_v15, %v8419_v0  ;;  %v1794_v19 = vpop.f32.mrb[47].mxu1  ;;  %2425 = vmatmul.mubr.bf16.gmra.mrb[56].mxu0 %v1922_v2  ;;  %2538 = vmatmul.mubr.bf16.gmra.mrb[72].mxu1 %v1922_v2  ;;  %v6354_v22 = vcombine.low %v2922_v54, %v2926_v4  ;;  %v6355_v56 = vcombine.high %v2922_v54, %v2926_v4  ;;  %v8568_v6 = vld [vmem:[%s8143_s23 + $0x420] sm:$0xff]  ;;  %v1990_v15 = vld [vmem:[%s8135_s26] sm:$0xf]  ;;  %v8691_v4 = vld [vmem:[%s8143_s23 + $0x5a8] sm:$0xff] }
 0x530   : > { %v1826_v10 = vmax.f32 %v1791_v14, 0.0  ;;  %v1795_v17 = vadd.f32 %v1794_v19, %v8422_v1  ;;  %4412 = vmatpush1.bf16.msra.mxu0 %v6336_v50  ;;  %4638 = vmatpush1.bf16.msra.mxu1 %v6338_v7  ;;  %v6360_v2 = vcombine.low %v2929_v57, %v2933_v58  ;;  %v8571_v7 = vld [vmem:[%s8143_s23 + $0x408] sm:$0xff]  ;;  %v6369_v8 = vcombine.high %v8565_v5, %v8568_v6  ;;  %v8590_v19 = vld [vmem:[%s8143_s23 + $0x460] sm:$0xff] }
 0x531   : > { %v1860_v24 = vmax.f32 %v1859_v62, %v1825_v16  ;;  %v1827_v25 = vmax.f32 %v1793_v18, 0.0  ;;  %4413 = vmatprep.subr.bf16.mxu0 %v6345_v12  ;;  %4639 = vmatprep.subr.bf16.mxu1 %v6347_v13  ;;  %v2934_v62 = vld [vmem:[%s8143_s23 + $0x3e8] sm:$0xff]  ;;  %v6371_v14 = vcombine.high %v8571_v7, %v8576_v11  ;;  %v8587_v18 = vld [vmem:[%s8143_s23 + $0x440] sm:$0xff] }
 0x532   : > { %v1873_v27 = vmax.f32 %v1872_v3, %v1826_v10  ;;  %v1828_v28 = vmax.f32 %v1795_v17, 0.0  ;;  %v6362_v50 = vcombine.low %v2930_v59, %v2934_v62  ;;  %v6363_v3 = vcombine.high %v2930_v59, %v2934_v62  ;;  %v8594_v17 = vld [vmem:[%s8143_s23 + $0x448] sm:$0xff]  ;;  %v8745_v59 = vld [vmem:[%s8143_s23 + $0x660] sm:$0xff] }
 0x533   : > { %v1861_v29 = vmax.f32 %v1860_v24, %v1827_v25  ;;  %v1924_v30 = vpack.c.bf16 %v1827_v25, %v1825_v16  ;;  %v9691_v16 = vsub.s32 2, %v8362_v26  ;;  %v8603_v24 = vld [vmem:[%s8143_s23 + $0x4a0] sm:$0xff]  ;;  %v8606_v25 = vld [vmem:[%s8143_s23 + $0x488] sm:$0xff]  ;;  %9781 = vst [vmem:[#allocation38_spill] sm:$0xff] %v8745_v59 }
 0x534   : > { %v1874_v31 = vmax.f32 %v1873_v27, %v1828_v28  ;;  %v1925_v0 = vpack.c.bf16 %v1828_v28, %v1826_v10  ;;  %4414 = vmatpush1.bf16.msra.mxu0 %v6344_v21  ;;  %4640 = vmatpush1.bf16.msra.mxu1 %v6346_v23  ;;  %v9690_v10 = vsub.s32 3, %v8362_v26  ;;  %v8597_v21 = vld [vmem:[%s8143_s23 + $0x468] sm:$0xff]  ;;  %v8600_v23 = vld [vmem:[%s8143_s23 + $0x480] sm:$0xff] }
 0x535   : > { %v1862_v34 = vrot.slane %v1861_v29, 4  ;;  %4415 = vmatprep.subr.bf16.mxu0 %v6353_v55  ;;  %4641 = vmatprep.subr.bf16.mxu1 %v6355_v56  ;;  %v8609_v27 = vld [vmem:[%s8143_s23 + $0x4a8] sm:$0xff]  ;;  %v8612_v28 = vld [vmem:[%s8143_s23 + $0x4c0] sm:$0xff] }
 0x536   : > { %v1875_v35 = vrot.slane %v1874_v31, 4  ;;  %2434 = vmatprep.mubr.bf16.mxu0 %v1925_v0  ;;  %2547 = vmatprep.mubr.bf16.mxu1 %v1925_v0  ;;  %v8624_v0 = vld [vmem:[%s8143_s23 + $0x500] sm:$0xff]  ;;  %v8711_v62 = vld [vmem:[%s8143_s23 + $0x5e8] sm:$0xff] }
 0x537   : > { %v1863_v1 = vmax.f32 %v1861_v29, %v1862_v34  ;;  %2435 = vmatmul.mubr.bf16.gmra.mrb[60].mxu0 %v1924_v30  ;;  %2548 = vmatmul.mubr.bf16.gmra.mrb[76].mxu1 %v1924_v30  ;;  %v8615_v29 = vld [vmem:[%s8143_s23 + $0x4e0] sm:$0xff]  ;;  %v8618_v30 = vld [vmem:[%s8143_s23 + $0x4c8] sm:$0xff] }
 0x538   : > { %v1876_v36 = vmax.f32 %v1874_v31, %v1875_v35  ;;  %4416 = vmatpush1.bf16.msra.mxu0 %v6352_v9  ;;  %4642 = vmatpush1.bf16.msra.mxu1 %v6354_v22  ;;  %v8621_v31 = vld [vmem:[%s8143_s23 + $0x4e8] sm:$0xff]  ;;  %v8627_v34 = vld [vmem:[%s8143_s23 + $0x520] sm:$0xff]  ;;  %v8630_v35 = vrot.slane %v1990_v15, %v8412_v61 }
 0x539   : > { %v1864_v37 = vrot.slane %v1863_v1, 2  ;;  %4417 = vmatprep.subr.bf16.mxu0 %v6361_v60  ;;  %4643 = vmatprep.subr.bf16.mxu1 %v6363_v3  ;;  %v8694_v9 = vld [vmem:[%s8143_s23 + $0x5c0] sm:$0xff]  ;;  %v8708_v60 = vld [vmem:[%s8143_s23 + $0x5c8] sm:$0xff] }
 0x53a   : > { %v1877_v38 = vrot.slane %v1876_v36, 2  ;;  %v8697_v22 = vld [vmem:[%s8143_s23 + $0x5e0] sm:$0xff]  ;;  %v8748_v56 = vld [vmem:[%s8143_s23 + $0x648] sm:$0xff] }
 0x53b   : > { %v1865_v39 = vmax.f32 %v1863_v1, %v1864_v37  ;;  %v8634_v1 = vrot.slane %v1990_v15, %v9691_v16  ;;  %v8640_v37 = vld [vmem:[%s8143_s23 + $0x528] sm:$0xff]  ;;  %v8742_v3 = vld [vmem:[%s8143_s23 + $0x640] sm:$0xff]  ;;  %9782 = vst [vmem:[#allocation39_spill] sm:$0xff] %v8748_v56 }
 0x53c   : > { %v1878_v40 = vmax.f32 %v1876_v36, %v1877_v38  ;;  %4418 = vmatpush1.bf16.msra.mxu0 %v6360_v2  ;;  %4644 = vmatpush1.bf16.msra.mxu1 %v6362_v50  ;;  %v8637_v36 = vld [vmem:[%s8143_s23 + $0x508] sm:$0xff]  ;;  %v8643_v38 = vld [vmem:[%s8143_s23 + $0x540] sm:$0xff]  ;;  %9780 = vst [vmem:[#allocation37_spill] sm:$0xff] %v8742_v3 }
 0x53d   : > { %v1866_v42 = vrot.slane %v1865_v39, 1  ;;  %4500 = vmatprep.subr.bf16.mxu0 %v6369_v8  ;;  %4726 = vmatprep.subr.bf16.mxu1 %v6371_v14  ;;  %v8714_v2 = vld [vmem:[%s8143_s23 + $0x600] sm:$0xff]  ;;  %v8731_v16 = vld [vmem:[%s8143_s23 + $0x628] sm:$0xff] }
 0x53e   : > { %v1879_v33 = vrot.slane %v1878_v40, 1  ;;  %9779 = vst [vmem:[#allocation36_spill] sm:$0xff] %v8731_v16  ;;  %v8759_v54 = vld [vmem:[%s8143_s23 + $0x668] sm:$0xff]  ;;  %v8762_v57 = vld [vmem:[%s8143_s23 + $0x680] sm:$0xff] }
 0x53f   : > { %v1867_v41 = vmax.f32 %v1865_v39, %v1866_v42  ;;  %v8646_v39 = vrot.slane %v1990_v15, %v8416_v63  ;;  %9783 = vst [vmem:[#allocation40_spill] sm:$0xff] %v8759_v54  ;;  %9784 = vst [vmem:[#allocation41_spill] sm:$0xff] %v8762_v57  ;;  %v8765_v55 = vld [vmem:[%s8143_s23 + $0x6a0] sm:$0xff]  ;;  %v8776_v14 = vld [vmem:[%s8143_s23 + $0x688] sm:$0xff] }
 0x540   : > { %v1880_v43 = vmax.f32 %v1878_v40, %v1879_v33  ;;  %v8650_v40 = vrot.slane %v1990_v15, %v9690_v10  ;;  %v8725_v15 = vld [vmem:[%s8143_s23 + $0x620] sm:$0xff]  ;;  %v8728_v10 = vld [vmem:[%s8143_s23 + $0x608] sm:$0xff]  ;;  %9785 = vst [vmem:[#allocation42_spill] sm:$0xff] %v8765_v55  ;;  %9786 = vst [vmem:[#allocation43_spill] sm:$0xff] %v8776_v14 }
 0x541   : > { %v8793_v8 = vld [vmem:[%s8143_s23 + $0x6e0] sm:$0xff]  ;;  %v8807_v33 = vld [vmem:[%s8143_s23 + $0x6e8] sm:$0xff] }
 0x542   : > { %v1893_v44 = vcombine.low %v1867_v41, %v1880_v43  ;;  %v8657_v41 = vld [vmem:[%s8143_s23 + $0x560] sm:$0xff]  ;;  %v8660_v43 = vld [vmem:[%s8143_s23 + $0x548] sm:$0xff]  ;;  %9789 = vst [vmem:[#allocation46_spill] sm:$0xff] %v8793_v8  ;;  %9791 = vst [vmem:[#allocation48_spill] sm:$0xff] %v8807_v33 }
 0x543   : > { %v8816_v58 = vld [vmem:[%s8143_s23 + $0x700] sm:$0xff]  ;;  %v8840_v33 = vld [vmem:[%s8143_s23 + $0x708] sm:$0xff] }
 0x544   : > { %v1900_v45 = vrot.slane %v1893_v44, %v8367_v32  ;;  %v8663_v44 = vld [vmem:[%s8143_s23 + $0x568] sm:$0xff]  ;;  %9792 = vst [vmem:[#allocation49_spill] sm:$0xff] %v8816_v58  ;;  %v8819_v61 = vld [vmem:[%s8143_s23 + $0x720] sm:$0xff]  ;;  %9794 = vst [vmem:[#allocation51_spill] sm:$0xff] %v8840_v33 }
 0x545   : > { %9793 = vst [vmem:[#allocation50_spill] sm:$0xff] %v8819_v61 }
 0x546   : > { %v1903_v47 = vrot.slane %v1900_v45, 7 }
 0x548   : > { %v1904_v48 = vsel %vm1558_vm3, %v1903_v47, %v1892_v46  ;;  %v8804_v46 = vld [vmem:[%s8143_s23 + $0x6c8] sm:$0xff] }
 0x549   : > { %v1905_v49 = vsel %vm1560_vm4, %v1903_v47, %v1904_v48  ;;  %v8790_v48 = vld [vmem:[%s8143_s23 + $0x6c0] sm:$0xff]  ;;  %9790 = vst [vmem:[#allocation47_spill] sm:$0xff] %v8804_v46 }
 0x54a   : > { %v1906_v51 = vsel %vm1562_vm5, %v1903_v47, %v1905_v49  ;;  %v8674_v49 = vld [vmem:[%s8143_s23 + $0x580] sm:$0xff]  ;;  %9788 = vst [vmem:[#allocation45_spill] sm:$0xff] %v8790_v48 }
 0x54b   : > { %v1907_v20 = vsel %vm1564_vm6, %v1903_v47, %v1906_v51  ;;  %v8677_v51 = vld [vmem:[%s8143_s23 + $0x5a0] sm:$0xff]  ;;  %v8779_v47 = vld [vmem:[%s8143_s23 + $0x6a8] sm:$0xff] }
 0x54c   : > { %1909 = vst [vmem:[%s8383_s21 + $0x18] sm:$0xf] %v1907_v20  ;;  %v8680_v20 = vld [vmem:[%s8143_s23 + $0x588] sm:$0xff]  ;;  %9787 = vst [vmem:[#allocation44_spill] sm:$0xff] %v8779_v47 }
 0x5d2   : > { %v2366_v45 = vpop.f32.mrb[32].mxu0  ;;  %v2479_v42 = vpop.f32.mrb[48].mxu1 }
 0x5d3   : > { %v2367_v13 = vadd.f32 %v2366_v45, %v8630_v35  ;;  %v2480_v12 = vadd.f32 %v2479_v42, %v8634_v1  ;;  %v2368_v63 = vpop.f32.mrb[33].mxu0  ;;  %v2481_v26 = vpop.f32.mrb[49].mxu1 }
 0x5d4   : > { %v2369_v52 = vadd.f32 %v2368_v63, %v8646_v39  ;;  %v2482_v55 = vadd.f32 %v2481_v26, %v8650_v40  ;;  %v2370_v57 = vpop.f32.mrb[34].mxu0  ;;  %v2483_v45 = vpop.f32.mrb[50].mxu1 }
 0x5d5   : > { %v2371_v53 = vadd.f32 %v2370_v57, %v8630_v35  ;;  %v2484_v50 = vadd.f32 %v2483_v45, %v8634_v1  ;;  %v2372_v47 = vpop.f32.mrb[35].mxu0  ;;  %v2485_v14 = vpop.f32.mrb[51].mxu1  ;;  %v2558_v45 = vmax.f32 %v2367_v13, 0.0  ;;  %v2560_v8 = vmax.f32 %v2480_v12, 0.0  ;;  %v8850_v57 = vld [vmem:[%s8143_s23 + $0x740] sm:$0xff] }
 0x5d6   : > { %v2373_v56 = vadd.f32 %v2372_v47, %v8646_v39  ;;  %v2486_v42 = vadd.f32 %v2485_v14, %v8650_v40  ;;  %v2559_v63 = vmax.f32 %v2369_v52, 0.0  ;;  %v2561_v3 = vmax.f32 %v2482_v55, 0.0  ;;  %v8843_v47 = vld [vmem:[%s8143_s23 + $0x728] sm:$0xff]  ;;  %v8853_v13 = vld [vmem:[%s8143_s23 + $0x760] sm:$0xff] }
 0x5d7   : > { %v2562_v48 = vmax.f32 %v2371_v53, 0.0  ;;  %v2564_v59 = vmax.f32 %v2484_v50, 0.0  ;;  %9795 = vst [vmem:[#allocation52_spill] sm:$0xff] %v8843_v47 }
 0x5d8   : > { %v2563_v32 = vmax.f32 %v2373_v56, 0.0  ;;  %v2565_v26 = vmax.f32 %v2486_v42, 0.0 }
 0x5d9   : > { %v2622_v14 = vmax.f32 %v2558_v45, %v2562_v48  ;;  %v8845_v46 = vpack.c.bf16 %v2562_v48, %v2558_v45  ;;  %v2648_v54 = vmax.f32 %v2560_v8, %v2564_v59  ;;  %v8847_v16 = vpack.c.bf16 %v2564_v59, %v2560_v8 }
 0x5da   : > { %v2635_v12 = vmax.f32 %v2559_v63, %v2563_v32  ;;  %v8855_v53 = vpack.c.bf16 %v2563_v32, %v2559_v63  ;;  %v2661_v52 = vmax.f32 %v2561_v3, %v2565_v26  ;;  %v8857_v55 = vpack.c.bf16 %v2565_v26, %v2561_v3  ;;  %v2376_v56 = vpop.f32.mrb[36].mxu0  ;;  %v2489_v50 = vpop.f32.mrb[52].mxu1 }
 0x5db   : > { %9796 = vst [vmem:[#allocation53_spill] sm:$0xff] %v8845_v46  ;;  %9797 = vst [vmem:[#allocation54_spill] sm:$0xff] %v8847_v16  ;;  %v2377_v42 = vadd.f32 %v2376_v56, %v8630_v35  ;;  %v2490_v48 = vadd.f32 %v2489_v50, %v8634_v1  ;;  %v2378_v45 = vpop.f32.mrb[37].mxu0  ;;  %v2491_v61 = vpop.f32.mrb[53].mxu1 }
 0x5dc   : > { %9798 = vst [vmem:[#allocation55_spill] sm:$0xff] %v8855_v53  ;;  %9799 = vst [vmem:[#allocation56_spill] sm:$0xff] %v8857_v55  ;;  %v2379_v32 = vadd.f32 %v2378_v45, %v8646_v39  ;;  %v2492_v63 = vadd.f32 %v2491_v61, %v8650_v40  ;;  %v2380_v3 = vpop.f32.mrb[38].mxu0  ;;  %v2493_v26 = vpop.f32.mrb[54].mxu1  ;;  %4419 = vmatprep.mubr.bf16.mxu0 %v8855_v53  ;;  %4645 = vmatprep.mubr.bf16.mxu1 %v8855_v53 }
 0x5dd   : > { %v2566_v50 = vmax.f32 %v2377_v42, 0.0  ;;  %v2568_v16 = vmax.f32 %v2490_v48, 0.0  ;;  %v2381_v59 = vadd.f32 %v2380_v3, %v8630_v35  ;;  %v2494_v55 = vadd.f32 %v2493_v26, %v8634_v1  ;;  %v2382_v8 = vpop.f32.mrb[39].mxu0  ;;  %v2495_v47 = vpop.f32.mrb[55].mxu1  ;;  %4420 = vmatmul.mubr.bf16.vlgmr.msra.gmra.mrb[64].mxu0 %v8845_v46  ;;  %4646 = vmatmul.mubr.bf16.vlgmr.msra.gmra.mrb[80].mxu1 %v8845_v46 }
 0x5de   : > { %v2567_v61 = vmax.f32 %v2379_v32, 0.0  ;;  %v2569_v45 = vmax.f32 %v2492_v63, 0.0  ;;  %v2383_v33 = vadd.f32 %v2382_v8, %v8646_v39  ;;  %v2496_v53 = vadd.f32 %v2495_v47, %v8650_v40 }
 0x5df   : > { %v9800_v42 = vcombine.low %v8565_v5, %v8568_v6  ;;  %v9801_v48 = vcombine.low %v8571_v7, %v8576_v11  ;;  %v2623_v3 = vmax.f32 %v2622_v14, %v2566_v50  ;;  %v2649_v26 = vmax.f32 %v2648_v54, %v2568_v16  ;;  %v8894_v54 = vld [vmem:[%s8143_s23 + $0x748] sm:$0xff] }
 0x5e0   : > { %v2570_v56 = vmax.f32 %v2381_v59, 0.0  ;;  %v2572_v46 = vmax.f32 %v2494_v55, 0.0  ;;  %v9802_v32 = vcombine.high %v8587_v18, %v8590_v19  ;;  %v9803_v47 = vcombine.high %v8594_v17, %v8597_v21  ;;  %v8897_v55 = vld [vmem:[%s8143_s23 + $0x768] sm:$0xff] }
 0x5e1   : > { %4501 = vmatpush1.bf16.msra.mxu0 %v9800_v42  ;;  %4727 = vmatpush1.bf16.msra.mxu1 %v9801_v48  ;;  %v2636_v5 = vmax.f32 %v2635_v12, %v2567_v61  ;;  %v2662_v6 = vmax.f32 %v2661_v52, %v2569_v45  ;;  %v2571_v8 = vmax.f32 %v2383_v33, 0.0  ;;  %v2573_v63 = vmax.f32 %v2496_v53, 0.0 }
 0x5e2   : > { %4502 = vmatprep.subr.bf16.mxu0 %v9802_v32  ;;  %4728 = vmatprep.subr.bf16.mxu1 %v9803_v47  ;;  %v2624_v7 = vmax.f32 %v2623_v3, %v2570_v56  ;;  %v8889_v11 = vpack.c.bf16 %v2570_v56, %v2566_v50  ;;  %v2650_v42 = vmax.f32 %v2649_v26, %v2572_v46  ;;  %v2386_v12 = vpop.f32.mrb[40].mxu0  ;;  %v2499_v53 = vpop.f32.mrb[56].mxu1 }
 0x5e3   : > { %v8891_v14 = vpack.c.bf16 %v2572_v46, %v2568_v16  ;;  %v2637_v59 = vmax.f32 %v2636_v5, %v2571_v8  ;;  %v8899_v48 = vpack.c.bf16 %v2571_v8, %v2567_v61  ;;  %v2663_v32 = vmax.f32 %v2662_v6, %v2573_v63  ;;  %v2388_v56 = vpop.f32.mrb[41].mxu0  ;;  %v2501_v50 = vpop.f32.mrb[57].mxu1 }
 0x5e4   : > { %v8901_v58 = vpack.c.bf16 %v2573_v63, %v2569_v45  ;;  %v9804_v33 = vcombine.low %v8587_v18, %v8590_v19  ;;  %v9805_v16 = vcombine.low %v8594_v17, %v8597_v21  ;;  %v2387_v46 = vadd.f32 %v2386_v12, %v8630_v35  ;;  %v2390_v3 = vpop.f32.mrb[42].mxu0  ;;  %v2503_v17 = vpop.f32.mrb[58].mxu1 }
 0x5e5   : > { %v2500_v52 = vadd.f32 %v2499_v53, %v8634_v1  ;;  %v9806_v61 = vcombine.high %v8600_v23, %v8603_v24  ;;  %v2389_v19 = vadd.f32 %v2388_v56, %v8646_v39  ;;  %v2502_v45 = vadd.f32 %v2501_v50, %v8650_v40  ;;  %4429 = vmatprep.mubr.bf16.mxu0 %v8899_v48  ;;  %v2392_v63 = vpop.f32.mrb[43].mxu0 }
 0x5e6   : > { %4503 = vmatpush1.bf16.msra.mxu0 %v9804_v33  ;;  %4729 = vmatpush1.bf16.msra.mxu1 %v9805_v16  ;;  %v2574_v26 = vmax.f32 %v2387_v46, 0.0  ;;  %v2391_v5 = vadd.f32 %v2390_v3, %v8630_v35  ;;  %v2504_v6 = vadd.f32 %v2503_v17, %v8634_v1  ;;  %v9807_v8 = vcombine.high %v8606_v25, %v8609_v27  ;;  %v2505_v33 = vpop.f32.mrb[59].mxu1 }
 0x5e7   : > { %4504 = vmatprep.subr.bf16.mxu0 %v9806_v61  ;;  %4655 = vmatprep.mubr.bf16.mxu1 %v8899_v48  ;;  %v2576_v47 = vmax.f32 %v2500_v52, 0.0  ;;  %v2575_v12 = vmax.f32 %v2389_v19, 0.0  ;;  %v2577_v53 = vmax.f32 %v2502_v45, 0.0  ;;  %v2393_v16 = vadd.f32 %v2392_v63, %v8646_v39 }
 0x5e8   : > { %4730 = vmatprep.subr.bf16.mxu1 %v9807_v8  ;;  %4430 = vmatmul.mubr.bf16.gmra.mrb[68].mxu0 %v8889_v11  ;;  %v2506_v56 = vadd.f32 %v2505_v33, %v8650_v40  ;;  %v9808_v46 = vcombine.low %v8600_v23, %v8603_v24  ;;  %v2625_v52 = vmax.f32 %v2624_v7, %v2574_v26  ;;  %v2578_v61 = vmax.f32 %v2391_v5, 0.0 }
 0x5e9   : > { %4656 = vmatmul.mubr.bf16.gmra.mrb[84].mxu1 %v8889_v11  ;;  %v2651_v50 = vmax.f32 %v2650_v42, %v2576_v47  ;;  %v2580_v3 = vmax.f32 %v2504_v6, 0.0  ;;  %v9809_v19 = vcombine.low %v8606_v25, %v8609_v27  ;;  %v9810_v45 = vcombine.high %v8612_v28, %v8615_v29  ;;  %v8948_v25 = vld [vmem:[%s8143_s23 + $0x780] sm:$0xff] }
 0x5ea   : > { %4505 = vmatpush1.bf16.msra.mxu0 %v9808_v46  ;;  %v2638_v17 = vmax.f32 %v2637_v59, %v2575_v12  ;;  %v2664_v8 = vmax.f32 %v2663_v32, %v2577_v53  ;;  %v2579_v23 = vmax.f32 %v2393_v16, 0.0  ;;  %v2581_v24 = vmax.f32 %v2506_v56, 0.0  ;;  %v8951_v27 = vld [vmem:[%s8143_s23 + $0x7a0] sm:$0xff]  ;;  %v2396_v56 = vpop.f32.mrb[44].mxu0 }
 0x5eb   : > { %4731 = vmatpush1.bf16.msra.mxu1 %v9809_v19  ;;  %4506 = vmatprep.subr.bf16.mxu0 %v9810_v45  ;;  %v9811_v63 = vcombine.high %v8618_v30, %v8621_v31  ;;  %v2626_v7 = vmax.f32 %v2625_v52, %v2578_v61  ;;  %v8943_v42 = vpack.c.bf16 %v2578_v61, %v2574_v26  ;;  %v2509_v26 = vpop.f32.mrb[60].mxu1  ;;  %v2398_v61 = vpop.f32.mrb[45].mxu0 }
 0x5ec   : > { %v2652_v5 = vmax.f32 %v2651_v50, %v2580_v3  ;;  %v8945_v6 = vpack.c.bf16 %v2580_v3, %v2576_v47  ;;  %v2639_v33 = vmax.f32 %v2638_v17, %v2579_v23  ;;  %v8953_v46 = vpack.c.bf16 %v2579_v23, %v2575_v12  ;;  %v2511_v12 = vpop.f32.mrb[61].mxu1  ;;  %v2400_v19 = vpop.f32.mrb[46].mxu0 }
 0x5ed   : > { %4732 = vmatprep.subr.bf16.mxu1 %v9811_v63  ;;  %v2665_v59 = vmax.f32 %v2664_v8, %v2581_v24  ;;  %v8955_v32 = vpack.c.bf16 %v2581_v24, %v2577_v53  ;;  %v9812_v16 = vcombine.low %v8612_v28, %v8615_v29  ;;  %v9813_v47 = vcombine.low %v8618_v30, %v8621_v31  ;;  %v2513_v30 = vpop.f32.mrb[62].mxu1  ;;  %v2402_v63 = vpop.f32.mrb[47].mxu0 }
 0x5ee   : > { %v2397_v52 = vadd.f32 %v2396_v56, %v8630_v35  ;;  %v2510_v50 = vadd.f32 %v2509_v26, %v8634_v1  ;;  %v9814_v53 = vcombine.high %v8624_v0, %v8627_v34  ;;  %v2399_v29 = vadd.f32 %v2398_v61, %v8646_v39  ;;  %4439 = vmatprep.mubr.bf16.mxu0 %v8953_v46 }
 0x5ef   : > { %4507 = vmatpush1.bf16.msra.mxu0 %v9812_v16  ;;  %4733 = vmatpush1.bf16.msra.mxu1 %v9813_v47  ;;  %v2512_v3 = vadd.f32 %v2511_v12, %v8650_v40  ;;  %v2401_v8 = vadd.f32 %v2400_v19, %v8630_v35  ;;  %v2514_v23 = vadd.f32 %v2513_v30, %v8634_v1  ;;  %v2515_v16 = vpop.f32.mrb[63].mxu1 }
 0x5f0   : > { %4508 = vmatprep.subr.bf16.mxu0 %v9814_v53  ;;  %4665 = vmatprep.mubr.bf16.mxu1 %v8953_v46  ;;  %v2582_v45 = vmax.f32 %v2397_v52, 0.0  ;;  %v2584_v17 = vmax.f32 %v2510_v50, 0.0  ;;  %v9815_v24 = vcombine.high %v8637_v36, %v8640_v37  ;;  %v2583_v56 = vmax.f32 %v2399_v29, 0.0 }
 0x5f1   : > { %4440 = vmatmul.mubr.bf16.gmra.mrb[72].mxu0 %v8943_v42  ;;  %v2585_v26 = vmax.f32 %v2512_v3, 0.0  ;;  %v2403_v47 = vadd.f32 %v2402_v63, %v8646_v39  ;;  %v2516_v61 = vadd.f32 %v2515_v16, %v8650_v40  ;;  %v9816_v52 = vcombine.low %v8624_v0, %v8627_v34  ;;  %4666 = vmatmul.mubr.bf16.gmra.mrb[88].mxu1 %v8943_v42 }
 0x5f2   : > { %4734 = vmatprep.subr.bf16.mxu1 %v9815_v24  ;;  %v2627_v50 = vmax.f32 %v2626_v7, %v2582_v45  ;;  %v2653_v12 = vmax.f32 %v2652_v5, %v2584_v17  ;;  %v2586_v53 = vmax.f32 %v2401_v8, 0.0  ;;  %v2588_v19 = vmax.f32 %v2514_v23, 0.0 }
 0x5f3   : > { %4509 = vmatpush1.bf16.msra.mxu0 %v9816_v52  ;;  %v9817_v30 = vcombine.low %v8637_v36, %v8640_v37  ;;  %v9818_v29 = vcombine.high %v8643_v38, %v8657_v41  ;;  %v2640_v3 = vmax.f32 %v2639_v33, %v2583_v56  ;;  %v2666_v24 = vmax.f32 %v2665_v59, %v2585_v26  ;;  %v2406_v59 = vpop.f32.mrb[48].mxu0 }
 0x5f4   : > { %v2587_v63 = vmax.f32 %v2403_v47, 0.0  ;;  %v2589_v16 = vmax.f32 %v2516_v61, 0.0  ;;  %v9819_v0 = vcombine.high %v8660_v43, %v8663_v44  ;;  %v2628_v34 = vmax.f32 %v2627_v50, %v2586_v53  ;;  %v2519_v47 = vpop.f32.mrb[64].mxu1  ;;  %v2408_v50 = vpop.f32.mrb[49].mxu0 }
 0x5f5   : > { %4735 = vmatpush1.bf16.msra.mxu1 %v9817_v30  ;;  %4510 = vmatprep.subr.bf16.mxu0 %v9818_v29  ;;  %v8997_v7 = vpack.c.bf16 %v2586_v53, %v2582_v45  ;;  %v2654_v5 = vmax.f32 %v2653_v12, %v2588_v19  ;;  %v8999_v8 = vpack.c.bf16 %v2588_v19, %v2584_v17  ;;  %v2521_v12 = vpop.f32.mrb[65].mxu1  ;;  %v2410_v29 = vpop.f32.mrb[50].mxu0 }
 0x5f6   : > { %4736 = vmatprep.subr.bf16.mxu1 %v9819_v0  ;;  %v2641_v36 = vmax.f32 %v2640_v3, %v2587_v63  ;;  %v9001_v37 = vpack.c.bf16 %v2587_v63, %v2583_v56  ;;  %v2667_v23 = vmax.f32 %v2666_v24, %v2589_v16  ;;  %v9003_v52 = vpack.c.bf16 %v2589_v16, %v2585_v26  ;;  %v2412_v0 = vpop.f32.mrb[51].mxu0 }
 0x5f7   : > { %v9820_v33 = vcombine.low %v8643_v38, %v8657_v41  ;;  %v2629_v61 = vrot.slane %v2628_v34, 4  ;;  %v2655_v30 = vrot.slane %v2654_v5, 4  ;;  %v9821_v45 = vcombine.low %v8660_v43, %v8663_v44  ;;  %v2523_v43 = vpop.f32.mrb[66].mxu1 }
 0x5f8   : > { %v2407_v17 = vadd.f32 %v2406_v59, %v8630_v35  ;;  %v2520_v56 = vadd.f32 %v2519_v47, %v8634_v1  ;;  %v9822_v26 = vcombine.high %v8674_v49, %v8677_v51  ;;  %v2642_v38 = vrot.slane %v2641_v36, 4  ;;  %4449 = vmatprep.mubr.bf16.mxu0 %v9001_v37  ;;  %4675 = vmatprep.mubr.bf16.mxu1 %v9001_v37 }
 0x5f9   : > { %4511 = vmatpush1.bf16.msra.mxu0 %v9820_v33  ;;  %4737 = vmatpush1.bf16.msra.mxu1 %v9821_v45  ;;  %v2668_v41 = vrot.slane %v2667_v23, 4  ;;  %v2409_v53 = vadd.f32 %v2408_v50, %v8646_v39  ;;  %v9018_v19 = vadd.f32 %v2521_v12, %v8650_v40  ;;  %v2630_v44 = vmax.f32 %v2628_v34, %v2629_v61  ;;  %v2525_v33 = vpop.f32.mrb[67].mxu1 }
 0x5fa   : > { %4512 = vmatprep.subr.bf16.mxu0 %v9822_v26  ;;  %v2656_v3 = vmax.f32 %v2654_v5, %v2655_v30  ;;  %v2590_v24 = vmax.f32 %v2407_v17, 0.0  ;;  %v2592_v63 = vmax.f32 %v2520_v56, 0.0  ;;  %v9823_v16 = vcombine.high %v8680_v20, %v8691_v4  ;;  %4450 = vmatmul.mubr.bf16.gmra.mrb[76].mxu0 %v8997_v7 }
 0x5fb   : > { %v2643_v59 = vmax.f32 %v2641_v36, %v2642_v38  ;;  %v2669_v47 = vmax.f32 %v2667_v23, %v2668_v41  ;;  %v2591_v45 = vmax.f32 %v2409_v53, 0.0  ;;  %v2593_v50 = vmax.f32 %v9018_v19, 0.0  ;;  %4676 = vmatmul.mubr.bf16.gmra.mrb[92].mxu1 %v8997_v7 }
 0x5fc   : > { %4738 = vmatprep.subr.bf16.mxu1 %v9823_v16  ;;  %v9824_v12 = vcombine.low %v8674_v49, %v8677_v51  ;;  %v2631_v34 = vrot.slane %v2630_v44, 2  ;;  %v2657_v5 = vrot.slane %v2656_v3, 2  ;;  %v2411_v61 = vadd.f32 %v2410_v29, %v8630_v35 }
 0x5fd   : > { %v2524_v30 = vadd.f32 %v2523_v43, %v8634_v1  ;;  %v9825_v17 = vcombine.low %v8680_v20, %v8691_v4  ;;  %v9826_v36 = vcombine.high %v8694_v9, %v8697_v22  ;;  %v2644_v23 = vrot.slane %v2643_v59, 2 }
 0x5fe   : > { %4513 = vmatpush1.bf16.msra.mxu0 %v9824_v12  ;;  %v2670_v56 = vrot.slane %v2669_v47, 2  ;;  %v2413_v49 = vadd.f32 %v2412_v0, %v8646_v39  ;;  %v2526_v51 = vadd.f32 %v2525_v33, %v8650_v40  ;;  %v9827_v26 = vcombine.high %v8708_v60, %v8711_v62  ;;  %v2416_v12 = vpop.f32.mrb[52].mxu0  ;;  %v2529_v0 = vpop.f32.mrb[68].mxu1 }
 0x5ff   : > { %4739 = vmatpush1.bf16.msra.mxu1 %v9825_v17  ;;  %4514 = vmatprep.subr.bf16.mxu0 %v9826_v36  ;;  %v2632_v38 = vmax.f32 %v2630_v44, %v2631_v34  ;;  %v2658_v41 = vmax.f32 %v2656_v3, %v2657_v5  ;;  %v2594_v53 = vmax.f32 %v2411_v61, 0.0  ;;  %v2596_v19 = vmax.f32 %v2524_v30, 0.0  ;;  %v2418_v3 = vpop.f32.mrb[53].mxu0 }
 0x600   : > { %4740 = vmatprep.subr.bf16.mxu1 %v9827_v26  ;;  %v2645_v20 = vmax.f32 %v2643_v59, %v2644_v23  ;;  %v2671_v4 = vmax.f32 %v2669_v47, %v2670_v56  ;;  %v2595_v29 = vmax.f32 %v2413_v49, 0.0  ;;  %v2597_v43 = vmax.f32 %v2526_v51, 0.0  ;;  %v2531_v59 = vpop.f32.mrb[69].mxu1  ;;  %v2420_v61 = vpop.f32.mrb[54].mxu0 }
 0x601   : > { %v9828_v16 = vcombine.low %v8694_v9, %v8697_v22  ;;  %v2633_v17 = vrot.slane %v2632_v38, 1  ;;  %v2659_v33 = vrot.slane %v2658_v41, 1  ;;  %v2674_v36 = vmax.f32 %v2590_v24, %v2594_v53  ;;  %v2533_v30 = vpop.f32.mrb[70].mxu1  ;;  %v2422_v51 = vpop.f32.mrb[55].mxu0 }
 0x602   : > { %v9047_v31 = vpack.c.bf16 %v2594_v53, %v2590_v24  ;;  %v9830_v44 = vcombine.low %v8708_v60, %v8711_v62  ;;  %v9831_v47 = vcombine.high %v8714_v2, %v8725_v15  ;;  %v2646_v34 = vrot.slane %v2645_v20, 1  ;;  %v9832_v24 = vld [vmem:[#allocation36_spill] sm:$0xff]  ;;  %v2535_v26 = vpop.f32.mrb[71].mxu1 }
 0x603   : > { %4515 = vmatpush1.bf16.msra.mxu0 %v9828_v16  ;;  %v2672_v9 = vrot.slane %v2671_v4, 1  ;;  %v2700_v22 = vmax.f32 %v2592_v63, %v2596_v19  ;;  %v9055_v5 = vpack.c.bf16 %v2596_v19, %v2592_v63  ;;  %v9833_v23 = vcombine.high %v8728_v10, %v9832_v24 }
 0x604   : > { %9829 = vst [vmem:[#allocation57_spill] sm:$0xff] %v9047_v31  ;;  %4741 = vmatpush1.bf16.msra.mxu1 %v9830_v44  ;;  %4516 = vmatprep.subr.bf16.mxu0 %v9831_v47  ;;  %v2634_v56 = vmax.f32 %v2632_v38, %v2633_v17  ;;  %v2660_v60 = vmax.f32 %v2658_v41, %v2659_v33 }
 0x605   : > { %4742 = vmatprep.subr.bf16.mxu1 %v9833_v23  ;;  %v2687_v62 = vmax.f32 %v2591_v45, %v2595_v29  ;;  %v9060_v49 = vpack.c.bf16 %v2595_v29, %v2591_v45  ;;  %v2647_v53 = vmax.f32 %v2645_v20, %v2646_v34  ;;  %v2673_v16 = vmax.f32 %v2671_v4, %v2672_v9  ;;  %v9837_v34 = vld [vmem:[#allocation37_spill] sm:$0xff]  ;;  %v9838_v9 = vld [vmem:[#allocation38_spill] sm:$0xff] }
 0x606   : > { %v2713_v44 = vmax.f32 %v2593_v50, %v2597_v43  ;;  %v9062_v47 = vpack.c.bf16 %v2597_v43, %v2593_v50  ;;  %v9834_v63 = vcombine.low %v8714_v2, %v8725_v15  ;;  %v2417_v19 = vadd.f32 %v2416_v12, %v8630_v35  ;;  %v9835_v12 = vld [vmem:[#allocation33_spill] sm:$0xff] }
 0x607   : > { %v2530_v23 = vadd.f32 %v2529_v0, %v8634_v1  ;;  %v2419_v38 = vadd.f32 %v2418_v3, %v8646_v39  ;;  %v2532_v45 = vadd.f32 %v2531_v59, %v8650_v40  ;;  %4459 = vmatprep.mubr.bf16.mxu0 %v9060_v49  ;;  %v2734_v41 = vcombine.low %v2634_v56, %v2647_v53  ;;  %v2539_v56 = vpop.f32.mrb[72].mxu1 }
 0x608   : > { %4517 = vmatpush1.bf16.msra.mxu0 %v9834_v63  ;;  %v2735_v20 = vcombine.low %v2660_v60, %v2673_v16  ;;  %v2421_v4 = vadd.f32 %v2420_v61, %v8630_v35  ;;  %v2534_v50 = vadd.f32 %v2533_v30, %v8634_v1  ;;  %4685 = vmatprep.mubr.bf16.mxu1 %v9060_v49  ;;  %v2598_v2 = vmax.f32 %v2417_v19, 0.0  ;;  %v2426_v30 = vpop.f32.mrb[56].mxu0  ;;  %v9840_v19 = vld [vmem:[#allocation39_spill] sm:$0xff] }
 0x609   : > { %v2600_v15 = vmax.f32 %v2530_v23, 0.0  ;;  %v2599_v29 = vmax.f32 %v2419_v38, 0.0  ;;  %v2601_v43 = vmax.f32 %v2532_v45, 0.0  ;;  %4460 = vmatmul.mubr.bf16.gmra.mrb[80].mxu0 %v9047_v31  ;;  %4686 = vmatmul.mubr.bf16.gmra.mrb[96].mxu1 %v9047_v31  ;;  %v9078_v0 = vrot.slane %v2734_v41, %v9835_v12  ;;  %v9841_v23 = vld [vmem:[#allocation40_spill] sm:$0xff]  ;;  %v2428_v45 = vpop.f32.mrb[57].mxu0  ;;  %v2541_v41 = vpop.f32.mrb[73].mxu1 }
 0x60a   : > { %v9081_v17 = vrot.slane %v2735_v20, %v9835_v12  ;;  %v2602_v33 = vmax.f32 %v2421_v4, 0.0  ;;  %v2604_v3 = vmax.f32 %v2534_v50, 0.0  ;;  %v9836_v59 = vcombine.low %v8728_v10, %v9832_v24  ;;  %v9845_v10 = vld [vmem:[#allocation42_spill] sm:$0xff] }
 0x60b   : > { %v9839_v61 = vcombine.high %v9837_v34, %v9838_v9  ;;  %v2675_v60 = vmax.f32 %v2674_v36, %v2598_v2  ;;  %v2701_v53 = vmax.f32 %v2700_v22, %v2600_v15  ;;  %v2688_v16 = vmax.f32 %v2687_v62, %v2599_v29  ;;  %v2430_v22 = vpop.f32.mrb[58].mxu0  ;;  %v2543_v62 = vpop.f32.mrb[74].mxu1 }
 0x60c   : > { %4743 = vmatpush1.bf16.msra.mxu1 %v9836_v59  ;;  %v2714_v63 = vmax.f32 %v2713_v44, %v2601_v43  ;;  %v9842_v38 = vcombine.high %v9840_v19, %v9841_v23  ;;  %v9094_v24 = vpack.c.bf16 %v2602_v33, %v2598_v2  ;;  %v9096_v20 = vpack.c.bf16 %v2604_v3, %v2600_v15  ;;  %v2432_v15 = vpop.f32.mrb[59].mxu0  ;;  %v2545_v21 = vpop.f32.mrb[75].mxu1 }
 0x60d   : > { %4518 = vmatprep.subr.bf16.mxu0 %v9839_v61  ;;  %v2423_v4 = vadd.f32 %v2422_v51, %v8646_v39  ;;  %v9843_v36 = vcombine.low %v9837_v34, %v9838_v9  ;;  %v2676_v44 = vmax.f32 %v2675_v60, %v2602_v33  ;;  %v2702_v50 = vmax.f32 %v2701_v53, %v2604_v3  ;;  %v9848_v53 = vld [vmem:[#allocation43_spill] sm:$0xff] }
 0x60e   : > { %4744 = vmatprep.subr.bf16.mxu1 %v9842_v38  ;;  %v2536_v59 = vadd.f32 %v2535_v26, %v8650_v40  ;;  %v2427_v61 = vadd.f32 %v2426_v30, %v8630_v35  ;;  %v9844_v38 = vld [vmem:[#allocation41_spill] sm:$0xff]  ;;  %v9847_v51 = vcombine.low %v9840_v19, %v9841_v23  ;;  %v2540_v34 = vadd.f32 %v2539_v56, %v8634_v1 }
 0x60f   : > { %4519 = vmatpush1.bf16.msra.mxu0 %v9843_v36  ;;  %v9846_v2 = vcombine.high %v9844_v38, %v9845_v10  ;;  %v2603_v18 = vmax.f32 %v2423_v4, 0.0  ;;  %v2429_v33 = vadd.f32 %v2428_v45, %v8646_v39  ;;  %v2542_v3 = vadd.f32 %v2541_v41, %v8650_v40  ;;  %v9849_v36 = vld [vmem:[#allocation44_spill] sm:$0xff] }
 0x610   : > { %4745 = vmatpush1.bf16.msra.mxu1 %v9847_v51  ;;  %v2605_v26 = vmax.f32 %v2536_v59, 0.0  ;;  %v2606_v9 = vmax.f32 %v2427_v61, 0.0  ;;  %v2431_v30 = vadd.f32 %v2430_v22, %v8630_v35  ;;  %v2544_v60 = vadd.f32 %v2543_v62, %v8634_v1  ;;  %v9852_v61 = vld [vmem:[#allocation45_spill] sm:$0xff]  ;;  %v9853_v62 = vld [vmem:[#allocation46_spill] sm:$0xff] }
 0x611   : > { %4520 = vmatprep.subr.bf16.mxu0 %v9846_v2  ;;  %v9850_v2 = vcombine.high %v9848_v53, %v9849_v36  ;;  %v2689_v4 = vmax.f32 %v2688_v16, %v2603_v18  ;;  %v9118_v28 = vpack.c.bf16 %v2603_v18, %v2599_v29  ;;  %v2608_v19 = vmax.f32 %v2540_v34, 0.0  ;;  %v2436_v29 = vpop.f32.mrb[60].mxu0 }
 0x612   : > { %v2607_v23 = vmax.f32 %v2429_v33, 0.0  ;;  %v9851_v56 = vcombine.low %v9844_v38, %v9845_v10  ;;  %v2715_v45 = vmax.f32 %v2714_v63, %v2605_v26  ;;  %v9123_v41 = vpack.c.bf16 %v2605_v26, %v2601_v43  ;;  %v2549_v10 = vpop.f32.mrb[76].mxu1 }
 0x613   : > { %4746 = vmatprep.subr.bf16.mxu1 %v9850_v2  ;;  %v2677_v59 = vmax.f32 %v2676_v44, %v2606_v9  ;;  %v2609_v22 = vmax.f32 %v2542_v3, 0.0  ;;  %v9854_v51 = vcombine.high %v9852_v61, %v9853_v62  ;;  %v2703_v31 = vmax.f32 %v2702_v50, %v2608_v19  ;;  %4469 = vmatprep.mubr.bf16.mxu0 %v9118_v28  ;;  %v2438_v44 = vpop.f32.mrb[61].mxu0  ;;  %v2551_v50 = vpop.f32.mrb[77].mxu1 }
 0x614   : > { %4521 = vmatpush1.bf16.msra.mxu0 %v9851_v56  ;;  %v2690_v2 = vmax.f32 %v2689_v4, %v2607_v23  ;;  %v2610_v16 = vmax.f32 %v2431_v30, 0.0  ;;  %v2612_v18 = vmax.f32 %v2544_v60, 0.0  ;;  %4695 = vmatprep.mubr.bf16.mxu1 %v9118_v28  ;;  %v2433_v43 = vadd.f32 %v2432_v15, %v8646_v39  ;;  %v2440_v60 = vpop.f32.mrb[62].mxu0  ;;  %v2553_v15 = vpop.f32.mrb[78].mxu1  ;;  %v9856_v56 = vld [vmem:[#allocation47_spill] sm:$0xff] }
 0x615   : > { %4522 = vmatprep.subr.bf16.mxu0 %v9854_v51  ;;  %v2716_v38 = vmax.f32 %v2715_v45, %v2609_v22  ;;  %v2546_v63 = vadd.f32 %v2545_v21, %v8650_v40  ;;  %4470 = vmatmul.mubr.bf16.gmra.mrb[84].mxu0 %v9094_v24  ;;  %v9855_v30 = vcombine.low %v9848_v53, %v9849_v36  ;;  %v9857_v45 = vld [vmem:[#allocation48_spill] sm:$0xff] }
 0x616   : > { %4696 = vmatmul.mubr.bf16.gmra.mrb[100].mxu1 %v9094_v24  ;;  %v2678_v34 = vmax.f32 %v2677_v59, %v2610_v16  ;;  %v9134_v33 = vpack.c.bf16 %v2610_v16, %v2606_v9  ;;  %v2704_v3 = vmax.f32 %v2703_v31, %v2612_v18  ;;  %v9136_v26 = vpack.c.bf16 %v2612_v18, %v2608_v19  ;;  %v2442_v19 = vpop.f32.mrb[63].mxu0  ;;  %v2555_v16 = vpop.f32.mrb[79].mxu1 }
 0x617   : > { %4747 = vmatpush1.bf16.msra.mxu1 %v9855_v30  ;;  %v2611_v4 = vmax.f32 %v2433_v43, 0.0  ;;  %v2613_v21 = vmax.f32 %v2546_v63, 0.0  ;;  %v9858_v51 = vcombine.high %v9856_v56, %v9857_v45  ;;  %v9859_v59 = vcombine.low %v9852_v61, %v9853_v62  ;;  %v9860_v63 = vld [vmem:[#allocation49_spill] sm:$0xff]  ;;  %v9861_v30 = vld [vmem:[#allocation50_spill] sm:$0xff] }
 0x618   : > { %v2437_v31 = vadd.f32 %v2436_v29, %v8630_v35  ;;  %v2550_v9 = vadd.f32 %v2549_v10, %v8634_v1  ;;  %v2439_v53 = vadd.f32 %v2438_v44, %v8646_v39  ;;  %v2552_v36 = vadd.f32 %v2551_v50, %v8650_v40 }
 0x619   : > { %4748 = vmatprep.subr.bf16.mxu1 %v9858_v51  ;;  %4523 = vmatpush1.bf16.msra.mxu0 %v9859_v59  ;;  %v2441_v18 = vadd.f32 %v2440_v60, %v8630_v35  ;;  %v2554_v43 = vadd.f32 %v2553_v15, %v8634_v1  ;;  %v9862_v51 = vcombine.high %v9860_v63, %v9861_v30 }
 0x61a   : > { %v2691_v61 = vmax.f32 %v2690_v2, %v2611_v4  ;;  %v9156_v62 = vpack.c.bf16 %v2611_v4, %v2607_v23  ;;  %v2717_v29 = vmax.f32 %v2716_v38, %v2613_v21  ;;  %v9158_v10 = vpack.c.bf16 %v2613_v21, %v2609_v22  ;;  %v3050_v22 = vld [vmem:[%s8143_s23 + $0x788] sm:$0xff] }
 0x61b   : > { %4524 = vmatprep.subr.bf16.mxu0 %v9862_v51  ;;  %v9863_v44 = vcombine.low %v9856_v56, %v9857_v45  ;;  %v2614_v50 = vmax.f32 %v2437_v31, 0.0  ;;  %v2616_v35 = vmax.f32 %v2550_v9, 0.0  ;;  %v2615_v60 = vmax.f32 %v2439_v53, 0.0  ;;  %v3054_v38 = vld [vmem:[%s8143_s23 + $0x7a8] sm:$0xff]  ;;  %v9865_v9 = vld [vmem:[#allocation52_spill] sm:$0xff] }
 0x61c   : > { %v2617_v1 = vmax.f32 %v2552_v36, 0.0  ;;  %v2618_v15 = vmax.f32 %v2441_v18, 0.0  ;;  %v2620_v59 = vmax.f32 %v2554_v43, 0.0  ;;  %4479 = vmatprep.mubr.bf16.mxu0 %v9156_v62  ;;  %4705 = vmatprep.mubr.bf16.mxu1 %v9156_v62  ;;  %v2443_v23 = vadd.f32 %v2442_v19, %v8646_v39  ;;  %v9864_v31 = vld [vmem:[#allocation51_spill] sm:$0xff] }
 0x61d   : > { %4749 = vmatpush1.bf16.msra.mxu1 %v9863_v44  ;;  %v2556_v2 = vadd.f32 %v2555_v16, %v8650_v40  ;;  %v2679_v4 = vmax.f32 %v2678_v34, %v2614_v50  ;;  %v2705_v21 = vmax.f32 %v2704_v3, %v2616_v35  ;;  %v2692_v56 = vmax.f32 %v2691_v61, %v2615_v60 }
 0x61e   : > { %v2718_v45 = vmax.f32 %v2717_v29, %v2617_v1  ;;  %v9866_v53 = vcombine.high %v9864_v31, %v9865_v9  ;;  %v9172_v36 = vpack.c.bf16 %v2618_v15, %v2614_v50  ;;  %v9174_v18 = vpack.c.bf16 %v2620_v59, %v2616_v35  ;;  %4480 = vmatmul.mubr.bf16.gmra.mrb[88].mxu0 %v9134_v33 }
 0x61f   : > { %v2619_v43 = vmax.f32 %v2443_v23, 0.0  ;;  %v2621_v51 = vmax.f32 %v2556_v2, 0.0  ;;  %4706 = vmatmul.mubr.bf16.gmra.mrb[104].mxu1 %v9134_v33  ;;  %v2680_v39 = vmax.f32 %v2679_v4, %v2618_v15  ;;  %v2706_v40 = vmax.f32 %v2705_v21, %v2620_v59  ;;  %v3057_v15 = vld [vmem:[%s8143_s23 + $0x7c0] sm:$0xff]  ;;  %v3058_v2 = vld [vmem:[%s8143_s23 + $0x7c8] sm:$0xff] }
 0x620   : > { %4750 = vmatprep.subr.bf16.mxu1 %v9866_v53  ;;  %v9867_v34 = vcombine.low %v9860_v63, %v9861_v30  ;;  %v9868_v3 = vcombine.low %v9864_v31, %v9865_v9  ;;  %v6483_v19 = vcombine.high %v3050_v22, %v3054_v38  ;;  %v9869_v50 = vcombine.high %v8850_v57, %v8853_v13  ;;  %v3062_v4 = vld [vmem:[%s8143_s23 + $0x7e8] sm:$0xff] }
 0x621   : > { %v2693_v16 = vmax.f32 %v2692_v56, %v2619_v43  ;;  %v9184_v61 = vpack.c.bf16 %v2619_v43, %v2615_v60  ;;  %v2719_v29 = vmax.f32 %v2718_v45, %v2621_v51  ;;  %v9186_v44 = vpack.c.bf16 %v2621_v51, %v2617_v1  ;;  %v3061_v1 = vld [vmem:[%s8143_s23 + $0x7e0] sm:$0xff] }
 0x622   : > { %4525 = vmatpush1.bf16.msra.mxu0 %v9867_v34  ;;  %4751 = vmatpush1.bf16.msra.mxu1 %v9868_v3  ;;  %v2681_v63 = vrot.slane %v2680_v39, 4  ;;  %v2707_v30 = vrot.slane %v2706_v40, 4  ;;  %v9870_v35 = vcombine.high %v8894_v54, %v8897_v55  ;;  %v6480_v60 = vcombine.low %v8948_v25, %v8951_v27  ;;  %v2811_v34 = vld [vmem:[%s8143_s23 + $0x10] sm:$0xff] }
 0x623   : > { %4526 = vmatprep.subr.bf16.mxu0 %v9869_v50  ;;  %v2694_v59 = vrot.slane %v2693_v16, 4  ;;  %v2720_v23 = vrot.slane %v2719_v29, 4  ;;  %4489 = vmatprep.mubr.bf16.mxu0 %v9184_v61  ;;  %v9871_v45 = vcombine.low %v8850_v57, %v8853_v13  ;;  %v9872_v31 = vcombine.low %v8894_v54, %v8897_v55  ;;  %v2812_v57 = vld [vmem:[%s8143_s23 + $0x18] sm:$0xff] }
 0x624   : > { %4752 = vmatprep.subr.bf16.mxu1 %v9870_v35  ;;  %4715 = vmatprep.mubr.bf16.mxu1 %v9184_v61  ;;  %v2682_v21 = vmax.f32 %v2680_v39, %v2681_v63  ;;  %v2708_v56 = vmax.f32 %v2706_v40, %v2707_v30  ;;  %v6482_v9 = vcombine.low %v3050_v22, %v3054_v38  ;;  %v2815_v39 = vld [vmem:[%s8143_s23 + $0x30] sm:$0xff]  ;;  %v2816_v13 = vld [vmem:[%s8143_s23 + $0x38] sm:$0xff] }
 0x625   : > { %v2695_v53 = vmax.f32 %v2693_v16, %v2694_v59  ;;  %v2721_v43 = vmax.f32 %v2719_v29, %v2720_v23  ;;  %v9873_v51 = vcombine.high %v8948_v25, %v8951_v27  ;;  %v6489_v50 = vcombine.high %v3057_v15, %v3061_v1  ;;  %v9874_v16 = vld [vmem:[#allocation56_spill] sm:$0xff] }
 0x626   : > { %4527 = vmatpush1.bf16.msra.mxu0 %v9871_v45  ;;  %4753 = vmatpush1.bf16.msra.mxu1 %v9872_v31  ;;  %v2683_v3 = vrot.slane %v2682_v21, 2  ;;  %v2709_v40 = vrot.slane %v2708_v56, 2  ;;  %v6491_v63 = vcombine.high %v3058_v2, %v3062_v4  ;;  %v6488_v54 = vcombine.low %v3057_v15, %v3061_v1  ;;  %v2819_v15 = vld [vmem:[%s8143_s23 + $0x50] sm:$0xff] }
 0x627   : > { %4528 = vmatprep.subr.bf16.mxu0 %v9873_v51  ;;  %4754 = vmatprep.subr.bf16.mxu1 %v6483_v19  ;;  %v2696_v30 = vrot.slane %v2695_v53, 2  ;;  %v2722_v35 = vrot.slane %v2721_v43, 2  ;;  %v6490_v55 = vcombine.low %v3058_v2, %v3062_v4  ;;  %v6245_v22 = vcombine.high %v2811_v34, %v2815_v39  ;;  %v2823_v4 = vld [vmem:[%s8143_s23 + $0x70] sm:$0xff] }
 0x628   : > { %4490 = vmatmul.mubr.bf16.gmra.mrb[92].mxu0 %v9172_v36  ;;  %4716 = vmatmul.mubr.bf16.gmra.mrb[108].mxu1 %v9172_v36  ;;  %v2684_v25 = vmax.f32 %v2682_v21, %v2683_v3  ;;  %v2710_v27 = vmax.f32 %v2708_v56, %v2709_v40  ;;  %v6247_v29 = vcombine.high %v2812_v57, %v2816_v13  ;;  %v2820_v21 = vld [vmem:[%s8143_s23 + $0x58] sm:$0xff]  ;;  %v2827_v51 = vld [vmem:[%s8143_s23 + $0x90] sm:$0xff] }
 0x629   : > { %v2697_v38 = vmax.f32 %v2695_v53, %v2696_v30  ;;  %v2723_v19 = vmax.f32 %v2721_v43, %v2722_v35  ;;  %4532 = vmatprep.mubr.bf16.mxu0 %v9874_v16  ;;  %4758 = vmatprep.mubr.bf16.mxu1 %v9874_v16  ;;  %v6244_v2 = vcombine.low %v2811_v34, %v2815_v39  ;;  %v2824_v56 = vld [vmem:[%s8143_s23 + $0x78] sm:$0xff]  ;;  %v2831_v3 = vld [vmem:[%s8143_s23 + $0xb0] sm:$0xff]  ;;  %v9875_v35 = vld [vmem:[#allocation54_spill] sm:$0xff] }
 0x62a   : > { %4529 = vmatpush1.bf16.msra.mxu0 %v6480_v60  ;;  %4755 = vmatpush1.bf16.msra.mxu1 %v6482_v9  ;;  %v2685_v59 = vrot.slane %v2684_v25, 1  ;;  %v2711_v23 = vrot.slane %v2710_v27, 1  ;;  %v6246_v9 = vcombine.low %v2812_v57, %v2816_v13  ;;  %v6253_v40 = vcombine.high %v2819_v15, %v2823_v4  ;;  %v2832_v34 = vld [vmem:[%s8143_s23 + $0xb8] sm:$0xff] }
 0x62b   : > { %4530 = vmatprep.subr.bf16.mxu0 %v6489_v50  ;;  %4756 = vmatprep.subr.bf16.mxu1 %v6491_v63  ;;  %v2698_v1 = vrot.slane %v2697_v38, 1  ;;  %v2724_v60 = vrot.slane %v2723_v19, 1  ;;  %v6255_v50 = vcombine.high %v2820_v21, %v2824_v56  ;;  %v2828_v63 = vld [vmem:[%s8143_s23 + $0x98] sm:$0xff]  ;;  %v6252_v57 = vcombine.low %v2819_v15, %v2823_v4 }
 0x62c   : > { %v2686_v45 = vmax.f32 %v2684_v25, %v2685_v59  ;;  %v2712_v31 = vmax.f32 %v2710_v27, %v2711_v23  ;;  %v6254_v13 = vcombine.low %v2820_v21, %v2824_v56  ;;  %v6263_v27 = vcombine.high %v2828_v63, %v2832_v34  ;;  %v2840_v59 = vld [vmem:[%s8143_s23 + $0xf8] sm:$0xff]  ;;  %v2847_v21 = vld [vmem:[%s8143_s23 + $0x130] sm:$0xff] }
 0x62d   : > { %v2699_v53 = vmax.f32 %v2697_v38, %v2698_v1  ;;  %v2725_v43 = vmax.f32 %v2723_v19, %v2724_v60  ;;  %v2839_v19 = vld [vmem:[%s8143_s23 + $0xf0] sm:$0xff]  ;;  %v6260_v23 = vcombine.low %v2827_v51, %v2831_v3  ;;  %v6262_v15 = vcombine.low %v2828_v63, %v2832_v34  ;;  %v2844_v56 = vld [vmem:[%s8143_s23 + $0x118] sm:$0xff] }
 0x62e   : > { %4531 = vmatpush1.bf16.msra.mxu0 %v6488_v54  ;;  %4757 = vmatpush1.bf16.msra.mxu1 %v6490_v55  ;;  %v6261_v54 = vcombine.high %v2827_v51, %v2831_v3  ;;  %v2843_v60 = vld [vmem:[%s8143_s23 + $0x110] sm:$0xff]  ;;  %v2852_v34 = vld [vmem:[%s8143_s23 + $0x158] sm:$0xff] }
 0x62f   : > { %4839 = vmatprep.subr.bf16.mxu0 %v6245_v22  ;;  %5065 = vmatprep.subr.bf16.mxu1 %v6247_v29  ;;  %v2751_v39 = vcombine.low %v2686_v45, %v2699_v53  ;;  %v2752_v30 = vcombine.low %v2712_v31, %v2725_v43  ;;  %v2835_v22 = vld [vmem:[%s8143_s23 + $0xd0] sm:$0xff]  ;;  %v2836_v29 = vld [vmem:[%s8143_s23 + $0xd8] sm:$0xff]  ;;  %v9876_v31 = vcombine.low %v9078_v0, %v9081_v17 }
 0x630   : > { %v6271_v4 = vcombine.high %v2836_v29, %v2840_v59  ;;  %v2848_v45 = vld [vmem:[%s8143_s23 + $0x138] sm:$0xff]  ;;  %v6268_v43 = vcombine.low %v2835_v22, %v2839_v19  ;;  %v6270_v51 = vcombine.low %v2836_v29, %v2840_v59  ;;  %v6277_v0 = vcombine.high %v2843_v60, %v2847_v21  ;;  %v2855_v63 = vld [vmem:[%s8143_s23 + $0x170] sm:$0xff] }
 0x631   : > { %4533 = vmatmul.mubr.bf16.vlgmr.msra.gmra.mrb[64].mxu0 %v9875_v35  ;;  %4759 = vmatmul.mubr.bf16.vlgmr.msra.gmra.mrb[80].mxu1 %v9875_v35  ;;  %v2759_v55 = vrot.slane %v2751_v39, %v9835_v12  ;;  %v2766_v25 = vrot.slane %v2752_v30, %v9835_v12  ;;  %v6279_v17 = vcombine.high %v2844_v56, %v2848_v45  ;;  %v2856_v39 = vld [vmem:[%s8143_s23 + $0x178] sm:$0xff] }
 0x632   : > { %4840 = vmatpush1.bf16.msra.mxu0 %v6244_v2  ;;  %5066 = vmatpush1.bf16.msra.mxu1 %v6246_v9  ;;  %v6269_v2 = vcombine.high %v2835_v22, %v2839_v19  ;;  %v6276_v30 = vcombine.low %v2843_v60, %v2847_v21  ;;  %v2864_v22 = vld [vmem:[%s8143_s23 + $0x1b8] sm:$0xff]  ;;  %v6286_v19 = vcombine.low %v2852_v34, %v2856_v39  ;;  %v2875_v21 = vld [vmem:[%s8143_s23 + $0x210] sm:$0xff] }
 0x633   : > { %4542 = vmatprep.mubr.bf16.mxu0 %v8901_v58  ;;  %4768 = vmatprep.mubr.bf16.mxu1 %v8901_v58  ;;  %v2767_v38 = vcombine.low %v2759_v55, %v2766_v25  ;;  %v6287_v55 = vcombine.high %v2852_v34, %v2856_v39  ;;  %v2863_v25 = vld [vmem:[%s8143_s23 + $0x1b0] sm:$0xff]  ;;  %v2872_v60 = vld [vmem:[%s8143_s23 + $0x1f8] sm:$0xff] }
 0x634   : > { %4841 = vmatprep.subr.bf16.mxu0 %v6253_v40  ;;  %5067 = vmatprep.subr.bf16.mxu1 %v6255_v50  ;;  %v2851_v50 = vld [vmem:[%s8143_s23 + $0x150] sm:$0xff] }
 0x635   : > { %v2770_v1 = vrot.slane %v2767_v38, 7  ;;  %v6284_v38 = vcombine.low %v2851_v50, %v2855_v63 }
 0x636   : > { %4842 = vmatpush1.bf16.msra.mxu0 %v6252_v57  ;;  %5068 = vmatpush1.bf16.msra.mxu1 %v6254_v13  ;;  %v6278_v57 = vcombine.low %v2844_v56, %v2848_v45  ;;  %v2859_v13 = vld [vmem:[%s8143_s23 + $0x190] sm:$0xff] }
 0x637   : > { %4843 = vmatprep.subr.bf16.mxu0 %v6261_v54  ;;  %5069 = vmatprep.subr.bf16.mxu1 %v6263_v27  ;;  %v2771_v9 = vsel %vm1558_vm3, %v2770_v1, %v9876_v31  ;;  %v6285_v54 = vcombine.high %v2851_v50, %v2855_v63  ;;  %v2860_v27 = vld [vmem:[%s8143_s23 + $0x198] sm:$0xff]  ;;  %v6293_v29 = vcombine.high %v2859_v13, %v2863_v25  ;;  %v2879_v31 = vld [vmem:[%s8143_s23 + $0x230] sm:$0xff] }
 0x638   : > { %v2772_v53 = vsel %vm1560_vm4, %v2770_v1, %v2771_v9  ;;  %v6295_v59 = vcombine.high %v2860_v27, %v2864_v22  ;;  %v2876_v9 = vld [vmem:[%s8143_s23 + $0x218] sm:$0xff]  ;;  %v6308_v34 = vcombine.low %v2875_v21, %v2879_v31 }
 0x639   : > { %4543 = vmatmul.mubr.bf16.gmra.mrb[68].mxu0 %v8891_v14  ;;  %4769 = vmatmul.mubr.bf16.gmra.mrb[84].mxu1 %v8891_v14  ;;  %v2773_v3 = vsel %vm1562_vm5, %v2770_v1, %v2772_v53  ;;  %v2880_v53 = vld [vmem:[%s8143_s23 + $0x238] sm:$0xff] }
 0x63a   : > { %4844 = vmatpush1.bf16.msra.mxu0 %v6260_v23  ;;  %5070 = vmatpush1.bf16.msra.mxu1 %v6262_v15  ;;  %v2774_v40 = vsel %vm1564_vm6, %v2770_v1, %v2773_v3  ;;  %v2867_v23 = vld [vmem:[%s8143_s23 + $0x1d0] sm:$0xff]  ;;  %v2868_v1 = vld [vmem:[%s8143_s23 + $0x1d8] sm:$0xff]  ;;  %v6309_v3 = vcombine.high %v2875_v21, %v2879_v31  ;;  %v6310_v39 = vcombine.low %v2876_v9, %v2880_v53 }
 0x63b   : > { %4552 = vmatprep.mubr.bf16.mxu0 %v8955_v32  ;;  %4778 = vmatprep.mubr.bf16.mxu1 %v8955_v32  ;;  %2776 = vst [vmem:[%s8383_s21 + $0x10] sm:$0xff] %v2774_v40  ;;  %v2871_v15 = vld [vmem:[%s8143_s23 + $0x1f0] sm:$0xff]  ;;  %v6303_v45 = vcombine.high %v2868_v1, %v2872_v60  ;;  %v2884_v50 = vld [vmem:[%s8143_s23 + $0x258] sm:$0xff] }
 0x63c   : > { %4845 = vmatprep.subr.bf16.mxu0 %v6269_v2  ;;  %5071 = vmatprep.subr.bf16.mxu1 %v6271_v4  ;;  %v6292_v2 = vcombine.low %v2859_v13, %v2863_v25  ;;  %v6294_v4 = vcombine.low %v2860_v27, %v2864_v22  ;;  %v6301_v56 = vcombine.high %v2867_v23, %v2871_v15  ;;  %v2887_v40 = vld [vmem:[%s8143_s23 + $0x270] sm:$0xff]  ;;  %v2888_v63 = vld [vmem:[%s8143_s23 + $0x278] sm:$0xff] }
 0x63d   : > { %v6319_v13 = vcombine.high %v2884_v50, %v2888_v63  ;;  %v2896_v25 = vld [vmem:[%s8143_s23 + $0x2b8] sm:$0xff]  ;;  %v6318_v22 = vcombine.low %v2884_v50, %v2888_v63 }
 0x63e   : > { %4846 = vmatpush1.bf16.msra.mxu0 %v6268_v43  ;;  %5072 = vmatpush1.bf16.msra.mxu1 %v6270_v51  ;;  %v6300_v43 = vcombine.low %v2867_v23, %v2871_v15  ;;  %v6302_v51 = vcombine.low %v2868_v1, %v2872_v60  ;;  %v2900_v23 = vld [vmem:[%s8143_s23 + $0x2d8] sm:$0xff] }
 0x63f   : > { %4847 = vmatprep.subr.bf16.mxu0 %v6277_v0  ;;  %5073 = vmatprep.subr.bf16.mxu1 %v6279_v17  ;;  %v6311_v0 = vcombine.high %v2876_v9, %v2880_v53  ;;  %v2883_v17 = vld [vmem:[%s8143_s23 + $0x250] sm:$0xff]  ;;  %v2904_v15 = vld [vmem:[%s8143_s23 + $0x2f8] sm:$0xff] }
 0x640   : > { %v6316_v27 = vcombine.low %v2883_v17, %v2887_v40  ;;  %v6335_v21 = vcombine.high %v2900_v23, %v2904_v15  ;;  %v2912_v31 = vld [vmem:[%s8143_s23 + $0x338] sm:$0xff]  ;;  %v6334_v53 = vcombine.low %v2900_v23, %v2904_v15 }
 0x641   : > { %4553 = vmatmul.mubr.bf16.gmra.mrb[72].mxu0 %v8945_v6  ;;  %4779 = vmatmul.mubr.bf16.gmra.mrb[88].mxu1 %v8945_v6 }
 0x642   : > { %4848 = vmatpush1.bf16.msra.mxu0 %v6276_v30  ;;  %5074 = vmatpush1.bf16.msra.mxu1 %v6278_v57  ;;  %v2891_v30 = vld [vmem:[%s8143_s23 + $0x290] sm:$0xff]  ;;  %v6317_v57 = vcombine.high %v2883_v17, %v2887_v40  ;;  %v2916_v17 = vld [vmem:[%s8143_s23 + $0x358] sm:$0xff] }
 0x643   : > { %4562 = vmatprep.mubr.bf16.mxu0 %v9003_v52  ;;  %4788 = vmatprep.mubr.bf16.mxu1 %v9003_v52  ;;  %v2920_v40 = vld [vmem:[%s8143_s23 + $0x378] sm:$0xff] }
 0x644   : > { %4849 = vmatprep.subr.bf16.mxu0 %v6285_v54  ;;  %5075 = vmatprep.subr.bf16.mxu1 %v6287_v55  ;;  %v2895_v54 = vld [vmem:[%s8143_s23 + $0x2b0] sm:$0xff]  ;;  %v2892_v55 = vld [vmem:[%s8143_s23 + $0x298] sm:$0xff] }
 0x645   : > { %v6324_v1 = vcombine.low %v2891_v30, %v2895_v54  ;;  %v6326_v60 = vcombine.low %v2892_v55, %v2896_v25 }
 0x646   : > { %4850 = vmatpush1.bf16.msra.mxu0 %v6284_v38  ;;  %5076 = vmatpush1.bf16.msra.mxu1 %v6286_v19  ;;  %v6325_v38 = vcombine.high %v2891_v30, %v2895_v54  ;;  %v6327_v19 = vcombine.high %v2892_v55, %v2896_v25  ;;  %v6351_v30 = vcombine.high %v2916_v17, %v2920_v40  ;;  %v2928_v54 = vld [vmem:[%s8143_s23 + $0x3b8] sm:$0xff] }
 0x647   : > { %4851 = vmatprep.subr.bf16.mxu0 %v6293_v29  ;;  %5077 = vmatprep.subr.bf16.mxu1 %v6295_v59  ;;  %v2899_v29 = vld [vmem:[%s8143_s23 + $0x2d0] sm:$0xff]  ;;  %v6350_v25 = vcombine.low %v2916_v17, %v2920_v40  ;;  %v2952_v17 = vld [vmem:[%s8143_s23 + $0x478] sm:$0xff] }
 0x648   : > { %v2903_v59 = vld [vmem:[%s8143_s23 + $0x2f0] sm:$0xff] }
 0x649   : > { %4563 = vmatmul.mubr.bf16.gmra.mrb[76].mxu0 %v8999_v8  ;;  %4789 = vmatmul.mubr.bf16.gmra.mrb[92].mxu1 %v8999_v8  ;;  %v6332_v9 = vcombine.low %v2899_v29, %v2903_v59 }
 0x64a   : > { %4852 = vmatpush1.bf16.msra.mxu0 %v6292_v2  ;;  %5078 = vmatpush1.bf16.msra.mxu1 %v6294_v4  ;;  %v2907_v2 = vld [vmem:[%s8143_s23 + $0x310] sm:$0xff]  ;;  %v6333_v4 = vcombine.high %v2899_v29, %v2903_v59  ;;  %v2932_v29 = vld [vmem:[%s8143_s23 + $0x3d8] sm:$0xff] }
 0x64b   : > { %4572 = vmatprep.mubr.bf16.mxu0 %v9062_v47  ;;  %4798 = vmatprep.mubr.bf16.mxu1 %v9062_v47  ;;  %v2936_v59 = vld [vmem:[%s8143_s23 + $0x3f8] sm:$0xff] }
 0x64c   : > { %4853 = vmatprep.subr.bf16.mxu0 %v6301_v56  ;;  %5079 = vmatprep.subr.bf16.mxu1 %v6303_v45  ;;  %v2911_v56 = vld [vmem:[%s8143_s23 + $0x330] sm:$0xff]  ;;  %v2908_v45 = vld [vmem:[%s8143_s23 + $0x318] sm:$0xff] }
 0x64d   : > { %v6340_v50 = vcombine.low %v2907_v2, %v2911_v56  ;;  %v6342_v63 = vcombine.low %v2908_v45, %v2912_v31 }
 0x64e   : > { %4854 = vmatpush1.bf16.msra.mxu0 %v6300_v43  ;;  %5080 = vmatpush1.bf16.msra.mxu1 %v6302_v51  ;;  %v6341_v43 = vcombine.high %v2907_v2, %v2911_v56  ;;  %v6343_v51 = vcombine.high %v2908_v45, %v2912_v31  ;;  %v6367_v2 = vcombine.high %v2932_v29, %v2936_v59  ;;  %v2944_v56 = vld [vmem:[%s8143_s23 + $0x438] sm:$0xff] }
 0x64f   : > { %4855 = vmatprep.subr.bf16.mxu0 %v6309_v3  ;;  %5081 = vmatprep.subr.bf16.mxu1 %v6311_v0  ;;  %v2915_v3 = vld [vmem:[%s8143_s23 + $0x350] sm:$0xff]  ;;  %v6366_v31 = vcombine.low %v2932_v29, %v2936_v59  ;;  %v2964_v29 = vld [vmem:[%s8143_s23 + $0x4d8] sm:$0xff] }
 0x650   : > { %v2919_v0 = vld [vmem:[%s8143_s23 + $0x370] sm:$0xff]  ;;  %v2968_v59 = vld [vmem:[%s8143_s23 + $0x4f8] sm:$0xff] }
 0x651   : > { %4573 = vmatmul.mubr.bf16.gmra.mrb[80].mxu0 %v9055_v5  ;;  %4799 = vmatmul.mubr.bf16.gmra.mrb[96].mxu1 %v9055_v5  ;;  %v6348_v55 = vcombine.low %v2915_v3, %v2919_v0 }
 0x652   : > { %4856 = vmatpush1.bf16.msra.mxu0 %v6308_v34  ;;  %5082 = vmatpush1.bf16.msra.mxu1 %v6310_v39  ;;  %v2923_v34 = vld [vmem:[%s8143_s23 + $0x390] sm:$0xff]  ;;  %v6349_v39 = vcombine.high %v2915_v3, %v2919_v0  ;;  %v2948_v0 = vld [vmem:[%s8143_s23 + $0x458] sm:$0xff] }
 0x653   : > { %4582 = vmatprep.mubr.bf16.mxu0 %v9123_v41  ;;  %4808 = vmatprep.mubr.bf16.mxu1 %v9123_v41  ;;  %v2951_v3 = vld [vmem:[%s8143_s23 + $0x470] sm:$0xff] }
 0x654   : > { %4857 = vmatprep.subr.bf16.mxu0 %v6317_v57  ;;  %5083 = vmatprep.subr.bf16.mxu1 %v6319_v13  ;;  %v2927_v57 = vld [vmem:[%s8143_s23 + $0x3b0] sm:$0xff]  ;;  %v2924_v13 = vld [vmem:[%s8143_s23 + $0x398] sm:$0xff] }
 0x655   : > { %v6356_v23 = vcombine.low %v2923_v34, %v2927_v57  ;;  %v6358_v15 = vcombine.low %v2924_v13, %v2928_v54 }
 0x656   : > { %4858 = vmatpush1.bf16.msra.mxu0 %v6316_v27  ;;  %5084 = vmatpush1.bf16.msra.mxu1 %v6318_v22  ;;  %v6357_v27 = vcombine.high %v2923_v34, %v2927_v57  ;;  %v6359_v22 = vcombine.high %v2924_v13, %v2928_v54  ;;  %v2956_v57 = vld [vmem:[%s8143_s23 + $0x498] sm:$0xff] }
 0x657   : > { %4859 = vmatprep.subr.bf16.mxu0 %v6325_v38  ;;  %5085 = vmatprep.subr.bf16.mxu1 %v6327_v19  ;;  %v2931_v38 = vld [vmem:[%s8143_s23 + $0x3d0] sm:$0xff]  ;;  %v2960_v13 = vld [vmem:[%s8143_s23 + $0x4b8] sm:$0xff] }
 0x658   : > { %v2935_v19 = vld [vmem:[%s8143_s23 + $0x3f0] sm:$0xff]  ;;  %v9878_v54 = vld [vmem:[#allocation53_spill] sm:$0xff] }
 0x659   : > { %4583 = vmatmul.mubr.bf16.gmra.mrb[84].mxu0 %v9096_v20  ;;  %4809 = vmatmul.mubr.bf16.gmra.mrb[100].mxu1 %v9096_v20  ;;  %v6364_v45 = vcombine.low %v2931_v38, %v2935_v19 }
 0x65a   : > { %4860 = vmatpush1.bf16.msra.mxu0 %v6324_v1  ;;  %5086 = vmatpush1.bf16.msra.mxu1 %v6326_v60  ;;  %v2939_v1 = vld [vmem:[%s8143_s23 + $0x410] sm:$0xff]  ;;  %v6365_v60 = vcombine.high %v2931_v38, %v2935_v19 }
 0x65b   : > { %4592 = vmatprep.mubr.bf16.mxu0 %v9158_v10  ;;  %4818 = vmatprep.mubr.bf16.mxu1 %v9158_v10  ;;  %v2963_v38 = vld [vmem:[%s8143_s23 + $0x4d0] sm:$0xff] }
 0x65c   : > { %4861 = vmatprep.subr.bf16.mxu0 %v6333_v4  ;;  %5087 = vmatprep.subr.bf16.mxu1 %v6335_v21  ;;  %v2943_v4 = vld [vmem:[%s8143_s23 + $0x430] sm:$0xff]  ;;  %v2940_v21 = vld [vmem:[%s8143_s23 + $0x418] sm:$0xff] }
 0x65d   : > { %v6372_v40 = vcombine.low %v2939_v1, %v2943_v4  ;;  %v2967_v19 = vld [vmem:[%s8143_s23 + $0x4f0] sm:$0xff] }
 0x65e   : > { %4862 = vmatpush1.bf16.msra.mxu0 %v6332_v9  ;;  %5088 = vmatpush1.bf16.msra.mxu1 %v6334_v53  ;;  %v9877_v9 = vld [vmem:[#allocation55_spill] sm:$0xff]  ;;  %v6373_v53 = vcombine.high %v2939_v1, %v2943_v4  ;;  %v2971_v1 = vld [vmem:[%s8143_s23 + $0x510] sm:$0xff]  ;;  %v2972_v4 = vld [vmem:[%s8143_s23 + $0x518] sm:$0xff] }
 0x65f   : > { %4863 = vmatprep.subr.bf16.mxu0 %v6341_v43  ;;  %5089 = vmatprep.subr.bf16.mxu1 %v6343_v51  ;;  %v6375_v43 = vcombine.high %v2940_v21, %v2944_v56  ;;  %v2947_v51 = vld [vmem:[%s8143_s23 + $0x450] sm:$0xff] }
 0x660   : > { %v6381_v34 = vcombine.high %v2947_v51, %v2951_v3 }
 0x661   : > { %4593 = vmatmul.mubr.bf16.gmra.mrb[88].mxu0 %v9136_v26  ;;  %4819 = vmatmul.mubr.bf16.gmra.mrb[104].mxu1 %v9136_v26 }
 0x662   : > { %4864 = vmatpush1.bf16.msra.mxu0 %v6340_v50  ;;  %5090 = vmatpush1.bf16.msra.mxu1 %v6342_v63  ;;  %v6374_v50 = vcombine.low %v2940_v21, %v2944_v56  ;;  %v2955_v63 = vld [vmem:[%s8143_s23 + $0x490] sm:$0xff]  ;;  %v2976_v21 = vld [vmem:[%s8143_s23 + $0x538] sm:$0xff]  ;;  %v6396_v56 = vcombine.low %v2963_v38, %v2967_v19 }
 0x663   : > { %4602 = vmatprep.mubr.bf16.mxu0 %v9186_v44  ;;  %4828 = vmatprep.mubr.bf16.mxu1 %v9186_v44 }
 0x664   : > { %4865 = vmatprep.subr.bf16.mxu0 %v6349_v39  ;;  %5091 = vmatprep.subr.bf16.mxu1 %v6351_v30  ;;  %v6383_v39 = vcombine.high %v2948_v0, %v2952_v17  ;;  %v2959_v30 = vld [vmem:[%s8143_s23 + $0x4b0] sm:$0xff] }
 0x666   : > { %4866 = vmatpush1.bf16.msra.mxu0 %v6348_v55  ;;  %5092 = vmatpush1.bf16.msra.mxu1 %v6350_v25  ;;  %v6380_v55 = vcombine.low %v2947_v51, %v2951_v3  ;;  %v6382_v25 = vcombine.low %v2948_v0, %v2952_v17  ;;  %v2980_v51 = vld [vmem:[%s8143_s23 + $0x558] sm:$0xff]  ;;  %v6406_v0 = vcombine.low %v2972_v4, %v2976_v21  ;;  %v2987_v17 = vld [vmem:[%s8143_s23 + $0x590] sm:$0xff] }
 0x667   : > { %4867 = vmatprep.subr.bf16.mxu0 %v6357_v27  ;;  %5093 = vmatprep.subr.bf16.mxu1 %v6359_v22  ;;  %v6389_v27 = vcombine.high %v2955_v63, %v2959_v30  ;;  %v6391_v22 = vcombine.high %v2956_v57, %v2960_v13 }
 0x669   : > { %4603 = vmatmul.mubr.bf16.gmra.mrb[92].mxu0 %v9174_v18  ;;  %4829 = vmatmul.mubr.bf16.gmra.mrb[108].mxu1 %v9174_v18 }
 0x66a   : > { %4868 = vmatpush1.bf16.msra.mxu0 %v6356_v23  ;;  %5094 = vmatpush1.bf16.msra.mxu1 %v6358_v15  ;;  %v6388_v23 = vcombine.low %v2955_v63, %v2959_v30  ;;  %v6390_v15 = vcombine.low %v2956_v57, %v2960_v13  ;;  %v2988_v63 = vld [vmem:[%s8143_s23 + $0x598] sm:$0xff] }
 0x66b   : > { %4871 = vmatprep.mubr.bf16.mxu0 %v9877_v9  ;;  %5097 = vmatprep.mubr.bf16.mxu1 %v9877_v9  ;;  %v6407_v9 = vcombine.high %v2972_v4, %v2976_v21  ;;  %v3015_v4 = vld [vmem:[%s8143_s23 + $0x670] sm:$0xff]  ;;  %v3012_v21 = vld [vmem:[%s8143_s23 + $0x658] sm:$0xff] }
 0x66c   : > { %4869 = vmatprep.subr.bf16.mxu0 %v6365_v60  ;;  %5095 = vmatprep.subr.bf16.mxu1 %v6367_v2  ;;  %v6397_v60 = vcombine.high %v2963_v38, %v2967_v19  ;;  %v2975_v2 = vld [vmem:[%s8143_s23 + $0x530] sm:$0xff] }
 0x66d   : > { %v6404_v3 = vcombine.low %v2971_v1, %v2975_v2  ;;  %v3003_v38 = vld [vmem:[%s8143_s23 + $0x610] sm:$0xff] }
 0x66e   : > { %4870 = vmatpush1.bf16.msra.mxu0 %v6364_v45  ;;  %5096 = vmatpush1.bf16.msra.mxu1 %v6366_v31  ;;  %v6398_v45 = vcombine.low %v2964_v29, %v2968_v59  ;;  %v6405_v31 = vcombine.high %v2971_v1, %v2975_v2  ;;  %v3011_v2 = vld [vmem:[%s8143_s23 + $0x650] sm:$0xff] }
 0x66f   : > { %4952 = vmatprep.subr.bf16.mxu0 %v6373_v53  ;;  %5178 = vmatprep.subr.bf16.mxu1 %v6375_v43  ;;  %v2979_v53 = vld [vmem:[%s8143_s23 + $0x550] sm:$0xff] }
 0x670   : > { %v2983_v43 = vld [vmem:[%s8143_s23 + $0x570] sm:$0xff] }
 0x671   : > { %4872 = vmatmul.mubr.bf16.vlgmr.msra.gmra.mrb[96].mxu0 %v9878_v54  ;;  %5098 = vmatmul.mubr.bf16.vlgmr.msra.gmra.mrb[112].mxu1 %v9878_v54  ;;  %v2995_v54 = vld [vmem:[%s8143_s23 + $0x5d0] sm:$0xff] }
 0x672   : > { %4953 = vmatpush1.bf16.msra.mxu0 %v6372_v40  ;;  %5179 = vmatpush1.bf16.msra.mxu1 %v6374_v50  ;;  %v6413_v40 = vcombine.high %v2979_v53, %v2983_v43  ;;  %v2991_v50 = vld [vmem:[%s8143_s23 + $0x5b0] sm:$0xff] }
 0x673   : > { %4881 = vmatprep.mubr.bf16.mxu0 %v8899_v48  ;;  %5107 = vmatprep.mubr.bf16.mxu1 %v8899_v48  ;;  %v6399_v48 = vcombine.high %v2964_v29, %v2968_v59  ;;  %v6421_v57 = vcombine.high %v2987_v17, %v2991_v50  ;;  %v3007_v29 = vld [vmem:[%s8143_s23 + $0x630] sm:$0xff]  ;;  %v3004_v59 = vld [vmem:[%s8143_s23 + $0x618] sm:$0xff] }
 0x674   : > { %4954 = vmatprep.subr.bf16.mxu0 %v6381_v34  ;;  %5180 = vmatprep.subr.bf16.mxu1 %v6383_v39  ;;  %v2992_v34 = vld [vmem:[%s8143_s23 + $0x5b8] sm:$0xff]  ;;  %v6412_v39 = vcombine.low %v2979_v53, %v2983_v43  ;;  %v3023_v53 = vld [vmem:[%s8143_s23 + $0x6b0] sm:$0xff] }
 0x675   : > { %v6423_v13 = vcombine.high %v2988_v63, %v2992_v34  ;;  %v3020_v43 = vld [vmem:[%s8143_s23 + $0x698] sm:$0xff] }
 0x676   : > { %4955 = vmatpush1.bf16.msra.mxu0 %v6380_v55  ;;  %5181 = vmatpush1.bf16.msra.mxu1 %v6382_v25  ;;  %v2999_v55 = vld [vmem:[%s8143_s23 + $0x5f0] sm:$0xff]  ;;  %v2996_v25 = vld [vmem:[%s8143_s23 + $0x5d8] sm:$0xff] }
 0x677   : > { %4956 = vmatprep.subr.bf16.mxu0 %v6389_v27  ;;  %5182 = vmatprep.subr.bf16.mxu1 %v6391_v22  ;;  %v6420_v27 = vcombine.low %v2987_v17, %v2991_v50  ;;  %v6422_v22 = vcombine.low %v2988_v63, %v2992_v34  ;;  %v6429_v19 = vcombine.high %v2995_v54, %v2999_v55  ;;  %v3031_v50 = vld [vmem:[%s8143_s23 + $0x6f0] sm:$0xff]  ;;  %v3028_v63 = vld [vmem:[%s8143_s23 + $0x6d8] sm:$0xff] }
 0x678   : > { %v3032_v34 = vld [vmem:[%s8143_s23 + $0x6f8] sm:$0xff] }
 0x679   : > { %4882 = vmatmul.mubr.bf16.gmra.mrb[100].mxu0 %v8889_v11  ;;  %5108 = vmatmul.mubr.bf16.gmra.mrb[116].mxu1 %v8889_v11  ;;  %v2984_v11 = vld [vmem:[%s8143_s23 + $0x578] sm:$0xff] }
 0x67a   : > { %4957 = vmatpush1.bf16.msra.mxu0 %v6388_v23  ;;  %5183 = vmatpush1.bf16.msra.mxu1 %v6390_v15  ;;  %v6414_v30 = vcombine.low %v2980_v51, %v2984_v11  ;;  %v3008_v23 = vld [vmem:[%s8143_s23 + $0x638] sm:$0xff]  ;;  %v6428_v15 = vcombine.low %v2995_v54, %v2999_v55  ;;  %v3039_v54 = vld [vmem:[%s8143_s23 + $0x730] sm:$0xff] }
 0x67b   : > { %4891 = vmatprep.mubr.bf16.mxu0 %v8953_v46  ;;  %5117 = vmatprep.mubr.bf16.mxu1 %v8953_v46  ;;  %v6415_v46 = vcombine.high %v2980_v51, %v2984_v11  ;;  %v3024_v51 = vld [vmem:[%s8143_s23 + $0x6b8] sm:$0xff] }
 0x67c   : > { %4958 = vmatprep.subr.bf16.mxu0 %v6397_v60  ;;  %5184 = vmatprep.subr.bf16.mxu1 %v6399_v48  ;;  %v6437_v60 = vcombine.high %v3003_v38, %v3007_v29  ;;  %v6439_v48 = vcombine.high %v3004_v59, %v3008_v23  ;;  %v9879_v11 = vld [vmem:[#allocation57_spill] sm:$0xff] }
 0x67d   : > { %v3036_v55 = vld [vmem:[%s8143_s23 + $0x718] sm:$0xff] }
 0x67e   : > { %4959 = vmatpush1.bf16.msra.mxu0 %v6396_v56  ;;  %5185 = vmatpush1.bf16.msra.mxu1 %v6398_v45  ;;  %v6436_v56 = vcombine.low %v3003_v38, %v3007_v29  ;;  %v6438_v45 = vcombine.low %v3004_v59, %v3008_v23  ;;  %v3044_v29 = vld [vmem:[%s8143_s23 + $0x758] sm:$0xff] }
 0x67f   : > { %4960 = vmatprep.subr.bf16.mxu0 %v6405_v31  ;;  %5186 = vmatprep.subr.bf16.mxu1 %v6407_v9  ;;  %v3019_v31 = vld [vmem:[%s8143_s23 + $0x690] sm:$0xff]  ;;  %v6445_v9 = vcombine.high %v3011_v2, %v3015_v4 }
 0x680   : > { %v6453_v17 = vcombine.high %v3019_v31, %v3023_v53 }
 0x681   : > { %4892 = vmatmul.mubr.bf16.gmra.mrb[104].mxu0 %v8943_v42  ;;  %5118 = vmatmul.mubr.bf16.gmra.mrb[120].mxu1 %v8943_v42  ;;  %v3000_v42 = vld [vmem:[%s8143_s23 + $0x5f8] sm:$0xff] }
 0x682   : > { %4961 = vmatpush1.bf16.msra.mxu0 %v6404_v3  ;;  %5187 = vmatpush1.bf16.msra.mxu1 %v6406_v0  ;;  %v6430_v1 = vcombine.low %v2996_v25, %v3000_v42  ;;  %v6444_v3 = vcombine.low %v3011_v2, %v3015_v4  ;;  %v3056_v2 = vld [vmem:[%s8143_s23 + $0x7b8] sm:$0xff] }
 0x683   : > { %4901 = vmatprep.mubr.bf16.mxu0 %v9001_v37  ;;  %5127 = vmatprep.mubr.bf16.mxu1 %v9001_v37  ;;  %v6431_v37 = vcombine.high %v2996_v25, %v3000_v42  ;;  %v3040_v25 = vld [vmem:[%s8143_s23 + $0x738] sm:$0xff] }
 0x684   : > { %4962 = vmatprep.subr.bf16.mxu0 %v6413_v40  ;;  %5188 = vmatprep.subr.bf16.mxu1 %v6415_v46  ;;  %v6455_v40 = vcombine.high %v3020_v43, %v3024_v51  ;;  %v3027_v46 = vld [vmem:[%s8143_s23 + $0x6d0] sm:$0xff]  ;;  %v6471_v38 = vcombine.high %v3036_v55, %v3040_v25  ;;  %v6470_v23 = vcombine.low %v3036_v55, %v3040_v25 }
 0x685   : > { %v6460_v42 = vcombine.low %v3027_v46, %v3031_v50 }
 0x686   : > { %4963 = vmatpush1.bf16.msra.mxu0 %v6412_v39  ;;  %5189 = vmatpush1.bf16.msra.mxu1 %v6414_v30  ;;  %v6452_v39 = vcombine.low %v3019_v31, %v3023_v53  ;;  %v6454_v30 = vcombine.low %v3020_v43, %v3024_v51  ;;  %v3063_v31 = vld [vmem:[%s8143_s23 + $0x7f0] sm:$0xff] }
 0x687   : > { %4964 = vmatprep.subr.bf16.mxu0 %v6421_v57  ;;  %5190 = vmatprep.subr.bf16.mxu1 %v6423_v13  ;;  %v3035_v57 = vld [vmem:[%s8143_s23 + $0x710] sm:$0xff]  ;;  %v6461_v13 = vcombine.high %v3027_v46, %v3031_v50 }
 0x688   : > { %v6468_v59 = vcombine.low %v3035_v57, %v3039_v54 }
 0x689   : > { %4902 = vmatmul.mubr.bf16.gmra.mrb[108].mxu0 %v8997_v7  ;;  %5128 = vmatmul.mubr.bf16.gmra.mrb[124].mxu1 %v8997_v7  ;;  %v3016_v7 = vld [vmem:[%s8143_s23 + $0x678] sm:$0xff] }
 0x68a   : > { %4965 = vmatpush1.bf16.msra.mxu0 %v6420_v27  ;;  %5191 = vmatpush1.bf16.msra.mxu1 %v6422_v22  ;;  %v6446_v0 = vcombine.low %v3012_v21, %v3016_v7  ;;  %v6462_v27 = vcombine.low %v3028_v63, %v3032_v34  ;;  %v6469_v22 = vcombine.high %v3035_v57, %v3039_v54 }
 0x68b   : > { %4911 = vmatprep.mubr.bf16.mxu0 %v9060_v49  ;;  %5137 = vmatprep.mubr.bf16.mxu1 %v9060_v49  ;;  %v6447_v49 = vcombine.high %v3012_v21, %v3016_v7 }
 0x68c   : > { %4966 = vmatprep.subr.bf16.mxu0 %v6429_v19  ;;  %5192 = vmatprep.subr.bf16.mxu1 %v6431_v37  ;;  %v3043_v19 = vld [vmem:[%s8143_s23 + $0x750] sm:$0xff] }
 0x68d   : > { %v3047_v37 = vld [vmem:[%s8143_s23 + $0x770] sm:$0xff] }
 0x68e   : > { %4967 = vmatpush1.bf16.msra.mxu0 %v6428_v15  ;;  %5193 = vmatpush1.bf16.msra.mxu1 %v6430_v1  ;;  %v3051_v15 = vld [vmem:[%s8143_s23 + $0x790] sm:$0xff]  ;;  %v6477_v1 = vcombine.high %v3043_v19, %v3047_v37  ;;  %v6476_v4 = vcombine.low %v3043_v19, %v3047_v37 }
 0x68f   : > { %4968 = vmatprep.subr.bf16.mxu0 %v6437_v60  ;;  %5194 = vmatprep.subr.bf16.mxu1 %v6439_v48  ;;  %v3055_v60 = vld [vmem:[%s8143_s23 + $0x7b0] sm:$0xff]  ;;  %v3052_v48 = vld [vmem:[%s8143_s23 + $0x798] sm:$0xff] }
 0x690   : > { %v6485_v7 = vcombine.high %v3051_v15, %v3055_v60  ;;  %v6484_v53 = vcombine.low %v3051_v15, %v3055_v60 }
 0x691   : > { %4912 = vmatmul.mubr.bf16.gmra.mrb[112].mxu0 %v9879_v11  ;;  %5138 = vmatmul.mubr.bf16.gmra.mrb[128].mxu1 %v9879_v11 }
 0x692   : > { %4969 = vmatpush1.bf16.msra.mxu0 %v6436_v56  ;;  %5195 = vmatpush1.bf16.msra.mxu1 %v6438_v45  ;;  %v6487_v56 = vcombine.high %v3052_v48, %v3056_v2  ;;  %v3059_v45 = vld [vmem:[%s8143_s23 + $0x7d0] sm:$0xff] }
 0x693   : > { %4921 = vmatprep.mubr.bf16.mxu0 %v9118_v28  ;;  %5147 = vmatprep.mubr.bf16.mxu1 %v9118_v28  ;;  %v6463_v28 = vcombine.high %v3028_v63, %v3032_v34  ;;  %v6493_v43 = vcombine.high %v3059_v45, %v3063_v31 }
 0x694   : > { %4970 = vmatprep.subr.bf16.mxu0 %v6445_v9  ;;  %5196 = vmatprep.subr.bf16.mxu1 %v6447_v49  ;;  %v3060_v9 = vld [vmem:[%s8143_s23 + $0x7d8] sm:$0xff] }
 0x695   : > { %v3064_v49 = vld [vmem:[%s8143_s23 + $0x7f8] sm:$0xff] }
 0x696   : > { %4971 = vmatpush1.bf16.msra.mxu0 %v6444_v3  ;;  %5197 = vmatpush1.bf16.msra.mxu1 %v6446_v0  ;;  %v6495_v51 = vcombine.high %v3060_v9, %v3064_v49  ;;  %v6494_v11 = vcombine.low %v3060_v9, %v3064_v49 }
 0x697   : > { %4972 = vmatprep.subr.bf16.mxu0 %v6453_v17  ;;  %5198 = vmatprep.subr.bf16.mxu1 %v6455_v40 }
 0x699   : > { %4922 = vmatmul.mubr.bf16.gmra.mrb[116].mxu0 %v9094_v24  ;;  %5148 = vmatmul.mubr.bf16.gmra.mrb[132].mxu1 %v9094_v24  ;;  %v3048_v24 = vld [vmem:[%s8143_s23 + $0x778] sm:$0xff] }
 0x69a   : > { %4973 = vmatpush1.bf16.msra.mxu0 %v6452_v39  ;;  %5199 = vmatpush1.bf16.msra.mxu1 %v6454_v30  ;;  %v6478_v21 = vcombine.low %v3044_v29, %v3048_v24 }
 0x69b   : > { %4931 = vmatprep.mubr.bf16.mxu0 %v9156_v62  ;;  %5157 = vmatprep.mubr.bf16.mxu1 %v9156_v62  ;;  %v6479_v62 = vcombine.high %v3044_v29, %v3048_v24 }
 0x69c   : > { %4974 = vmatprep.subr.bf16.mxu0 %v6461_v13  ;;  %5200 = vmatprep.subr.bf16.mxu1 %v6463_v28 }
 0x69e   : > { %4975 = vmatpush1.bf16.msra.mxu0 %v6460_v42  ;;  %5201 = vmatpush1.bf16.msra.mxu1 %v6462_v27 }
 0x69f   : > { %4976 = vmatprep.subr.bf16.mxu0 %v6469_v22  ;;  %5202 = vmatprep.subr.bf16.mxu1 %v6471_v38 }
 0x6a1   : > { %4932 = vmatmul.mubr.bf16.gmra.mrb[120].mxu0 %v9134_v33  ;;  %5158 = vmatmul.mubr.bf16.gmra.mrb[136].mxu1 %v9134_v33  ;;  %v6486_v33 = vcombine.low %v3052_v48, %v3056_v2 }
 0x6a2   : > { %4977 = vmatpush1.bf16.msra.mxu0 %v6468_v59  ;;  %5203 = vmatpush1.bf16.msra.mxu1 %v6470_v23 }
 0x6a3   : > { %4941 = vmatprep.mubr.bf16.mxu0 %v9184_v61  ;;  %5167 = vmatprep.mubr.bf16.mxu1 %v9184_v61  ;;  %v6492_v61 = vcombine.low %v3059_v45, %v3063_v31 }
 0x6a4   : > { %4978 = vmatprep.subr.bf16.mxu0 %v6477_v1  ;;  %5204 = vmatprep.subr.bf16.mxu1 %v6479_v62 }
 0x6a6   : > { %4979 = vmatpush1.bf16.msra.mxu0 %v6476_v4  ;;  %5205 = vmatpush1.bf16.msra.mxu1 %v6478_v21 }
 0x6a7   : > { %4980 = vmatprep.subr.bf16.mxu0 %v6485_v7  ;;  %5206 = vmatprep.subr.bf16.mxu1 %v6487_v56 }
 0x6a9   : > { %4942 = vmatmul.mubr.bf16.gmra.mrb[124].mxu0 %v9172_v36  ;;  %5168 = vmatmul.mubr.bf16.gmra.mrb[140].mxu1 %v9172_v36 }
 0x6aa   : > { %4981 = vmatpush1.bf16.msra.mxu0 %v6484_v53  ;;  %5207 = vmatpush1.bf16.msra.mxu1 %v6486_v33 }
 0x6ab   : > { %4984 = vmatprep.mubr.bf16.mxu0 %v9874_v16  ;;  %5210 = vmatprep.mubr.bf16.mxu1 %v9874_v16 }
 0x6ac   : > { %4982 = vmatprep.subr.bf16.mxu0 %v6493_v43  ;;  %5208 = vmatprep.subr.bf16.mxu1 %v6495_v51 }
 0x6ae   : > { %4983 = vmatpush1.bf16.msra.mxu0 %v6492_v61  ;;  %5209 = vmatpush1.bf16.msra.mxu1 %v6494_v11 }
 0x6b1   : > { %4985 = vmatmul.mubr.bf16.vlgmr.msra.gmra.mrb[96].mxu0 %v9875_v35  ;;  %5211 = vmatmul.mubr.bf16.vlgmr.msra.gmra.mrb[112].mxu1 %v9875_v35 }
 0x6b2   : > { %4994 = vmatprep.mubr.bf16.mxu0 %v8901_v58  ;;  %5220 = vmatprep.mubr.bf16.mxu1 %v8901_v58  ;;  %v9448_v58 = vld [vmem:[%s8146_s20] sm:$0xff] }
 0x6b9   : > { %4995 = vmatmul.mubr.bf16.gmra.mrb[100].mxu0 %v8891_v14  ;;  %5221 = vmatmul.mubr.bf16.gmra.mrb[116].mxu1 %v8891_v14  ;;  %v9880_v14 = vld [vmem:[#allocation34_spill] sm:$0xff] }
 0x6ba   : > { %5004 = vmatprep.mubr.bf16.mxu0 %v8955_v32  ;;  %5230 = vmatprep.mubr.bf16.mxu1 %v8955_v32  ;;  %v9881_v32 = vld [vmem:[#allocation32_spill] sm:$0xff] }
 0x6c1   : > { %5005 = vmatmul.mubr.bf16.gmra.mrb[104].mxu0 %v8945_v6  ;;  %5231 = vmatmul.mubr.bf16.gmra.mrb[120].mxu1 %v8945_v6  ;;  %v9452_v6 = vrot.slane %v9448_v58, %v9880_v14 }
 0x6c2   : > { %5014 = vmatprep.mubr.bf16.mxu0 %v9003_v52  ;;  %5240 = vmatprep.mubr.bf16.mxu1 %v9003_v52 }
 0x6c9   : > { %5015 = vmatmul.mubr.bf16.gmra.mrb[108].mxu0 %v8999_v8  ;;  %5241 = vmatmul.mubr.bf16.gmra.mrb[124].mxu1 %v8999_v8  ;;  %v9882_v8 = vsub.s32 2, %v9881_v32 }
 0x6ca   : > { %5024 = vmatprep.mubr.bf16.mxu0 %v9062_v47  ;;  %5250 = vmatprep.mubr.bf16.mxu1 %v9062_v47 }
 0x6cb   : > { %v9457_v52 = vrot.slane %v9448_v58, %v9882_v8 }
 0x6d1   : > { %5025 = vmatmul.mubr.bf16.gmra.mrb[112].mxu0 %v9055_v5  ;;  %5251 = vmatmul.mubr.bf16.gmra.mrb[128].mxu1 %v9055_v5  ;;  %v9883_v5 = vld [vmem:[#allocation35_spill] sm:$0xff] }
 0x6d2   : > { %5034 = vmatprep.mubr.bf16.mxu0 %v9123_v41  ;;  %5260 = vmatprep.mubr.bf16.mxu1 %v9123_v41  ;;  %v9461_v47 = vrot.slane %v9448_v58, %v9883_v5 }
 0x6d9   : > { %5035 = vmatmul.mubr.bf16.gmra.mrb[116].mxu0 %v9096_v20  ;;  %5261 = vmatmul.mubr.bf16.gmra.mrb[132].mxu1 %v9096_v20  ;;  %v9884_v20 = vsub.s32 3, %v9881_v32 }
 0x6da   : > { %5044 = vmatprep.mubr.bf16.mxu0 %v9158_v10  ;;  %5270 = vmatprep.mubr.bf16.mxu1 %v9158_v10 }
 0x6db   : > { %v9466_v41 = vrot.slane %v9448_v58, %v9884_v20 }
 0x6e1   : > { %5045 = vmatmul.mubr.bf16.gmra.mrb[120].mxu0 %v9136_v26  ;;  %5271 = vmatmul.mubr.bf16.gmra.mrb[136].mxu1 %v9136_v26 }
 0x6e2   : > { %5054 = vmatprep.mubr.bf16.mxu0 %v9186_v44  ;;  %5280 = vmatprep.mubr.bf16.mxu1 %v9186_v44 }
 0x6e9   : > { %5055 = vmatmul.mubr.bf16.gmra.mrb[124].mxu0 %v9174_v18  ;;  %5281 = vmatmul.mubr.bf16.gmra.mrb[140].mxu1 %v9174_v18 }
 0x704   : > { %v4534_v26 = vpop.f32.mrb[64].mxu0  ;;  %v4760_v10 = vpop.f32.mrb[80].mxu1 }
 0x705   : > { %v6607_v36 = vadd.f32 %v4534_v26, %v9452_v6  ;;  %v6639_v18 = vadd.f32 %v4760_v10, %v9457_v52  ;;  %v4536_v44 = vpop.f32.mrb[65].mxu0  ;;  %v4762_v16 = vpop.f32.mrb[81].mxu1 }
 0x706   : > { %v6608_v35 = vadd.f32 %v4536_v44, %v9461_v47  ;;  %v6640_v3 = vadd.f32 %v4762_v16, %v9466_v41  ;;  %v4538_v0 = vpop.f32.mrb[66].mxu0  ;;  %v4764_v17 = vpop.f32.mrb[82].mxu1 }
 0x707   : > { %v6609_v40 = vadd.f32 %v4538_v0, %v9452_v6  ;;  %v6641_v46 = vadd.f32 %v4764_v17, %v9457_v52  ;;  %v4540_v50 = vpop.f32.mrb[67].mxu0  ;;  %v4766_v63 = vpop.f32.mrb[83].mxu1  ;;  %v5291_v30 = vmax.f32 %v6607_v36, 0.0  ;;  %v5293_v57 = vmax.f32 %v6639_v18, 0.0 }
 0x708   : > { %v6610_v34 = vadd.f32 %v4540_v50, %v9461_v47  ;;  %v6642_v39 = vadd.f32 %v4766_v63, %v9466_v41  ;;  %v5292_v54 = vmax.f32 %v6608_v35, 0.0  ;;  %v5294_v55 = vmax.f32 %v6640_v3, 0.0 }
 0x709   : > { %v5299_v13 = vmax.f32 %v6609_v40, 0.0  ;;  %v5301_v28 = vmax.f32 %v6641_v46, 0.0 }
 0x70a   : > { %v5300_v25 = vmax.f32 %v6610_v34, 0.0  ;;  %v5302_v42 = vmax.f32 %v6642_v39, 0.0 }
 0x70b   : > { %v5419_v27 = vmax.f32 %v5291_v30, %v5299_v13  ;;  %v5445_v22 = vmax.f32 %v5293_v57, %v5301_v28 }
 0x70c   : > { %v5432_v38 = vmax.f32 %v5292_v54, %v5300_v25  ;;  %v5458_v19 = vmax.f32 %v5294_v55, %v5302_v42  ;;  %v4544_v37 = vpop.f32.mrb[68].mxu0  ;;  %v4770_v29 = vpop.f32.mrb[84].mxu1 }
 0x70d   : > { %v6611_v24 = vadd.f32 %v4544_v37, %v9452_v6  ;;  %v6643_v59 = vadd.f32 %v4770_v29, %v9457_v52  ;;  %v4546_v23 = vpop.f32.mrb[69].mxu0  ;;  %v4772_v15 = vpop.f32.mrb[85].mxu1 }
 0x70e   : > { %v6612_v1 = vadd.f32 %v4546_v23, %v9461_v47  ;;  %v6644_v62 = vadd.f32 %v4772_v15, %v9466_v41  ;;  %v4548_v60 = vpop.f32.mrb[70].mxu0  ;;  %v4774_v48 = vpop.f32.mrb[86].mxu1 }
 0x70f   : > { %v5307_v2 = vmax.f32 %v6611_v24, 0.0  ;;  %v5309_v4 = vmax.f32 %v6643_v59, 0.0  ;;  %v6613_v21 = vadd.f32 %v4548_v60, %v9452_v6  ;;  %v6645_v7 = vadd.f32 %v4774_v48, %v9457_v52  ;;  %v4550_v56 = vpop.f32.mrb[71].mxu0  ;;  %v4776_v45 = vpop.f32.mrb[87].mxu1 }
 0x710   : > { %v5308_v31 = vmax.f32 %v6612_v1, 0.0  ;;  %v5310_v9 = vmax.f32 %v6644_v62, 0.0  ;;  %v6614_v49 = vadd.f32 %v4550_v56, %v9461_v47  ;;  %v6646_v53 = vadd.f32 %v4776_v45, %v9466_v41 }
 0x711   : > { %v5420_v33 = vmax.f32 %v5419_v27, %v5307_v2  ;;  %v5446_v43 = vmax.f32 %v5445_v22, %v5309_v4  ;;  %v5315_v51 = vmax.f32 %v6613_v21, 0.0  ;;  %v5317_v61 = vmax.f32 %v6645_v7, 0.0 }
 0x712   : > { %v5433_v11 = vmax.f32 %v5432_v38, %v5308_v31  ;;  %v5459_v14 = vmax.f32 %v5458_v19, %v5310_v9  ;;  %v5316_v8 = vmax.f32 %v6614_v49, 0.0  ;;  %v5318_v5 = vmax.f32 %v6646_v53, 0.0 }
 0x713   : > { %v5421_v20 = vmax.f32 %v5420_v33, %v5315_v51  ;;  %v5447_v26 = vmax.f32 %v5446_v43, %v5317_v61 }
 0x714   : > { %v5434_v10 = vmax.f32 %v5433_v11, %v5316_v8  ;;  %v5460_v36 = vmax.f32 %v5459_v14, %v5318_v5  ;;  %v4554_v18 = vpop.f32.mrb[72].mxu0  ;;  %v4780_v44 = vpop.f32.mrb[88].mxu1 }
 0x715   : > { %v6615_v16 = vadd.f32 %v4554_v18, %v9452_v6  ;;  %v6647_v35 = vadd.f32 %v4780_v44, %v9457_v52  ;;  %v4556_v3 = vpop.f32.mrb[73].mxu0  ;;  %v4782_v0 = vpop.f32.mrb[89].mxu1 }
 0x716   : > { %v6616_v17 = vadd.f32 %v4556_v3, %v9461_v47  ;;  %v6648_v40 = vadd.f32 %v4782_v0, %v9466_v41  ;;  %v4558_v46 = vpop.f32.mrb[74].mxu0  ;;  %v4784_v50 = vpop.f32.mrb[90].mxu1 }
 0x717   : > { %v5323_v63 = vmax.f32 %v6615_v16, 0.0  ;;  %v5325_v34 = vmax.f32 %v6647_v35, 0.0  ;;  %v6617_v39 = vadd.f32 %v4558_v46, %v9452_v6  ;;  %v6649_v30 = vadd.f32 %v4784_v50, %v9457_v52  ;;  %v4560_v57 = vpop.f32.mrb[75].mxu0  ;;  %v4786_v13 = vpop.f32.mrb[91].mxu1 }
 0x718   : > { %v5324_v28 = vmax.f32 %v6616_v17, 0.0  ;;  %v5326_v54 = vmax.f32 %v6648_v40, 0.0  ;;  %v6618_v55 = vadd.f32 %v4560_v57, %v9461_v47  ;;  %v6650_v25 = vadd.f32 %v4786_v13, %v9466_v41 }
 0x719   : > { %v5422_v42 = vmax.f32 %v5421_v20, %v5323_v63  ;;  %v5448_v27 = vmax.f32 %v5447_v26, %v5325_v34  ;;  %v5331_v22 = vmax.f32 %v6617_v39, 0.0  ;;  %v5333_v38 = vmax.f32 %v6649_v30, 0.0 }
 0x71a   : > { %v5435_v19 = vmax.f32 %v5434_v10, %v5324_v28  ;;  %v5461_v37 = vmax.f32 %v5460_v36, %v5326_v54  ;;  %v5332_v29 = vmax.f32 %v6618_v55, 0.0  ;;  %v5334_v24 = vmax.f32 %v6650_v25, 0.0 }
 0x71b   : > { %v5423_v59 = vmax.f32 %v5422_v42, %v5331_v22  ;;  %v5449_v23 = vmax.f32 %v5448_v27, %v5333_v38 }
 0x71c   : > { %v5436_v15 = vmax.f32 %v5435_v19, %v5332_v29  ;;  %v5462_v1 = vmax.f32 %v5461_v37, %v5334_v24  ;;  %v4564_v62 = vpop.f32.mrb[76].mxu0  ;;  %v4790_v60 = vpop.f32.mrb[92].mxu1 }
 0x71d   : > { %v6619_v48 = vadd.f32 %v4564_v62, %v9452_v6  ;;  %v6651_v2 = vadd.f32 %v4790_v60, %v9457_v52  ;;  %v4566_v4 = vpop.f32.mrb[77].mxu0  ;;  %v4792_v21 = vpop.f32.mrb[93].mxu1 }
 0x71e   : > { %v6620_v7 = vadd.f32 %v4566_v4, %v9461_v47  ;;  %v6652_v56 = vadd.f32 %v4792_v21, %v9466_v41  ;;  %v4568_v45 = vpop.f32.mrb[78].mxu0  ;;  %v4794_v31 = vpop.f32.mrb[94].mxu1 }
 0x71f   : > { %v5339_v9 = vmax.f32 %v6619_v48, 0.0  ;;  %v5341_v49 = vmax.f32 %v6651_v2, 0.0  ;;  %v6621_v53 = vadd.f32 %v4568_v45, %v9452_v6  ;;  %v6653_v33 = vadd.f32 %v4794_v31, %v9457_v52  ;;  %v4570_v43 = vpop.f32.mrb[79].mxu0  ;;  %v4796_v51 = vpop.f32.mrb[95].mxu1 }
 0x720   : > { %v5340_v61 = vmax.f32 %v6620_v7, 0.0  ;;  %v5342_v11 = vmax.f32 %v6652_v56, 0.0  ;;  %v6622_v14 = vadd.f32 %v4570_v43, %v9461_v47  ;;  %v6654_v8 = vadd.f32 %v4796_v51, %v9466_v41 }
 0x721   : > { %v5424_v5 = vmax.f32 %v5423_v59, %v5339_v9  ;;  %v5450_v20 = vmax.f32 %v5449_v23, %v5341_v49  ;;  %v5347_v26 = vmax.f32 %v6621_v53, 0.0  ;;  %v5349_v10 = vmax.f32 %v6653_v33, 0.0 }
 0x722   : > { %v5437_v36 = vmax.f32 %v5436_v15, %v5340_v61  ;;  %v5463_v18 = vmax.f32 %v5462_v1, %v5342_v11  ;;  %v5348_v44 = vmax.f32 %v6622_v14, 0.0  ;;  %v5350_v16 = vmax.f32 %v6654_v8, 0.0 }
 0x723   : > { %v5425_v35 = vmax.f32 %v5424_v5, %v5347_v26  ;;  %v5451_v3 = vmax.f32 %v5450_v20, %v5349_v10 }
 0x724   : > { %v5438_v0 = vmax.f32 %v5437_v36, %v5348_v44  ;;  %v5464_v17 = vmax.f32 %v5463_v18, %v5350_v16  ;;  %v4574_v40 = vpop.f32.mrb[80].mxu0  ;;  %v4800_v46 = vpop.f32.mrb[96].mxu1 }
 0x725   : > { %v5426_v50 = vrot.slane %v5425_v35, 4  ;;  %v5452_v63 = vrot.slane %v5451_v3, 4  ;;  %v6623_v34 = vadd.f32 %v4574_v40, %v9452_v6  ;;  %v6655_v39 = vadd.f32 %v4800_v46, %v9457_v52  ;;  %v4576_v30 = vpop.f32.mrb[81].mxu0  ;;  %v4802_v57 = vpop.f32.mrb[97].mxu1 }
 0x726   : > { %v5439_v13 = vrot.slane %v5438_v0, 4  ;;  %v5465_v28 = vrot.slane %v5464_v17, 4  ;;  %v6624_v54 = vadd.f32 %v4576_v30, %v9461_v47  ;;  %v6656_v55 = vadd.f32 %v4802_v57, %v9466_v41  ;;  %v4578_v25 = vpop.f32.mrb[82].mxu0  ;;  %v4804_v42 = vpop.f32.mrb[98].mxu1 }
 0x727   : > { %v5427_v27 = vmax.f32 %v5425_v35, %v5426_v50  ;;  %v5453_v22 = vmax.f32 %v5451_v3, %v5452_v63  ;;  %v5355_v38 = vmax.f32 %v6623_v34, 0.0  ;;  %v5357_v19 = vmax.f32 %v6655_v39, 0.0  ;;  %v4580_v37 = vpop.f32.mrb[83].mxu0  ;;  %v4806_v29 = vpop.f32.mrb[99].mxu1 }
 0x728   : > { %v5440_v24 = vmax.f32 %v5438_v0, %v5439_v13  ;;  %v5466_v59 = vmax.f32 %v5464_v17, %v5465_v28  ;;  %v5356_v23 = vmax.f32 %v6624_v54, 0.0  ;;  %v5358_v15 = vmax.f32 %v6656_v55, 0.0 }
 0x729   : > { %v5428_v1 = vrot.slane %v5427_v27, 2  ;;  %v5454_v62 = vrot.slane %v5453_v22, 2  ;;  %v6625_v60 = vadd.f32 %v4578_v25, %v9452_v6  ;;  %v6657_v48 = vadd.f32 %v4804_v42, %v9457_v52 }
 0x72a   : > { %v5441_v2 = vrot.slane %v5440_v24, 2  ;;  %v5467_v4 = vrot.slane %v5466_v59, 2  ;;  %v6626_v21 = vadd.f32 %v4580_v37, %v9461_v47  ;;  %v6658_v7 = vadd.f32 %v4806_v29, %v9466_v41 }
 0x72b   : > { %v5429_v56 = vmax.f32 %v5427_v27, %v5428_v1  ;;  %v5455_v45 = vmax.f32 %v5453_v22, %v5454_v62  ;;  %v5363_v31 = vmax.f32 %v6625_v60, 0.0  ;;  %v5365_v9 = vmax.f32 %v6657_v48, 0.0 }
 0x72c   : > { %v5442_v49 = vmax.f32 %v5440_v24, %v5441_v2  ;;  %v5468_v53 = vmax.f32 %v5466_v59, %v5467_v4  ;;  %v5364_v33 = vmax.f32 %v6626_v21, 0.0  ;;  %v5366_v43 = vmax.f32 %v6658_v7, 0.0  ;;  %v4584_v51 = vpop.f32.mrb[84].mxu0  ;;  %v4810_v61 = vpop.f32.mrb[100].mxu1 }
 0x72d   : > { %v5430_v11 = vrot.slane %v5429_v56, 1  ;;  %v5456_v14 = vrot.slane %v5455_v45, 1  ;;  %v5523_v8 = vmax.f32 %v5355_v38, %v5363_v31  ;;  %v5549_v5 = vmax.f32 %v5357_v19, %v5365_v9  ;;  %v4586_v20 = vpop.f32.mrb[85].mxu0  ;;  %v4812_v26 = vpop.f32.mrb[101].mxu1 }
 0x72e   : > { %v5443_v10 = vrot.slane %v5442_v49, 1  ;;  %v5469_v36 = vrot.slane %v5468_v53, 1  ;;  %v5536_v18 = vmax.f32 %v5356_v23, %v5364_v33  ;;  %v5562_v44 = vmax.f32 %v5358_v15, %v5366_v43  ;;  %v4588_v16 = vpop.f32.mrb[86].mxu0  ;;  %v4814_v35 = vpop.f32.mrb[102].mxu1 }
 0x72f   : > { %v5431_v3 = vmax.f32 %v5429_v56, %v5430_v11  ;;  %v5457_v0 = vmax.f32 %v5455_v45, %v5456_v14  ;;  %v6627_v17 = vadd.f32 %v4584_v51, %v9452_v6  ;;  %v6659_v40 = vadd.f32 %v4810_v61, %v9457_v52  ;;  %v4590_v46 = vpop.f32.mrb[87].mxu0  ;;  %v4816_v50 = vpop.f32.mrb[103].mxu1 }
 0x730   : > { %v5444_v63 = vmax.f32 %v5442_v49, %v5443_v10  ;;  %v5470_v34 = vmax.f32 %v5468_v53, %v5469_v36  ;;  %v6628_v39 = vadd.f32 %v4586_v20, %v9461_v47  ;;  %v6660_v30 = vadd.f32 %v4812_v26, %v9466_v41 }
 0x731   : > { %v5371_v57 = vmax.f32 %v6627_v17, 0.0  ;;  %v5373_v13 = vmax.f32 %v6659_v40, 0.0  ;;  %v6629_v28 = vadd.f32 %v4588_v16, %v9452_v6  ;;  %v6661_v54 = vadd.f32 %v4814_v35, %v9457_v52 }
 0x732   : > { %v5643_v55 = vcombine.low %v5431_v3, %v5444_v63  ;;  %v5644_v25 = vcombine.low %v5457_v0, %v5470_v34  ;;  %v5372_v42 = vmax.f32 %v6628_v39, 0.0  ;;  %v5374_v27 = vmax.f32 %v6660_v30, 0.0 }
 0x733   : > { %v5524_v22 = vmax.f32 %v5523_v8, %v5371_v57  ;;  %v5550_v38 = vmax.f32 %v5549_v5, %v5373_v13  ;;  %v5379_v19 = vmax.f32 %v6629_v28, 0.0  ;;  %v5381_v37 = vmax.f32 %v6661_v54, 0.0 }
 0x734   : > { %v9515_v29 = vrot.slane %v5643_v55, %v9835_v12  ;;  %v9518_v24 = vrot.slane %v5644_v25, %v9835_v12  ;;  %v5537_v59 = vmax.f32 %v5536_v18, %v5372_v42  ;;  %v5563_v23 = vmax.f32 %v5562_v44, %v5374_v27  ;;  %v4594_v15 = vpop.f32.mrb[88].mxu0  ;;  %v4820_v1 = vpop.f32.mrb[104].mxu1 }
 0x735   : > { %v5525_v62 = vmax.f32 %v5524_v22, %v5379_v19  ;;  %v5551_v60 = vmax.f32 %v5550_v38, %v5381_v37  ;;  %v6630_v48 = vadd.f32 %v4590_v46, %v9461_v47  ;;  %v6662_v2 = vadd.f32 %v4816_v50, %v9466_v41  ;;  %v4596_v4 = vpop.f32.mrb[89].mxu0  ;;  %v4822_v21 = vpop.f32.mrb[105].mxu1 }
 0x736   : > { %v5659_v7 = vcombine.low %v9515_v29, %v9518_v24  ;;  %v6631_v56 = vadd.f32 %v4594_v15, %v9452_v6  ;;  %v6663_v45 = vadd.f32 %v4820_v1, %v9457_v52  ;;  %v6632_v31 = vadd.f32 %v4596_v4, %v9461_v47  ;;  %v4598_v9 = vpop.f32.mrb[90].mxu0  ;;  %v4824_v49 = vpop.f32.mrb[106].mxu1 }
 0x737   : > { %v5380_v53 = vmax.f32 %v6630_v48, 0.0  ;;  %v5382_v33 = vmax.f32 %v6662_v2, 0.0  ;;  %v6664_v43 = vadd.f32 %v4822_v21, %v9466_v41  ;;  %v6633_v51 = vadd.f32 %v4598_v9, %v9452_v6  ;;  %v4600_v61 = vpop.f32.mrb[91].mxu0  ;;  %v4826_v11 = vpop.f32.mrb[107].mxu1 }
 0x738   : > { %v5387_v14 = vmax.f32 %v6631_v56, 0.0  ;;  %v5389_v8 = vmax.f32 %v6663_v45, 0.0  ;;  %v5388_v5 = vmax.f32 %v6632_v31, 0.0  ;;  %v6665_v20 = vadd.f32 %v4824_v49, %v9457_v52 }
 0x739   : > { %v5538_v26 = vmax.f32 %v5537_v59, %v5380_v53  ;;  %v5564_v10 = vmax.f32 %v5563_v23, %v5382_v33  ;;  %v5390_v36 = vmax.f32 %v6664_v43, 0.0  ;;  %v5395_v18 = vmax.f32 %v6633_v51, 0.0 }
 0x73a   : > { %v5526_v44 = vmax.f32 %v5525_v62, %v5387_v14  ;;  %v5552_v16 = vmax.f32 %v5551_v60, %v5389_v8  ;;  %v5397_v35 = vmax.f32 %v6665_v20, 0.0  ;;  %v6634_v3 = vadd.f32 %v4600_v61, %v9461_v47 }
 0x73b   : > { %v5539_v0 = vmax.f32 %v5538_v26, %v5388_v5  ;;  %v5565_v17 = vmax.f32 %v5564_v10, %v5390_v36  ;;  %v6666_v40 = vadd.f32 %v4826_v11, %v9466_v41 }
 0x73c   : > { %v5527_v46 = vmax.f32 %v5526_v44, %v5395_v18  ;;  %v5553_v50 = vmax.f32 %v5552_v16, %v5397_v35  ;;  %v5396_v63 = vmax.f32 %v6634_v3, 0.0  ;;  %v4604_v34 = vpop.f32.mrb[92].mxu0  ;;  %v4830_v39 = vpop.f32.mrb[108].mxu1 }
 0x73d   : > { %v5398_v30 = vmax.f32 %v6666_v40, 0.0  ;;  %v6635_v57 = vadd.f32 %v4604_v34, %v9452_v6  ;;  %v6667_v13 = vadd.f32 %v4830_v39, %v9457_v52  ;;  %v4606_v28 = vpop.f32.mrb[93].mxu0  ;;  %v4832_v54 = vpop.f32.mrb[109].mxu1 }
 0x73e   : > { %v5540_v55 = vmax.f32 %v5539_v0, %v5396_v63  ;;  %v6636_v25 = vadd.f32 %v4606_v28, %v9461_v47  ;;  %v6668_v42 = vadd.f32 %v4832_v54, %v9466_v41  ;;  %v4608_v27 = vpop.f32.mrb[94].mxu0  ;;  %v4834_v22 = vpop.f32.mrb[110].mxu1 }
 0x73f   : > { %v5566_v38 = vmax.f32 %v5565_v17, %v5398_v30  ;;  %v5403_v19 = vmax.f32 %v6635_v57, 0.0  ;;  %v5405_v37 = vmax.f32 %v6667_v13, 0.0  ;;  %v6637_v59 = vadd.f32 %v4608_v27, %v9452_v6  ;;  %v4610_v23 = vpop.f32.mrb[95].mxu0  ;;  %v4836_v15 = vpop.f32.mrb[111].mxu1 }
 0x740   : > { %v5404_v1 = vmax.f32 %v6636_v25, 0.0  ;;  %v5406_v62 = vmax.f32 %v6668_v42, 0.0  ;;  %v6669_v60 = vadd.f32 %v4834_v22, %v9457_v52  ;;  %v6638_v48 = vadd.f32 %v4610_v23, %v9461_v47 }
 0x741   : > { %v5528_v2 = vmax.f32 %v5527_v46, %v5403_v19  ;;  %v5554_v4 = vmax.f32 %v5553_v50, %v5405_v37  ;;  %v5411_v21 = vmax.f32 %v6637_v59, 0.0  ;;  %v6670_v56 = vadd.f32 %v4836_v15, %v9466_v41 }
 0x742   : > { %v5541_v45 = vmax.f32 %v5540_v55, %v5404_v1  ;;  %v5567_v31 = vmax.f32 %v5566_v38, %v5406_v62  ;;  %v5413_v9 = vmax.f32 %v6669_v60, 0.0  ;;  %v5412_v49 = vmax.f32 %v6638_v48, 0.0 }
 0x743   : > { %v5529_v53 = vmax.f32 %v5528_v2, %v5411_v21  ;;  %v5414_v33 = vmax.f32 %v6670_v56, 0.0  ;;  %v3085_v22 = vsub.s32 4, %v9881_v32  ;;  %v3093_v38 = vsub.s32 6, %v9881_v32 }
 0x744   : > { %v5555_v6 = vmax.f32 %v5554_v4, %v5413_v9  ;;  %v5542_v43 = vmax.f32 %v5541_v45, %v5412_v49  ;;  %v3089_v19 = vsub.s32 5, %v9881_v32  ;;  %v3097_v37 = vsub.s32 7, %v9881_v32 }
 0x745   : > { %v5530_v51 = vrot.slane %v5529_v53, 4  ;;  %v5568_v61 = vmax.f32 %v5567_v31, %v5414_v33  ;;  %v9555_v59 = vrot.slane %v9448_v58, %v3085_v22  ;;  %v9558_v29 = vrot.slane %v9448_v58, %v3093_v38 }
 0x746   : > { %v5556_v11 = vrot.slane %v5555_v6, 4  ;;  %v5543_v14 = vrot.slane %v5542_v43, 4  ;;  %v9561_v24 = vrot.slane %v9448_v58, %v3089_v19 }
 0x747   : > { %v5531_v52 = vmax.f32 %v5529_v53, %v5530_v51  ;;  %v5569_v8 = vrot.slane %v5568_v61, 4 }
 0x748   : > { %v5557_v47 = vmax.f32 %v5555_v6, %v5556_v11  ;;  %v5544_v5 = vmax.f32 %v5542_v43, %v5543_v14 }
 0x749   : > { %v5532_v20 = vrot.slane %v5531_v52, 2  ;;  %v5570_v26 = vmax.f32 %v5568_v61, %v5569_v8 }
 0x74a   : > { %v5558_v10 = vrot.slane %v5557_v47, 2  ;;  %v5545_v41 = vrot.slane %v5544_v5, 2 }
 0x74b   : > { %v5533_v36 = vmax.f32 %v5531_v52, %v5532_v20  ;;  %v5571_v18 = vrot.slane %v5570_v26, 2 }
 0x74c   : > { %v5559_v44 = vmax.f32 %v5557_v47, %v5558_v10  ;;  %v5546_v16 = vmax.f32 %v5544_v5, %v5545_v41 }
 0x74d   : > { %v5534_v35 = vrot.slane %v5533_v36, 1  ;;  %v5572_v3 = vmax.f32 %v5570_v26, %v5571_v18 }
 0x74e   : > { %v5560_v0 = vrot.slane %v5559_v44, 1  ;;  %v5547_v17 = vrot.slane %v5546_v16, 1 }
 0x74f   : > { %v5535_v40 = vmax.f32 %v5533_v36, %v5534_v35  ;;  %v5573_v46 = vrot.slane %v5572_v3, 1 }
 0x750   : > { %v5561_v50 = vmax.f32 %v5559_v44, %v5560_v0  ;;  %v5548_v63 = vmax.f32 %v5546_v16, %v5547_v17 }
 0x751   : > { %v5574_v34 = vmax.f32 %v5572_v3, %v5573_v46 }
 0x752   : > { %v5677_v39 = vcombine.low %v5535_v40, %v5548_v63 }
 0x753   : > { %v5678_v30 = vcombine.low %v5561_v50, %v5574_v34 }
 0x754   : > { %v5685_v57 = vrot.slane %v5677_v39, %v9835_v12 }
 0x755   : > { %v5692_v13 = vrot.slane %v5678_v30, %v9835_v12 }
 0x757   : > { %v5693_v28 = vcombine.low %v5685_v57, %v5692_v13 }
 0x759   : > { %v5713_v54 = vrot.slane %v5693_v28, 7 }
 0x75b   : > { %v5714_v55 = vsel %vm1558_vm3, %v5713_v54, %v5659_v7  ;;  %v9564_v7 = vrot.slane %v9448_v58, %v3097_v37 }
 0x75c   : > { %v5715_v25 = vsel %vm1560_vm4, %v5713_v54, %v5714_v55 }
 0x75d   : > { %v5716_v42 = vsel %vm1562_vm5, %v5713_v54, %v5715_v25 }
 0x75e   : > { %v5717_v27 = vsel %vm1564_vm6, %v5713_v54, %v5716_v42 }
 0x75f   : > { %5727 = vst [vmem:[%s8383_s21] sm:$0xff] %v5717_v27 }
 0x784   : > { %v4986_v23 = vpop.f32.mrb[96].mxu0  ;;  %v5212_v15 = vpop.f32.mrb[112].mxu1 }
 0x785   : > { %v6671_v1 = vadd.f32 %v4986_v23, %v9555_v59  ;;  %v6703_v62 = vadd.f32 %v5212_v15, %v9558_v29  ;;  %v4988_v60 = vpop.f32.mrb[97].mxu0  ;;  %v5214_v32 = vpop.f32.mrb[113].mxu1 }
 0x786   : > { %v6672_v48 = vadd.f32 %v4988_v60, %v9561_v24  ;;  %v6704_v2 = vadd.f32 %v5214_v32, %v9564_v7  ;;  %v4990_v4 = vpop.f32.mrb[98].mxu0  ;;  %v5216_v21 = vpop.f32.mrb[114].mxu1 }
 0x787   : > { %v6673_v56 = vadd.f32 %v4990_v4, %v9555_v59  ;;  %v6705_v45 = vadd.f32 %v5216_v21, %v9558_v29  ;;  %v4992_v58 = vpop.f32.mrb[99].mxu0  ;;  %v5218_v31 = vpop.f32.mrb[115].mxu1  ;;  %v5295_v53 = vmax.f32 %v6671_v1, 0.0  ;;  %v5297_v33 = vmax.f32 %v6703_v62, 0.0 }
 0x788   : > { %v6674_v9 = vadd.f32 %v4992_v58, %v9561_v24  ;;  %v6706_v49 = vadd.f32 %v5218_v31, %v9564_v7  ;;  %v5296_v51 = vmax.f32 %v6672_v48, 0.0  ;;  %v5298_v61 = vmax.f32 %v6704_v2, 0.0 }
 0x789   : > { %v5303_v6 = vmax.f32 %v6673_v56, 0.0  ;;  %v5305_v43 = vmax.f32 %v6705_v45, 0.0 }
 0x78a   : > { %v5304_v11 = vmax.f32 %v6674_v9, 0.0  ;;  %v5306_v14 = vmax.f32 %v6706_v49, 0.0 }
 0x78b   : > { %v5471_v52 = vmax.f32 %v5295_v53, %v5303_v6  ;;  %v5497_v8 = vmax.f32 %v5297_v33, %v5305_v43 }
 0x78c   : > { %v5484_v47 = vmax.f32 %v5296_v51, %v5304_v11  ;;  %v5510_v5 = vmax.f32 %v5298_v61, %v5306_v14  ;;  %v4996_v20 = vpop.f32.mrb[100].mxu0  ;;  %v5222_v26 = vpop.f32.mrb[116].mxu1 }
 0x78d   : > { %v6675_v10 = vadd.f32 %v4996_v20, %v9555_v59  ;;  %v6707_v41 = vadd.f32 %v5222_v26, %v9558_v29  ;;  %v4998_v36 = vpop.f32.mrb[101].mxu0  ;;  %v5224_v18 = vpop.f32.mrb[117].mxu1 }
 0x78e   : > { %v6676_v44 = vadd.f32 %v4998_v36, %v9561_v24  ;;  %v6708_v16 = vadd.f32 %v5224_v18, %v9564_v7  ;;  %v5000_v35 = vpop.f32.mrb[102].mxu0  ;;  %v5226_v3 = vpop.f32.mrb[118].mxu1 }
 0x78f   : > { %v5311_v0 = vmax.f32 %v6675_v10, 0.0  ;;  %v5313_v17 = vmax.f32 %v6707_v41, 0.0  ;;  %v6677_v40 = vadd.f32 %v5000_v35, %v9555_v59  ;;  %v6709_v46 = vadd.f32 %v5226_v3, %v9558_v29  ;;  %v5002_v50 = vpop.f32.mrb[103].mxu0  ;;  %v5228_v63 = vpop.f32.mrb[119].mxu1 }
 0x790   : > { %v5312_v34 = vmax.f32 %v6676_v44, 0.0  ;;  %v5314_v39 = vmax.f32 %v6708_v16, 0.0  ;;  %v6678_v30 = vadd.f32 %v5002_v50, %v9561_v24  ;;  %v6710_v57 = vadd.f32 %v5228_v63, %v9564_v7 }
 0x791   : > { %v5472_v13 = vmax.f32 %v5471_v52, %v5311_v0  ;;  %v5498_v28 = vmax.f32 %v5497_v8, %v5313_v17  ;;  %v5319_v54 = vmax.f32 %v6677_v40, 0.0  ;;  %v5321_v55 = vmax.f32 %v6709_v46, 0.0 }
 0x792   : > { %v5485_v25 = vmax.f32 %v5484_v47, %v5312_v34  ;;  %v5511_v42 = vmax.f32 %v5510_v5, %v5314_v39  ;;  %v5320_v27 = vmax.f32 %v6678_v30, 0.0  ;;  %v5322_v22 = vmax.f32 %v6710_v57, 0.0 }
 0x793   : > { %v5473_v38 = vmax.f32 %v5472_v13, %v5319_v54  ;;  %v5499_v19 = vmax.f32 %v5498_v28, %v5321_v55 }
 0x794   : > { %v5486_v37 = vmax.f32 %v5485_v25, %v5320_v27  ;;  %v5512_v23 = vmax.f32 %v5511_v42, %v5322_v22  ;;  %v5006_v15 = vpop.f32.mrb[104].mxu0  ;;  %v5232_v1 = vpop.f32.mrb[120].mxu1 }
 0x795   : > { %v6679_v62 = vadd.f32 %v5006_v15, %v9555_v59  ;;  %v6711_v60 = vadd.f32 %v5232_v1, %v9558_v29  ;;  %v5008_v32 = vpop.f32.mrb[105].mxu0  ;;  %v5234_v48 = vpop.f32.mrb[121].mxu1 }
 0x796   : > { %v6680_v2 = vadd.f32 %v5008_v32, %v9561_v24  ;;  %v6712_v4 = vadd.f32 %v5234_v48, %v9564_v7  ;;  %v5010_v21 = vpop.f32.mrb[106].mxu0  ;;  %v5236_v56 = vpop.f32.mrb[122].mxu1 }
 0x797   : > { %v5327_v45 = vmax.f32 %v6679_v62, 0.0  ;;  %v5329_v58 = vmax.f32 %v6711_v60, 0.0  ;;  %v6681_v31 = vadd.f32 %v5010_v21, %v9555_v59  ;;  %v6713_v9 = vadd.f32 %v5236_v56, %v9558_v29  ;;  %v5012_v49 = vpop.f32.mrb[107].mxu0  ;;  %v5238_v53 = vpop.f32.mrb[123].mxu1 }
 0x798   : > { %v5328_v33 = vmax.f32 %v6680_v2, 0.0  ;;  %v5330_v6 = vmax.f32 %v6712_v4, 0.0  ;;  %v6682_v43 = vadd.f32 %v5012_v49, %v9561_v24  ;;  %v6714_v51 = vadd.f32 %v5238_v53, %v9564_v7 }
 0x799   : > { %v5474_v61 = vmax.f32 %v5473_v38, %v5327_v45  ;;  %v5500_v11 = vmax.f32 %v5499_v19, %v5329_v58  ;;  %v5335_v14 = vmax.f32 %v6681_v31, 0.0  ;;  %v5337_v52 = vmax.f32 %v6713_v9, 0.0 }
 0x79a   : > { %v5487_v8 = vmax.f32 %v5486_v37, %v5328_v33  ;;  %v5513_v47 = vmax.f32 %v5512_v23, %v5330_v6  ;;  %v5336_v5 = vmax.f32 %v6682_v43, 0.0  ;;  %v5338_v20 = vmax.f32 %v6714_v51, 0.0 }
 0x79b   : > { %v5475_v26 = vmax.f32 %v5474_v61, %v5335_v14  ;;  %v5501_v10 = vmax.f32 %v5500_v11, %v5337_v52 }
 0x79c   : > { %v5488_v41 = vmax.f32 %v5487_v8, %v5336_v5  ;;  %v5514_v36 = vmax.f32 %v5513_v47, %v5338_v20  ;;  %v5016_v18 = vpop.f32.mrb[108].mxu0  ;;  %v5242_v44 = vpop.f32.mrb[124].mxu1 }
 0x79d   : > { %v6683_v16 = vadd.f32 %v5016_v18, %v9555_v59  ;;  %v6715_v35 = vadd.f32 %v5242_v44, %v9558_v29  ;;  %v5018_v3 = vpop.f32.mrb[109].mxu0  ;;  %v5244_v0 = vpop.f32.mrb[125].mxu1 }
 0x79e   : > { %v6684_v17 = vadd.f32 %v5018_v3, %v9561_v24  ;;  %v6716_v40 = vadd.f32 %v5244_v0, %v9564_v7  ;;  %v5020_v46 = vpop.f32.mrb[110].mxu0  ;;  %v5246_v50 = vpop.f32.mrb[126].mxu1 }
 0x79f   : > { %v5343_v63 = vmax.f32 %v6683_v16, 0.0  ;;  %v5345_v34 = vmax.f32 %v6715_v35, 0.0  ;;  %v6685_v39 = vadd.f32 %v5020_v46, %v9555_v59  ;;  %v6717_v30 = vadd.f32 %v5246_v50, %v9558_v29  ;;  %v5022_v57 = vpop.f32.mrb[111].mxu0  ;;  %v5248_v13 = vpop.f32.mrb[127].mxu1 }
 0x7a0   : > { %v5344_v28 = vmax.f32 %v6684_v17, 0.0  ;;  %v5346_v54 = vmax.f32 %v6716_v40, 0.0  ;;  %v6686_v55 = vadd.f32 %v5022_v57, %v9561_v24  ;;  %v6718_v25 = vadd.f32 %v5248_v13, %v9564_v7 }
 0x7a1   : > { %v5476_v42 = vmax.f32 %v5475_v26, %v5343_v63  ;;  %v5502_v27 = vmax.f32 %v5501_v10, %v5345_v34  ;;  %v5351_v22 = vmax.f32 %v6685_v39, 0.0  ;;  %v5353_v38 = vmax.f32 %v6717_v30, 0.0 }
 0x7a2   : > { %v5489_v19 = vmax.f32 %v5488_v41, %v5344_v28  ;;  %v5515_v37 = vmax.f32 %v5514_v36, %v5346_v54  ;;  %v5352_v23 = vmax.f32 %v6686_v55, 0.0  ;;  %v5354_v15 = vmax.f32 %v6718_v25, 0.0 }
 0x7a3   : > { %v5477_v1 = vmax.f32 %v5476_v42, %v5351_v22  ;;  %v5503_v62 = vmax.f32 %v5502_v27, %v5353_v38 }
 0x7a4   : > { %v5490_v60 = vmax.f32 %v5489_v19, %v5352_v23  ;;  %v5516_v32 = vmax.f32 %v5515_v37, %v5354_v15  ;;  %v5026_v48 = vpop.f32.mrb[112].mxu0  ;;  %v5252_v2 = vpop.f32.mrb[128].mxu1 }
 0x7a5   : > { %v5478_v4 = vrot.slane %v5477_v1, 4  ;;  %v5504_v21 = vrot.slane %v5503_v62, 4  ;;  %v6687_v56 = vadd.f32 %v5026_v48, %v9555_v59  ;;  %v6719_v45 = vadd.f32 %v5252_v2, %v9558_v29  ;;  %v5028_v58 = vpop.f32.mrb[113].mxu0  ;;  %v5254_v31 = vpop.f32.mrb[129].mxu1 }
 0x7a6   : > { %v5491_v9 = vrot.slane %v5490_v60, 4  ;;  %v5517_v49 = vrot.slane %v5516_v32, 4  ;;  %v6688_v53 = vadd.f32 %v5028_v58, %v9561_v24  ;;  %v6720_v33 = vadd.f32 %v5254_v31, %v9564_v7  ;;  %v5030_v6 = vpop.f32.mrb[114].mxu0  ;;  %v5256_v43 = vpop.f32.mrb[130].mxu1 }
 0x7a7   : > { %v5479_v51 = vmax.f32 %v5477_v1, %v5478_v4  ;;  %v5505_v61 = vmax.f32 %v5503_v62, %v5504_v21  ;;  %v5359_v11 = vmax.f32 %v6687_v56, 0.0  ;;  %v5361_v14 = vmax.f32 %v6719_v45, 0.0  ;;  %v5032_v52 = vpop.f32.mrb[115].mxu0  ;;  %v5258_v8 = vpop.f32.mrb[131].mxu1 }
 0x7a8   : > { %v5492_v47 = vmax.f32 %v5490_v60, %v5491_v9  ;;  %v5518_v5 = vmax.f32 %v5516_v32, %v5517_v49  ;;  %v5360_v20 = vmax.f32 %v6688_v53, 0.0  ;;  %v5362_v26 = vmax.f32 %v6720_v33, 0.0 }
 0x7a9   : > { %v5480_v10 = vrot.slane %v5479_v51, 2  ;;  %v5506_v41 = vrot.slane %v5505_v61, 2  ;;  %v6689_v36 = vadd.f32 %v5030_v6, %v9555_v59  ;;  %v6721_v18 = vadd.f32 %v5256_v43, %v9558_v29 }
 0x7aa   : > { %v5493_v44 = vrot.slane %v5492_v47, 2  ;;  %v5519_v16 = vrot.slane %v5518_v5, 2  ;;  %v6690_v35 = vadd.f32 %v5032_v52, %v9561_v24  ;;  %v6722_v3 = vadd.f32 %v5258_v8, %v9564_v7 }
 0x7ab   : > { %v5481_v0 = vmax.f32 %v5479_v51, %v5480_v10  ;;  %v5507_v17 = vmax.f32 %v5505_v61, %v5506_v41  ;;  %v5367_v40 = vmax.f32 %v6689_v36, 0.0  ;;  %v5369_v46 = vmax.f32 %v6721_v18, 0.0 }
 0x7ac   : > { %v5494_v50 = vmax.f32 %v5492_v47, %v5493_v44  ;;  %v5520_v63 = vmax.f32 %v5518_v5, %v5519_v16  ;;  %v5368_v34 = vmax.f32 %v6690_v35, 0.0  ;;  %v5370_v39 = vmax.f32 %v6722_v3, 0.0  ;;  %v5036_v30 = vpop.f32.mrb[116].mxu0  ;;  %v5262_v57 = vpop.f32.mrb[132].mxu1 }
 0x7ad   : > { %v5482_v13 = vrot.slane %v5481_v0, 1  ;;  %v5508_v28 = vrot.slane %v5507_v17, 1  ;;  %v5575_v54 = vmax.f32 %v5359_v11, %v5367_v40  ;;  %v5601_v55 = vmax.f32 %v5361_v14, %v5369_v46  ;;  %v5038_v25 = vpop.f32.mrb[117].mxu0  ;;  %v5264_v42 = vpop.f32.mrb[133].mxu1 }
 0x7ae   : > { %v5495_v27 = vrot.slane %v5494_v50, 1  ;;  %v5521_v22 = vrot.slane %v5520_v63, 1  ;;  %v5588_v38 = vmax.f32 %v5360_v20, %v5368_v34  ;;  %v5614_v19 = vmax.f32 %v5362_v26, %v5370_v39  ;;  %v5040_v37 = vpop.f32.mrb[118].mxu0  ;;  %v5266_v23 = vpop.f32.mrb[134].mxu1 }
 0x7af   : > { %v5483_v15 = vmax.f32 %v5481_v0, %v5482_v13  ;;  %v5509_v1 = vmax.f32 %v5507_v17, %v5508_v28  ;;  %v6691_v62 = vadd.f32 %v5036_v30, %v9555_v59  ;;  %v6723_v60 = vadd.f32 %v5262_v57, %v9558_v29  ;;  %v5042_v32 = vpop.f32.mrb[119].mxu0  ;;  %v5268_v48 = vpop.f32.mrb[135].mxu1 }
 0x7b0   : > { %v5496_v2 = vmax.f32 %v5494_v50, %v5495_v27  ;;  %v5522_v4 = vmax.f32 %v5520_v63, %v5521_v22  ;;  %v6692_v21 = vadd.f32 %v5038_v25, %v9561_v24  ;;  %v6724_v56 = vadd.f32 %v5264_v42, %v9564_v7 }
 0x7b1   : > { %v5375_v45 = vmax.f32 %v6691_v62, 0.0  ;;  %v5377_v58 = vmax.f32 %v6723_v60, 0.0  ;;  %v6693_v31 = vadd.f32 %v5040_v37, %v9555_v59  ;;  %v6725_v9 = vadd.f32 %v5266_v23, %v9558_v29 }
 0x7b2   : > { %v5660_v49 = vcombine.low %v5483_v15, %v5496_v2  ;;  %v5661_v53 = vcombine.low %v5509_v1, %v5522_v4  ;;  %v5376_v33 = vmax.f32 %v6692_v21, 0.0  ;;  %v5378_v6 = vmax.f32 %v6724_v56, 0.0 }
 0x7b3   : > { %v5576_v43 = vmax.f32 %v5575_v54, %v5375_v45  ;;  %v5602_v51 = vmax.f32 %v5601_v55, %v5377_v58  ;;  %v5383_v61 = vmax.f32 %v6693_v31, 0.0  ;;  %v5385_v11 = vmax.f32 %v6725_v9, 0.0 }
 0x7b4   : > { %v9613_v14 = vrot.slane %v5660_v49, %v9835_v12  ;;  %v9616_v52 = vrot.slane %v5661_v53, %v9835_v12  ;;  %v5589_v8 = vmax.f32 %v5588_v38, %v5376_v33  ;;  %v5615_v47 = vmax.f32 %v5614_v19, %v5378_v6  ;;  %v5046_v5 = vpop.f32.mrb[120].mxu0  ;;  %v5272_v20 = vpop.f32.mrb[136].mxu1 }
 0x7b5   : > { %v5577_v26 = vmax.f32 %v5576_v43, %v5383_v61  ;;  %v5603_v10 = vmax.f32 %v5602_v51, %v5385_v11  ;;  %v6694_v41 = vadd.f32 %v5042_v32, %v9561_v24  ;;  %v6726_v36 = vadd.f32 %v5268_v48, %v9564_v7  ;;  %v5048_v18 = vpop.f32.mrb[121].mxu0  ;;  %v5274_v44 = vpop.f32.mrb[137].mxu1 }
 0x7b6   : > { %v5676_v16 = vcombine.low %v9613_v14, %v9616_v52  ;;  %v6695_v35 = vadd.f32 %v5046_v5, %v9555_v59  ;;  %v6727_v3 = vadd.f32 %v5272_v20, %v9558_v29  ;;  %v6696_v0 = vadd.f32 %v5048_v18, %v9561_v24  ;;  %v5050_v17 = vpop.f32.mrb[122].mxu0  ;;  %v5276_v40 = vpop.f32.mrb[138].mxu1 }
 0x7b7   : > { %v5384_v46 = vmax.f32 %v6694_v41, 0.0  ;;  %v5386_v50 = vmax.f32 %v6726_v36, 0.0  ;;  %v6728_v63 = vadd.f32 %v5274_v44, %v9564_v7  ;;  %v6697_v34 = vadd.f32 %v5050_v17, %v9555_v59  ;;  %v5052_v39 = vpop.f32.mrb[123].mxu0  ;;  %v5278_v30 = vpop.f32.mrb[139].mxu1 }
 0x7b8   : > { %v5391_v57 = vmax.f32 %v6695_v35, 0.0  ;;  %v5393_v13 = vmax.f32 %v6727_v3, 0.0  ;;  %v5392_v28 = vmax.f32 %v6696_v0, 0.0  ;;  %v6729_v54 = vadd.f32 %v5276_v40, %v9558_v29 }
 0x7b9   : > { %v5590_v55 = vmax.f32 %v5589_v8, %v5384_v46  ;;  %v5616_v25 = vmax.f32 %v5615_v47, %v5386_v50  ;;  %v5394_v42 = vmax.f32 %v6728_v63, 0.0  ;;  %v5399_v27 = vmax.f32 %v6697_v34, 0.0 }
 0x7ba   : > { %v5578_v22 = vmax.f32 %v5577_v26, %v5391_v57  ;;  %v5604_v38 = vmax.f32 %v5603_v10, %v5393_v13  ;;  %v5401_v19 = vmax.f32 %v6729_v54, 0.0  ;;  %v6698_v37 = vadd.f32 %v5052_v39, %v9561_v24 }
 0x7bb   : > { %v5591_v23 = vmax.f32 %v5590_v55, %v5392_v28  ;;  %v5617_v15 = vmax.f32 %v5616_v25, %v5394_v42  ;;  %v6730_v1 = vadd.f32 %v5278_v30, %v9564_v7 }
 0x7bc   : > { %v5579_v62 = vmax.f32 %v5578_v22, %v5399_v27  ;;  %v5605_v60 = vmax.f32 %v5604_v38, %v5401_v19  ;;  %v5400_v32 = vmax.f32 %v6698_v37, 0.0  ;;  %v5056_v48 = vpop.f32.mrb[124].mxu0  ;;  %v5282_v2 = vpop.f32.mrb[140].mxu1 }
 0x7bd   : > { %v5402_v4 = vmax.f32 %v6730_v1, 0.0  ;;  %v6699_v21 = vadd.f32 %v5056_v48, %v9555_v59  ;;  %v6731_v56 = vadd.f32 %v5282_v2, %v9558_v29  ;;  %v5058_v45 = vpop.f32.mrb[125].mxu0  ;;  %v5284_v58 = vpop.f32.mrb[141].mxu1 }
 0x7be   : > { %v5592_v31 = vmax.f32 %v5591_v23, %v5400_v32  ;;  %v6700_v9 = vadd.f32 %v5058_v45, %v9561_v24  ;;  %v6732_v49 = vadd.f32 %v5284_v58, %v9564_v7  ;;  %v5060_v53 = vpop.f32.mrb[126].mxu0  ;;  %v5286_v33 = vpop.f32.mrb[142].mxu1 }
 0x7bf   : > { %v5618_v6 = vmax.f32 %v5617_v15, %v5402_v4  ;;  %v5407_v43 = vmax.f32 %v6699_v21, 0.0  ;;  %v5409_v51 = vmax.f32 %v6731_v56, 0.0  ;;  %v6701_v61 = vadd.f32 %v5060_v53, %v9555_v59  ;;  %v5062_v11 = vpop.f32.mrb[127].mxu0  ;;  %v5288_v8 = vpop.f32.mrb[143].mxu1 }
 0x7c0   : > { %v5408_v47 = vmax.f32 %v6700_v9, 0.0  ;;  %v5410_v5 = vmax.f32 %v6732_v49, 0.0  ;;  %v6733_v20 = vadd.f32 %v5286_v33, %v9558_v29  ;;  %v6702_v26 = vadd.f32 %v5062_v11, %v9561_v24 }
 0x7c1   : > { %v5580_v10 = vmax.f32 %v5579_v62, %v5407_v43  ;;  %v5606_v41 = vmax.f32 %v5605_v60, %v5409_v51  ;;  %v5415_v36 = vmax.f32 %v6701_v61, 0.0  ;;  %v6734_v18 = vadd.f32 %v5288_v8, %v9564_v7 }
 0x7c2   : > { %v5593_v44 = vmax.f32 %v5592_v31, %v5408_v47  ;;  %v5619_v35 = vmax.f32 %v5618_v6, %v5410_v5  ;;  %v5417_v3 = vmax.f32 %v6733_v20, 0.0  ;;  %v5416_v0 = vmax.f32 %v6702_v26, 0.0 }
 0x7c3   : > { %v5581_v17 = vmax.f32 %v5580_v10, %v5415_v36  ;;  %v5418_v40 = vmax.f32 %v6734_v18, 0.0 }
 0x7c4   : > { %v5607_v59 = vmax.f32 %v5606_v41, %v5417_v3  ;;  %v5594_v46 = vmax.f32 %v5593_v44, %v5416_v0 }
 0x7c5   : > { %v5582_v50 = vrot.slane %v5581_v17, 4  ;;  %v5620_v63 = vmax.f32 %v5619_v35, %v5418_v40 }
 0x7c6   : > { %v5608_v34 = vrot.slane %v5607_v59, 4  ;;  %v5595_v39 = vrot.slane %v5594_v46, 4 }
 0x7c7   : > { %v5583_v29 = vmax.f32 %v5581_v17, %v5582_v50  ;;  %v5621_v30 = vrot.slane %v5620_v63, 4 }
 0x7c8   : > { %v5609_v24 = vmax.f32 %v5607_v59, %v5608_v34  ;;  %v5596_v57 = vmax.f32 %v5594_v46, %v5595_v39 }
 0x7c9   : > { %v5584_v13 = vrot.slane %v5583_v29, 2  ;;  %v5622_v28 = vmax.f32 %v5620_v63, %v5621_v30 }
 0x7ca   : > { %v5610_v54 = vrot.slane %v5609_v24, 2  ;;  %v5597_v7 = vrot.slane %v5596_v57, 2 }
 0x7cb   : > { %v5585_v55 = vmax.f32 %v5583_v29, %v5584_v13  ;;  %v5623_v25 = vrot.slane %v5622_v28, 2 }
 0x7cc   : > { %v5611_v42 = vmax.f32 %v5609_v24, %v5610_v54  ;;  %v5598_v27 = vmax.f32 %v5596_v57, %v5597_v7 }
 0x7cd   : > { %v5586_v22 = vrot.slane %v5585_v55, 1  ;;  %v5624_v38 = vmax.f32 %v5622_v28, %v5623_v25 }
 0x7ce   : > { %v5612_v19 = vrot.slane %v5611_v42, 1  ;;  %v5599_v37 = vrot.slane %v5598_v27, 1 }
 0x7cf   : > { %v5587_v23 = vmax.f32 %v5585_v55, %v5586_v22  ;;  %v5625_v15 = vrot.slane %v5624_v38, 1 }
 0x7d0   : > { %v5613_v1 = vmax.f32 %v5611_v42, %v5612_v19  ;;  %v5600_v62 = vmax.f32 %v5598_v27, %v5599_v37 }
 0x7d1   : > { %v5626_v60 = vmax.f32 %v5624_v38, %v5625_v15 }
 0x7d2   : > { %v5694_v32 = vcombine.low %v5587_v23, %v5600_v62 }
 0x7d3   : > { %v5695_v48 = vcombine.low %v5613_v1, %v5626_v60 }
 0x7d4   : > { %v5702_v2 = vrot.slane %v5694_v32, %v9835_v12 }
 0x7d5   : > { %v5709_v4 = vrot.slane %v5695_v48, %v9835_v12 }
 0x7d7   : > { %v5710_v21 = vcombine.low %v5702_v2, %v5709_v4 }
 0x7d9   : > { %v5720_v56 = vrot.slane %v5710_v21, 7 }
 0x7db   : > { %v5721_v45 = vsel %vm1558_vm3, %v5720_v56, %v5676_v16 }
 0x7dc   : > { %v5722_v58 = vsel %vm1560_vm4, %v5720_v56, %v5721_v45 }
 0x7dd   : > { %v5723_v31 = vsel %vm1562_vm5, %v5720_v56, %v5722_v58 }
 0x7de   : > { %v5724_v9 = vsel %vm1564_vm6, %v5720_v56, %v5723_v31 }
 0x7df   : > { %5728 = vst [vmem:[%s8383_s21 + $0x8] sm:$0xff] %v5724_v9 }
 0x7e0 PF: > { %s9885_s16 = sld [smem:[#allocation30_spill]]  ;;  %s9886_s1 = sld [smem:[#allocation28_spill]] }
 0x7e1   : > { %s9887_s15 = sld [smem:[#allocation31_spill]]  ;;  %s9888_s29 = smov %s7515_s30 }
 0x7e6   : > { %p43_p4 = scmp.ge.s32.totalorder %s9885_s16, 5   ;;  %s9889_s30 = smov %s9886_s1 }
 0x7e8   :  { %45 = sbr.rel (!%p43_p4) target bundleno = 22 (0x16), region = 260 }
 0x7ef   :  { %5766 = vsyncpa [#allocation3], 1 }
 0x7f0   :  { %5768 = vsyncpa [#allocation3 + $0x1], 1 }
 0x7f1   :  { %5769 = vsyncpa [#allocation5], 1 }
 0x7f2   :  { %5771 = vsyncpa [#allocation5 + $0x1], 1 }
 0x7f3   :  { %5772 = vsyncpa [#allocation8], 1 }
 0x7f4   :  { %5774 = vsyncpa [#allocation8 + $0x1], 1 }
 0x7f5   :  { %5775 = vsyncpa [#allocation11], 1 }
 0x7f6   :  { %5777 = vsyncpa [#allocation11 + $0x1], 1 }
 0x7f7   :  { %5778 = vsyncpa [#allocation14], 1 }
 0x7f8   :  { %5780 = vsyncpa [#allocation14 + $0x1], 1 }
 0x7f9   :  { %5781 = vsyncpa [#allocation17], 1 }
 0x7fa   :  { %5783 = vsyncpa [#allocation17 + $0x1], 1 }
 0x7fb   :  { %5784 = vsyncpa [#allocation20], 1 }
 0x7fc   :  { %5786 = vsyncpa [#allocation20 + $0x1], 1 }

</bundles_post_ra>
